<compile_context>
chip_gen: v5e
topology: v5e:2x2
jax: 0.10.0
libtpu: 0.0.40
codegen_flags: <defaults>
</compile_context>

<pallas_src>
import functools

import jax
import jax.numpy as jnp
import numpy as np
from jax import lax
from jax.experimental import pallas as pl
from jax.experimental.pallas import tpu as pltpu


# -----------------------------------------------------------------------------
# Fused RDB-5C kernel (one batch element per grid step)
# -----------------------------------------------------------------------------
def _rdb5c_kernel(x_ref,
                  w1_ref, w2_ref, w3_ref, w4_ref, w5_ref,
                  b1_ref, b2_ref, b3_ref, b4_ref, b5_ref,
                  o_ref, act_ref, *, nf, gc, H, W, neg_slope):
    # x_ref   : (1, nf, H*W)             input image, spatially flattened
    # wk_ref  : (3, 3, Cout_k, Cin_k)    conv-k weights, tap-major
    # bk_ref  : (Cout_k, 1)              conv-k bias
    # o_ref   : (1, nf, H*W)             output block
    # act_ref : (nf+4*gc, (H+2)*W + 2)   f32 scratch: row-padded, flattened
    #                                    activations [x | x1 | x2 | x3 | x4]
    HW = H * W
    off = 1 + W                          # flat offset of spatial (0, 0)

    # Zero the scratch: this provides the top/bottom zero-padding rows and the
    # +/-1 sentinel elements used by the corner taps.
    act_ref[...] = jnp.zeros_like(act_ref)

    x = x_ref[0].astype(jnp.float32)     # (nf, HW)
    act_ref[0:nf, off:off + HW] = x

    # Column-edge masks: tap dx=0 reads column w-1 (invalid at w==0),
    # tap dx=2 reads column w+1 (invalid at w==W-1).  Shared by all layers.
    col = lax.rem(lax.broadcasted_iota(jnp.int32, (1, HW), 1), W)
    mask_dx = {
        0: (col != 0).astype(jnp.float32),
        2: (col != (W - 1)).astype(jnp.float32),
    }

    def conv3x3(ci, w_ref, b_ref, cout):
        # (cout, HW) = bias + sum over 9 taps of (cout, ci) @ (ci, HW)
        acc = jnp.broadcast_to(b_ref[...].astype(jnp.float32), (cout, HW))
        for dy in range(3):
            for dx in range(3):
                start = dy * W + dx      # contiguous flat slice for this tap
                patch = act_ref[0:ci, start:start + HW]
                if dx != 1:
                    patch = patch * mask_dx[dx]
                acc = acc + jnp.dot(w_ref[dy, dx], patch,
                                    preferred_element_type=jnp.float32)
        return acc

    # conv1..conv4 (+ LeakyReLU); each result is appended as new channels of
    # the activation buffer -> the "concatenation" is free.
    w_refs = (w1_ref, w2_ref, w3_ref, w4_ref)
    b_refs = (b1_ref, b2_ref, b3_ref, b4_ref)
    for i in range(4):
        ci = nf + i * gc                 # channels visible to this conv
        y = conv3x3(ci, w_refs[i], b_refs[i], gc)
        y = jnp.where(y >= 0.0, y, y * neg_slope)
        act_ref[ci:ci + gc, off:off + HW] = y

    # conv5 (no activation) + residual scaling
    x5 = conv3x3(nf + 4 * gc, w5_ref, b5_ref, nf)
    o_ref[0] = (x5 * 0.2 + x).astype(o_ref.dtype)


def rdb5c_forward(x_nchw, params, *, neg_slope=0.2,
                  vmem_limit_bytes=64 * 1024 * 1024):
    """ResidualDenseBlock_5C forward. x_nchw: (N, nf, H, W), PyTorch layout."""
    N, nf, H, W = x_nchw.shape
    gc = params["w1"].shape[0]
    HW = H * W
    c_tot = nf + 4 * gc
    act_len = (H + 2) * W + 2

    # NCHW -> (N, C, H*W): pure reshape, no data movement / transpose.
    x_flat = x_nchw.reshape(N, nf, HW)

    # PyTorch OIHW (Cout, Cin, 3, 3) -> tap-major (3, 3, Cout, Cin)
    ws = [jnp.transpose(params[f"w{k}"], (2, 3, 0, 1)) for k in range(1, 6)]
    bs = [params[f"b{k}"].reshape(-1, 1) for k in range(1, 6)]

    kernel = functools.partial(_rdb5c_kernel, nf=nf, gc=gc, H=H, W=W,
                               neg_slope=neg_slope)

    w_specs = [pl.BlockSpec(w.shape, lambda n: (0, 0, 0, 0)) for w in ws]
    b_specs = [pl.BlockSpec(b.shape, lambda n: (0, 0)) for b in bs]

    out_flat = pl.pallas_call(
        kernel,
        out_shape=jax.ShapeDtypeStruct((N, nf, HW), x_nchw.dtype),
        grid=(N,),
        in_specs=[pl.BlockSpec((1, nf, HW), lambda n: (n, 0, 0))]
                 + w_specs + b_specs,
        out_specs=pl.BlockSpec((1, nf, HW), lambda n: (n, 0, 0)),
        scratch_shapes=[pltpu.VMEM((c_tot, act_len), jnp.float32)],
        compiler_params=pltpu.CompilerParams(
            dimension_semantics=("parallel",),
            vmem_limit_bytes=vmem_limit_bytes),
    )(x_flat, *ws, *bs)

    return out_flat.reshape(N, nf, H, W)


# -----------------------------------------------------------------------------
# Pure-JAX reference (lax.conv) for correctness checking
# -----------------------------------------------------------------------------
def _rdb5c_ref(x_nchw, params, *, neg_slope=0.2):
    def conv(x, w, b):
        y = lax.conv_general_dilated(
            x, w, window_strides=(1, 1), padding=((1, 1), (1, 1)),
            dimension_numbers=("NCHW", "OIHW", "NCHW"))
        return y + b.reshape(1, -1, 1, 1)

    lrelu = lambda t: jnp.where(t >= 0, t, t * neg_slope)
    x = x_nchw
    x1 = lrelu(conv(x, params["w1"], params["b1"]))
    x2 = lrelu(conv(jnp.concatenate([x, x1], 1), params["w2"], params["b2"]))
    x3 = lrelu(conv(jnp.concatenate([x, x1, x2], 1), params["w3"], params["b3"]))
    x4 = lrelu(conv(jnp.concatenate([x, x1, x2, x3], 1), params["w4"], params["b4"]))
    x5 = conv(jnp.concatenate([x, x1, x2, x3, x4], 1), params["w5"], params["b5"])
    return x5 * 0.2 + x


# -----------------------------------------------------------------------------
# Deterministic parameter construction (PyTorch OIHW layout)
# -----------------------------------------------------------------------------
def make_rdb5c_params(key, nf, gc, dtype=jnp.float32):
    in_chs = [nf, nf + gc, nf + 2 * gc, nf + 3 * gc, nf + 4 * gc]
    out_chs = [gc, gc, gc, gc, nf]
    p = {}
    for i, (ci, co) in enumerate(zip(in_chs, out_chs), start=1):
        key, kw, kb = jax.random.split(key, 3)
        p[f"w{i}"] = jax.random.normal(kw, (co, ci, 3, 3), dtype) * 0.1
        p[f"b{i}"] = jax.random.normal(kb, (co,), dtype) * 0.01
    return p


# -----------------------------------------------------------------------------
if __name__ == "__main__":
    nf, gc = 16, 8           # small, sublane-aligned stand-ins for (64, 32)
    N, H, W = 2, 16, 16

    key = jax.random.PRNGKey(0)
    key, kx = jax.random.split(key)
    x_nchw = jax.random.normal(kx, (N, nf, H, W), jnp.float32)  # NCHW

    params = make_rdb5c_params(key, nf, gc)

    out = jax.block_until_ready(rdb5c_forward(x_nchw, params))

    # Correctness check against an independent lax.conv reference.
    ref = jax.block_until_ready(_rdb5c_ref(x_nchw, params))
    np.testing.assert_allclose(np.asarray(out), np.asarray(ref),
                               rtol=1e-3, atol=1e-3)
    assert out.shape == x_nchw.shape and out.dtype == x_nchw.dtype

    print("KERNEL_OK")
</pallas_src>

<mosaic_0001>
module attributes {stable_mosaic.version = 11 : i64} {
  func.func @_rdb5c_kernel(%arg0: i32, %arg1: memref<1x16x256xf32, #tpu.memory_space<vmem>>, %arg2: memref<3x3x8x16xf32, #tpu.memory_space<vmem>>, %arg3: memref<3x3x8x24xf32, #tpu.memory_space<vmem>>, %arg4: memref<3x3x8x32xf32, #tpu.memory_space<vmem>>, %arg5: memref<3x3x8x40xf32, #tpu.memory_space<vmem>>, %arg6: memref<3x3x16x48xf32, #tpu.memory_space<vmem>>, %arg7: memref<8x1xf32, #tpu.memory_space<vmem>>, %arg8: memref<8x1xf32, #tpu.memory_space<vmem>>, %arg9: memref<8x1xf32, #tpu.memory_space<vmem>>, %arg10: memref<8x1xf32, #tpu.memory_space<vmem>>, %arg11: memref<16x1xf32, #tpu.memory_space<vmem>>, %arg12: memref<1x16x256xf32, #tpu.memory_space<vmem>>, %arg13: memref<48x290xf32, #tpu.memory_space<vmem>>) attributes {dimension_semantics = [#tpu.dimension_semantics<parallel>], iteration_bounds = array<i64: 2>, scalar_prefetch = 0 : i64, scratch_operands = 1 : i64, tpu.core_type = #tpu.core_type<tc>, window_params = [{transform_indices = @transform_0, window_bounds = array<i64: 1, 16, 256>}, {pipeline_mode = #tpu.pipeline_mode<synchronous>, transform_indices = @transform_1, window_bounds = array<i64: 3, 3, 8, 16>}, {pipeline_mode = #tpu.pipeline_mode<synchronous>, transform_indices = @transform_2, window_bounds = array<i64: 3, 3, 8, 24>}, {pipeline_mode = #tpu.pipeline_mode<synchronous>, transform_indices = @transform_3, window_bounds = array<i64: 3, 3, 8, 32>}, {pipeline_mode = #tpu.pipeline_mode<synchronous>, transform_indices = @transform_4, window_bounds = array<i64: 3, 3, 8, 40>}, {pipeline_mode = #tpu.pipeline_mode<synchronous>, transform_indices = @transform_5, window_bounds = array<i64: 3, 3, 16, 48>}, {pipeline_mode = #tpu.pipeline_mode<synchronous>, transform_indices = @transform_6, window_bounds = array<i64: 8, 1>}, {pipeline_mode = #tpu.pipeline_mode<synchronous>, transform_indices = @transform_7, window_bounds = array<i64: 8, 1>}, {pipeline_mode = #tpu.pipeline_mode<synchronous>, transform_indices = @transform_8, window_bounds = array<i64: 8, 1>}, {pipeline_mode = #tpu.pipeline_mode<synchronous>, transform_indices = @transform_9, window_bounds = array<i64: 8, 1>}, {pipeline_mode = #tpu.pipeline_mode<synchronous>, transform_indices = @transform_10, window_bounds = array<i64: 16, 1>}, {transform_indices = @transform_11, window_bounds = array<i64: 1, 16, 256>}]} {
    %cst = arith.constant 0.000000e+00 : f32
    %0 = vector.broadcast %cst : f32 to vector<48x290xf32>
    %c0 = arith.constant 0 : index
    %c0_0 = arith.constant 0 : index
    %1 = vector.load %arg13[%c0, %c0_0] : memref<48x290xf32, #tpu.memory_space<vmem>>, vector<48x290xf32>
    tpu.vector_store %arg13[%c0, %c0_0], %0 {strides = array<i32>} : memref<48x290xf32, #tpu.memory_space<vmem>>, vector<48x290xf32>,
    %c0_1 = arith.constant 0 : index
    %c0_2 = arith.constant 0 : index
    %c0_3 = arith.constant 0 : index
    %2 = vector.load %arg1[%c0_1, %c0_2, %c0_3] : memref<1x16x256xf32, #tpu.memory_space<vmem>>, vector<1x16x256xf32>
    %3 = vector.shape_cast %2 : vector<1x16x256xf32> to vector<16x256xf32>
    %c0_4 = arith.constant 0 : index
    %c17 = arith.constant 17 : index
    %4 = vector.load %arg13[%c0_4, %c17] : memref<48x290xf32, #tpu.memory_space<vmem>>, vector<16x256xf32>
    tpu.vector_store %arg13[%c0_4, %c17], %3 {strides = array<i32>} : memref<48x290xf32, #tpu.memory_space<vmem>>, vector<16x256xf32>,
    %5 = tpu.iota {dimensions = array<i32: 1>} : vector<1x256xi32>
    %c16_i32 = arith.constant 16 : i32
    %6 = vector.broadcast %c16_i32 : i32 to vector<1x256xi32>
    %7 = arith.remsi %5, %6 : vector<1x256xi32>
    %c0_i32 = arith.constant 0 : i32
    %8 = vector.broadcast %c0_i32 : i32 to vector<1x256xi32>
    %9 = arith.cmpi ne, %7, %8 : vector<1x256xi32>
    %10 = arith.extui %9 : vector<1x256xi1> to vector<1x256xi32>
    %11 = arith.sitofp %10 : vector<1x256xi32> to vector<1x256xf32>
    %c15_i32 = arith.constant 15 : i32
    %12 = vector.broadcast %c15_i32 : i32 to vector<1x256xi32>
    %13 = arith.cmpi ne, %7, %12 : vector<1x256xi32>
    %14 = arith.extui %13 : vector<1x256xi1> to vector<1x256xi32>
    %15 = arith.sitofp %14 : vector<1x256xi32> to vector<1x256xf32>
    %c0_5 = arith.constant 0 : index
    %c0_6 = arith.constant 0 : index
    %16 = vector.load %arg7[%c0_5, %c0_6] : memref<8x1xf32, #tpu.memory_space<vmem>>, vector<8x1xf32>
    %17 = vector.shape_cast %16 : vector<8x1xf32> to vector<8x1xf32>
    %18 = vector.broadcast %17 : vector<8x1xf32> to vector<8x256xf32>
    %c0_7 = arith.constant 0 : index
    %c0_8 = arith.constant 0 : index
    %19 = vector.load %arg13[%c0_7, %c0_8] : memref<48x290xf32, #tpu.memory_space<vmem>>, vector<16x256xf32>
    %20 = vector.broadcast %11 : vector<1x256xf32> to vector<16x256xf32>
    %21 = arith.mulf %19, %20 : vector<16x256xf32>
    %c0_9 = arith.constant 0 : index
    %c0_10 = arith.constant 0 : index
    %c0_11 = arith.constant 0 : index
    %c0_12 = arith.constant 0 : index
    %22 = vector.load %arg2[%c0_9, %c0_10, %c0_11, %c0_12] : memref<3x3x8x16xf32, #tpu.memory_space<vmem>>, vector<1x1x8x16xf32>
    %23 = vector.shape_cast %22 : vector<1x1x8x16xf32> to vector<8x16xf32>
    %cst_13 = arith.constant dense<0.000000e+00> : vector<8x256xf32>
    %24 = tpu.matmul %23, %21, %cst_13 {dimension_numbers = #tpu.dot_dimension_numbers<[1], [0], [0], [1], [0, 0, 1, 1], [], []>} : vector<8x16xf32>, vector<16x256xf32>, vector<8x256xf32> -> vector<8x256xf32>
    %25 = arith.addf %18, %24 : vector<8x256xf32>
    %c0_14 = arith.constant 0 : index
    %c1 = arith.constant 1 : index
    %26 = vector.load %arg13[%c0_14, %c1] : memref<48x290xf32, #tpu.memory_space<vmem>>, vector<16x256xf32>
    %c0_15 = arith.constant 0 : index
    %c1_16 = arith.constant 1 : index
    %c0_17 = arith.constant 0 : index
    %c0_18 = arith.constant 0 : index
    %27 = vector.load %arg2[%c0_15, %c1_16, %c0_17, %c0_18] : memref<3x3x8x16xf32, #tpu.memory_space<vmem>>, vector<1x1x8x16xf32>
    %28 = vector.shape_cast %27 : vector<1x1x8x16xf32> to vector<8x16xf32>
    %cst_19 = arith.constant dense<0.000000e+00> : vector<8x256xf32>
    %29 = tpu.matmul %28, %26, %cst_19 {dimension_numbers = #tpu.dot_dimension_numbers<[1], [0], [0], [1], [0, 0, 1, 1], [], []>} : vector<8x16xf32>, vector<16x256xf32>, vector<8x256xf32> -> vector<8x256xf32>
    %30 = arith.addf %25, %29 : vector<8x256xf32>
    %c0_20 = arith.constant 0 : index
    %c2 = arith.constant 2 : index
    %31 = vector.load %arg13[%c0_20, %c2] : memref<48x290xf32, #tpu.memory_space<vmem>>, vector<16x256xf32>
    %32 = vector.broadcast %15 : vector<1x256xf32> to vector<16x256xf32>
    %33 = arith.mulf %31, %32 : vector<16x256xf32>
    %c0_21 = arith.constant 0 : index
    %c2_22 = arith.constant 2 : index
    %c0_23 = arith.constant 0 : index
    %c0_24 = arith.constant 0 : index
    %34 = vector.load %arg2[%c0_21, %c2_22, %c0_23, %c0_24] : memref<3x3x8x16xf32, #tpu.memory_space<vmem>>, vector<1x1x8x16xf32>
    %35 = vector.shape_cast %34 : vector<1x1x8x16xf32> to vector<8x16xf32>
    %cst_25 = arith.constant dense<0.000000e+00> : vector<8x256xf32>
    %36 = tpu.matmul %35, %33, %cst_25 {dimension_numbers = #tpu.dot_dimension_numbers<[1], [0], [0], [1], [0, 0, 1, 1], [], []>} : vector<8x16xf32>, vector<16x256xf32>, vector<8x256xf32> -> vector<8x256xf32>
    %37 = arith.addf %30, %36 : vector<8x256xf32>
    %c0_26 = arith.constant 0 : index
    %c16 = arith.constant 16 : index
    %38 = vector.load %arg13[%c0_26, %c16] : memref<48x290xf32, #tpu.memory_space<vmem>>, vector<16x256xf32>
    %39 = vector.broadcast %11 : vector<1x256xf32> to vector<16x256xf32>
    %40 = arith.mulf %38, %39 : vector<16x256xf32>
    %c1_27 = arith.constant 1 : index
    %c0_28 = arith.constant 0 : index
    %c0_29 = arith.constant 0 : index
    %c0_30 = arith.constant 0 : index
    %41 = vector.load %arg2[%c1_27, %c0_28, %c0_29, %c0_30] : memref<3x3x8x16xf32, #tpu.memory_space<vmem>>, vector<1x1x8x16xf32>
    %42 = vector.shape_cast %41 : vector<1x1x8x16xf32> to vector<8x16xf32>
    %cst_31 = arith.constant dense<0.000000e+00> : vector<8x256xf32>
    %43 = tpu.matmul %42, %40, %cst_31 {dimension_numbers = #tpu.dot_dimension_numbers<[1], [0], [0], [1], [0, 0, 1, 1], [], []>} : vector<8x16xf32>, vector<16x256xf32>, vector<8x256xf32> -> vector<8x256xf32>
    %44 = arith.addf %37, %43 : vector<8x256xf32>
    %c0_32 = arith.constant 0 : index
    %c17_33 = arith.constant 17 : index
    %45 = vector.load %arg13[%c0_32, %c17_33] : memref<48x290xf32, #tpu.memory_space<vmem>>, vector<16x256xf32>
    %c1_34 = arith.constant 1 : index
    %c1_35 = arith.constant 1 : index
    %c0_36 = arith.constant 0 : index
    %c0_37 = arith.constant 0 : index
    %46 = vector.load %arg2[%c1_34, %c1_35, %c0_36, %c0_37] : memref<3x3x8x16xf32, #tpu.memory_space<vmem>>, vector<1x1x8x16xf32>
    %47 = vector.shape_cast %46 : vector<1x1x8x16xf32> to vector<8x16xf32>
    %cst_38 = arith.constant dense<0.000000e+00> : vector<8x256xf32>
    %48 = tpu.matmul %47, %45, %cst_38 {dimension_numbers = #tpu.dot_dimension_numbers<[1], [0], [0], [1], [0, 0, 1, 1], [], []>} : vector<8x16xf32>, vector<16x256xf32>, vector<8x256xf32> -> vector<8x256xf32>
    %49 = arith.addf %44, %48 : vector<8x256xf32>
    %c0_39 = arith.constant 0 : index
    %c18 = arith.constant 18 : index
    %50 = vector.load %arg13[%c0_39, %c18] : memref<48x290xf32, #tpu.memory_space<vmem>>, vector<16x256xf32>
    %51 = vector.broadcast %15 : vector<1x256xf32> to vector<16x256xf32>
    %52 = arith.mulf %50, %51 : vector<16x256xf32>
    %c1_40 = arith.constant 1 : index
    %c2_41 = arith.constant 2 : index
    %c0_42 = arith.constant 0 : index
    %c0_43 = arith.constant 0 : index
    %53 = vector.load %arg2[%c1_40, %c2_41, %c0_42, %c0_43] : memref<3x3x8x16xf32, #tpu.memory_space<vmem>>, vector<1x1x8x16xf32>
    %54 = vector.shape_cast %53 : vector<1x1x8x16xf32> to vector<8x16xf32>
    %cst_44 = arith.constant dense<0.000000e+00> : vector<8x256xf32>
    %55 = tpu.matmul %54, %52, %cst_44 {dimension_numbers = #tpu.dot_dimension_numbers<[1], [0], [0], [1], [0, 0, 1, 1], [], []>} : vector<8x16xf32>, vector<16x256xf32>, vector<8x256xf32> -> vector<8x256xf32>
    %56 = arith.addf %49, %55 : vector<8x256xf32>
    %c0_45 = arith.constant 0 : index
    %c32 = arith.constant 32 : index
    %57 = vector.load %arg13[%c0_45, %c32] : memref<48x290xf32, #tpu.memory_space<vmem>>, vector<16x256xf32>
    %58 = vector.broadcast %11 : vector<1x256xf32> to vector<16x256xf32>
    %59 = arith.mulf %57, %58 : vector<16x256xf32>
    %c2_46 = arith.constant 2 : index
    %c0_47 = arith.constant 0 : index
    %c0_48 = arith.constant 0 : index
    %c0_49 = arith.constant 0 : index
    %60 = vector.load %arg2[%c2_46, %c0_47, %c0_48, %c0_49] : memref<3x3x8x16xf32, #tpu.memory_space<vmem>>, vector<1x1x8x16xf32>
    %61 = vector.shape_cast %60 : vector<1x1x8x16xf32> to vector<8x16xf32>
    %cst_50 = arith.constant dense<0.000000e+00> : vector<8x256xf32>
    %62 = tpu.matmul %61, %59, %cst_50 {dimension_numbers = #tpu.dot_dimension_numbers<[1], [0], [0], [1], [0, 0, 1, 1], [], []>} : vector<8x16xf32>, vector<16x256xf32>, vector<8x256xf32> -> vector<8x256xf32>
    %63 = arith.addf %56, %62 : vector<8x256xf32>
    %c0_51 = arith.constant 0 : index
    %c33 = arith.constant 33 : index
    %64 = vector.load %arg13[%c0_51, %c33] : memref<48x290xf32, #tpu.memory_space<vmem>>, vector<16x256xf32>
    %c2_52 = arith.constant 2 : index
    %c1_53 = arith.constant 1 : index
    %c0_54 = arith.constant 0 : index
    %c0_55 = arith.constant 0 : index
    %65 = vector.load %arg2[%c2_52, %c1_53, %c0_54, %c0_55] : memref<3x3x8x16xf32, #tpu.memory_space<vmem>>, vector<1x1x8x16xf32>
    %66 = vector.shape_cast %65 : vector<1x1x8x16xf32> to vector<8x16xf32>
    %cst_56 = arith.constant dense<0.000000e+00> : vector<8x256xf32>
    %67 = tpu.matmul %66, %64, %cst_56 {dimension_numbers = #tpu.dot_dimension_numbers<[1], [0], [0], [1], [0, 0, 1, 1], [], []>} : vector<8x16xf32>, vector<16x256xf32>, vector<8x256xf32> -> vector<8x256xf32>
    %68 = arith.addf %63, %67 : vector<8x256xf32>
    %c0_57 = arith.constant 0 : index
    %c34 = arith.constant 34 : index
    %69 = vector.load %arg13[%c0_57, %c34] : memref<48x290xf32, #tpu.memory_space<vmem>>, vector<16x256xf32>
    %70 = vector.broadcast %15 : vector<1x256xf32> to vector<16x256xf32>
    %71 = arith.mulf %69, %70 : vector<16x256xf32>
    %c2_58 = arith.constant 2 : index
    %c2_59 = arith.constant 2 : index
    %c0_60 = arith.constant 0 : index
    %c0_61 = arith.constant 0 : index
    %72 = vector.load %arg2[%c2_58, %c2_59, %c0_60, %c0_61] : memref<3x3x8x16xf32, #tpu.memory_space<vmem>>, vector<1x1x8x16xf32>
    %73 = vector.shape_cast %72 : vector<1x1x8x16xf32> to vector<8x16xf32>
    %cst_62 = arith.constant dense<0.000000e+00> : vector<8x256xf32>
    %74 = tpu.matmul %73, %71, %cst_62 {dimension_numbers = #tpu.dot_dimension_numbers<[1], [0], [0], [1], [0, 0, 1, 1], [], []>} : vector<8x16xf32>, vector<16x256xf32>, vector<8x256xf32> -> vector<8x256xf32>
    %75 = arith.addf %68, %74 : vector<8x256xf32>
    %cst_63 = arith.constant 0.000000e+00 : f32
    %76 = vector.broadcast %cst_63 : f32 to vector<8x256xf32>
    %77 = arith.cmpf oge, %75, %76 : vector<8x256xf32>
    %cst_64 = arith.constant 2.000000e-01 : f32
    %78 = vector.broadcast %cst_64 : f32 to vector<8x256xf32>
    %79 = arith.mulf %75, %78 : vector<8x256xf32>
    %80 = arith.select %77, %75, %79 : vector<8x256xi1>, vector<8x256xf32>
    %c16_65 = arith.constant 16 : index
    %c17_66 = arith.constant 17 : index
    %81 = vector.load %arg13[%c16_65, %c17_66] : memref<48x290xf32, #tpu.memory_space<vmem>>, vector<8x256xf32>
    tpu.vector_store %arg13[%c16_65, %c17_66], %80 {strides = array<i32>} : memref<48x290xf32, #tpu.memory_space<vmem>>, vector<8x256xf32>,
    %c0_67 = arith.constant 0 : index
    %c0_68 = arith.constant 0 : index
    %82 = vector.load %arg8[%c0_67, %c0_68] : memref<8x1xf32, #tpu.memory_space<vmem>>, vector<8x1xf32>
    %83 = vector.shape_cast %82 : vector<8x1xf32> to vector<8x1xf32>
    %84 = vector.broadcast %83 : vector<8x1xf32> to vector<8x256xf32>
    %c0_69 = arith.constant 0 : index
    %c0_70 = arith.constant 0 : index
    %85 = vector.load %arg13[%c0_69, %c0_70] : memref<48x290xf32, #tpu.memory_space<vmem>>, vector<24x256xf32>
    %86 = vector.broadcast %11 : vector<1x256xf32> to vector<24x256xf32>
    %87 = arith.mulf %85, %86 : vector<24x256xf32>
    %c0_71 = arith.constant 0 : index
    %c0_72 = arith.constant 0 : index
    %c0_73 = arith.constant 0 : index
    %c0_74 = arith.constant 0 : index
    %88 = vector.load %arg3[%c0_71, %c0_72, %c0_73, %c0_74] : memref<3x3x8x24xf32, #tpu.memory_space<vmem>>, vector<1x1x8x24xf32>
    %89 = vector.shape_cast %88 : vector<1x1x8x24xf32> to vector<8x24xf32>
    %cst_75 = arith.constant dense<0.000000e+00> : vector<8x256xf32>
    %90 = tpu.matmul %89, %87, %cst_75 {dimension_numbers = #tpu.dot_dimension_numbers<[1], [0], [0], [1], [0, 0, 1, 1], [], []>} : vector<8x24xf32>, vector<24x256xf32>, vector<8x256xf32> -> vector<8x256xf32>
    %91 = arith.addf %84, %90 : vector<8x256xf32>
    %c0_76 = arith.constant 0 : index
    %c1_77 = arith.constant 1 : index
    %92 = vector.load %arg13[%c0_76, %c1_77] : memref<48x290xf32, #tpu.memory_space<vmem>>, vector<24x256xf32>
    %c0_78 = arith.constant 0 : index
    %c1_79 = arith.constant 1 : index
    %c0_80 = arith.constant 0 : index
    %c0_81 = arith.constant 0 : index
    %93 = vector.load %arg3[%c0_78, %c1_79, %c0_80, %c0_81] : memref<3x3x8x24xf32, #tpu.memory_space<vmem>>, vector<1x1x8x24xf32>
    %94 = vector.shape_cast %93 : vector<1x1x8x24xf32> to vector<8x24xf32>
    %cst_82 = arith.constant dense<0.000000e+00> : vector<8x256xf32>
    %95 = tpu.matmul %94, %92, %cst_82 {dimension_numbers = #tpu.dot_dimension_numbers<[1], [0], [0], [1], [0, 0, 1, 1], [], []>} : vector<8x24xf32>, vector<24x256xf32>, vector<8x256xf32> -> vector<8x256xf32>
    %96 = arith.addf %91, %95 : vector<8x256xf32>
    %c0_83 = arith.constant 0 : index
    %c2_84 = arith.constant 2 : index
    %97 = vector.load %arg13[%c0_83, %c2_84] : memref<48x290xf32, #tpu.memory_space<vmem>>, vector<24x256xf32>
    %98 = vector.broadcast %15 : vector<1x256xf32> to vector<24x256xf32>
    %99 = arith.mulf %97, %98 : vector<24x256xf32>
    %c0_85 = arith.constant 0 : index
    %c2_86 = arith.constant 2 : index
    %c0_87 = arith.constant 0 : index
    %c0_88 = arith.constant 0 : index
    %100 = vector.load %arg3[%c0_85, %c2_86, %c0_87, %c0_88] : memref<3x3x8x24xf32, #tpu.memory_space<vmem>>, vector<1x1x8x24xf32>
    %101 = vector.shape_cast %100 : vector<1x1x8x24xf32> to vector<8x24xf32>
    %cst_89 = arith.constant dense<0.000000e+00> : vector<8x256xf32>
    %102 = tpu.matmul %101, %99, %cst_89 {dimension_numbers = #tpu.dot_dimension_numbers<[1], [0], [0], [1], [0, 0, 1, 1], [], []>} : vector<8x24xf32>, vector<24x256xf32>, vector<8x256xf32> -> vector<8x256xf32>
    %103 = arith.addf %96, %102 : vector<8x256xf32>
    %c0_90 = arith.constant 0 : index
    %c16_91 = arith.constant 16 : index
    %104 = vector.load %arg13[%c0_90, %c16_91] : memref<48x290xf32, #tpu.memory_space<vmem>>, vector<24x256xf32>
    %105 = vector.broadcast %11 : vector<1x256xf32> to vector<24x256xf32>
    %106 = arith.mulf %104, %105 : vector<24x256xf32>
    %c1_92 = arith.constant 1 : index
    %c0_93 = arith.constant 0 : index
    %c0_94 = arith.constant 0 : index
    %c0_95 = arith.constant 0 : index
    %107 = vector.load %arg3[%c1_92, %c0_93, %c0_94, %c0_95] : memref<3x3x8x24xf32, #tpu.memory_space<vmem>>, vector<1x1x8x24xf32>
    %108 = vector.shape_cast %107 : vector<1x1x8x24xf32> to vector<8x24xf32>
    %cst_96 = arith.constant dense<0.000000e+00> : vector<8x256xf32>
    %109 = tpu.matmul %108, %106, %cst_96 {dimension_numbers = #tpu.dot_dimension_numbers<[1], [0], [0], [1], [0, 0, 1, 1], [], []>} : vector<8x24xf32>, vector<24x256xf32>, vector<8x256xf32> -> vector<8x256xf32>
    %110 = arith.addf %103, %109 : vector<8x256xf32>
    %c0_97 = arith.constant 0 : index
    %c17_98 = arith.constant 17 : index
    %111 = vector.load %arg13[%c0_97, %c17_98] : memref<48x290xf32, #tpu.memory_space<vmem>>, vector<24x256xf32>
    %c1_99 = arith.constant 1 : index
    %c1_100 = arith.constant 1 : index
    %c0_101 = arith.constant 0 : index
    %c0_102 = arith.constant 0 : index
    %112 = vector.load %arg3[%c1_99, %c1_100, %c0_101, %c0_102] : memref<3x3x8x24xf32, #tpu.memory_space<vmem>>, vector<1x1x8x24xf32>
    %113 = vector.shape_cast %112 : vector<1x1x8x24xf32> to vector<8x24xf32>
    %cst_103 = arith.constant dense<0.000000e+00> : vector<8x256xf32>
    %114 = tpu.matmul %113, %111, %cst_103 {dimension_numbers = #tpu.dot_dimension_numbers<[1], [0], [0], [1], [0, 0, 1, 1], [], []>} : vector<8x24xf32>, vector<24x256xf32>, vector<8x256xf32> -> vector<8x256xf32>
    %115 = arith.addf %110, %114 : vector<8x256xf32>
    %c0_104 = arith.constant 0 : index
    %c18_105 = arith.constant 18 : index
    %116 = vector.load %arg13[%c0_104, %c18_105] : memref<48x290xf32, #tpu.memory_space<vmem>>, vector<24x256xf32>
    %117 = vector.broadcast %15 : vector<1x256xf32> to vector<24x256xf32>
    %118 = arith.mulf %116, %117 : vector<24x256xf32>
    %c1_106 = arith.constant 1 : index
    %c2_107 = arith.constant 2 : index
    %c0_108 = arith.constant 0 : index
    %c0_109 = arith.constant 0 : index
    %119 = vector.load %arg3[%c1_106, %c2_107, %c0_108, %c0_109] : memref<3x3x8x24xf32, #tpu.memory_space<vmem>>, vector<1x1x8x24xf32>
    %120 = vector.shape_cast %119 : vector<1x1x8x24xf32> to vector<8x24xf32>
    %cst_110 = arith.constant dense<0.000000e+00> : vector<8x256xf32>
    %121 = tpu.matmul %120, %118, %cst_110 {dimension_numbers = #tpu.dot_dimension_numbers<[1], [0], [0], [1], [0, 0, 1, 1], [], []>} : vector<8x24xf32>, vector<24x256xf32>, vector<8x256xf32> -> vector<8x256xf32>
    %122 = arith.addf %115, %121 : vector<8x256xf32>
    %c0_111 = arith.constant 0 : index
    %c32_112 = arith.constant 32 : index
    %123 = vector.load %arg13[%c0_111, %c32_112] : memref<48x290xf32, #tpu.memory_space<vmem>>, vector<24x256xf32>
    %124 = vector.broadcast %11 : vector<1x256xf32> to vector<24x256xf32>
    %125 = arith.mulf %123, %124 : vector<24x256xf32>
    %c2_113 = arith.constant 2 : index
    %c0_114 = arith.constant 0 : index
    %c0_115 = arith.constant 0 : index
    %c0_116 = arith.constant 0 : index
    %126 = vector.load %arg3[%c2_113, %c0_114, %c0_115, %c0_116] : memref<3x3x8x24xf32, #tpu.memory_space<vmem>>, vector<1x1x8x24xf32>
    %127 = vector.shape_cast %126 : vector<1x1x8x24xf32> to vector<8x24xf32>
    %cst_117 = arith.constant dense<0.000000e+00> : vector<8x256xf32>
    %128 = tpu.matmul %127, %125, %cst_117 {dimension_numbers = #tpu.dot_dimension_numbers<[1], [0], [0], [1], [0, 0, 1, 1], [], []>} : vector<8x24xf32>, vector<24x256xf32>, vector<8x256xf32> -> vector<8x256xf32>
    %129 = arith.addf %122, %128 : vector<8x256xf32>
    %c0_118 = arith.constant 0 : index
    %c33_119 = arith.constant 33 : index
    %130 = vector.load %arg13[%c0_118, %c33_119] : memref<48x290xf32, #tpu.memory_space<vmem>>, vector<24x256xf32>
    %c2_120 = arith.constant 2 : index
    %c1_121 = arith.constant 1 : index
    %c0_122 = arith.constant 0 : index
    %c0_123 = arith.constant 0 : index
    %131 = vector.load %arg3[%c2_120, %c1_121, %c0_122, %c0_123] : memref<3x3x8x24xf32, #tpu.memory_space<vmem>>, vector<1x1x8x24xf32>
    %132 = vector.shape_cast %131 : vector<1x1x8x24xf32> to vector<8x24xf32>
    %cst_124 = arith.constant dense<0.000000e+00> : vector<8x256xf32>
    %133 = tpu.matmul %132, %130, %cst_124 {dimension_numbers = #tpu.dot_dimension_numbers<[1], [0], [0], [1], [0, 0, 1, 1], [], []>} : vector<8x24xf32>, vector<24x256xf32>, vector<8x256xf32> -> vector<8x256xf32>
    %134 = arith.addf %129, %133 : vector<8x256xf32>
    %c0_125 = arith.constant 0 : index
    %c34_126 = arith.constant 34 : index
    %135 = vector.load %arg13[%c0_125, %c34_126] : memref<48x290xf32, #tpu.memory_space<vmem>>, vector<24x256xf32>
    %136 = vector.broadcast %15 : vector<1x256xf32> to vector<24x256xf32>
    %137 = arith.mulf %135, %136 : vector<24x256xf32>
    %c2_127 = arith.constant 2 : index
    %c2_128 = arith.constant 2 : index
    %c0_129 = arith.constant 0 : index
    %c0_130 = arith.constant 0 : index
    %138 = vector.load %arg3[%c2_127, %c2_128, %c0_129, %c0_130] : memref<3x3x8x24xf32, #tpu.memory_space<vmem>>, vector<1x1x8x24xf32>
    %139 = vector.shape_cast %138 : vector<1x1x8x24xf32> to vector<8x24xf32>
    %cst_131 = arith.constant dense<0.000000e+00> : vector<8x256xf32>
    %140 = tpu.matmul %139, %137, %cst_131 {dimension_numbers = #tpu.dot_dimension_numbers<[1], [0], [0], [1], [0, 0, 1, 1], [], []>} : vector<8x24xf32>, vector<24x256xf32>, vector<8x256xf32> -> vector<8x256xf32>
    %141 = arith.addf %134, %140 : vector<8x256xf32>
    %cst_132 = arith.constant 0.000000e+00 : f32
    %142 = vector.broadcast %cst_132 : f32 to vector<8x256xf32>
    %143 = arith.cmpf oge, %141, %142 : vector<8x256xf32>
    %cst_133 = arith.constant 2.000000e-01 : f32
    %144 = vector.broadcast %cst_133 : f32 to vector<8x256xf32>
    %145 = arith.mulf %141, %144 : vector<8x256xf32>
    %146 = arith.select %143, %141, %145 : vector<8x256xi1>, vector<8x256xf32>
    %c24 = arith.constant 24 : index
    %c17_134 = arith.constant 17 : index
    %147 = vector.load %arg13[%c24, %c17_134] : memref<48x290xf32, #tpu.memory_space<vmem>>, vector<8x256xf32>
    tpu.vector_store %arg13[%c24, %c17_134], %146 {strides = array<i32>} : memref<48x290xf32, #tpu.memory_space<vmem>>, vector<8x256xf32>,
    %c0_135 = arith.constant 0 : index
    %c0_136 = arith.constant 0 : index
    %148 = vector.load %arg9[%c0_135, %c0_136] : memref<8x1xf32, #tpu.memory_space<vmem>>, vector<8x1xf32>
    %149 = vector.shape_cast %148 : vector<8x1xf32> to vector<8x1xf32>
    %150 = vector.broadcast %149 : vector<8x1xf32> to vector<8x256xf32>
    %c0_137 = arith.constant 0 : index
    %c0_138 = arith.constant 0 : index
    %151 = vector.load %arg13[%c0_137, %c0_138] : memref<48x290xf32, #tpu.memory_space<vmem>>, vector<32x256xf32>
    %152 = vector.broadcast %11 : vector<1x256xf32> to vector<32x256xf32>
    %153 = arith.mulf %151, %152 : vector<32x256xf32>
    %c0_139 = arith.constant 0 : index
    %c0_140 = arith.constant 0 : index
    %c0_141 = arith.constant 0 : index
    %c0_142 = arith.constant 0 : index
    %154 = vector.load %arg4[%c0_139, %c0_140, %c0_141, %c0_142] : memref<3x3x8x32xf32, #tpu.memory_space<vmem>>, vector<1x1x8x32xf32>
    %155 = vector.shape_cast %154 : vector<1x1x8x32xf32> to vector<8x32xf32>
    %cst_143 = arith.constant dense<0.000000e+00> : vector<8x256xf32>
    %156 = tpu.matmul %155, %153, %cst_143 {dimension_numbers = #tpu.dot_dimension_numbers<[1], [0], [0], [1], [0, 0, 1, 1], [], []>} : vector<8x32xf32>, vector<32x256xf32>, vector<8x256xf32> -> vector<8x256xf32>
    %157 = arith.addf %150, %156 : vector<8x256xf32>
    %c0_144 = arith.constant 0 : index
    %c1_145 = arith.constant 1 : index
    %158 = vector.load %arg13[%c0_144, %c1_145] : memref<48x290xf32, #tpu.memory_space<vmem>>, vector<32x256xf32>
    %c0_146 = arith.constant 0 : index
    %c1_147 = arith.constant 1 : index
    %c0_148 = arith.constant 0 : index
    %c0_149 = arith.constant 0 : index
    %159 = vector.load %arg4[%c0_146, %c1_147, %c0_148, %c0_149] : memref<3x3x8x32xf32, #tpu.memory_space<vmem>>, vector<1x1x8x32xf32>
    %160 = vector.shape_cast %159 : vector<1x1x8x32xf32> to vector<8x32xf32>
    %cst_150 = arith.constant dense<0.000000e+00> : vector<8x256xf32>
    %161 = tpu.matmul %160, %158, %cst_150 {dimension_numbers = #tpu.dot_dimension_numbers<[1], [0], [0], [1], [0, 0, 1, 1], [], []>} : vector<8x32xf32>, vector<32x256xf32>, vector<8x256xf32> -> vector<8x256xf32>
    %162 = arith.addf %157, %161 : vector<8x256xf32>
    %c0_151 = arith.constant 0 : index
    %c2_152 = arith.constant 2 : index
    %163 = vector.load %arg13[%c0_151, %c2_152] : memref<48x290xf32, #tpu.memory_space<vmem>>, vector<32x256xf32>
    %164 = vector.broadcast %15 : vector<1x256xf32> to vector<32x256xf32>
    %165 = arith.mulf %163, %164 : vector<32x256xf32>
    %c0_153 = arith.constant 0 : index
    %c2_154 = arith.constant 2 : index
    %c0_155 = arith.constant 0 : index
    %c0_156 = arith.constant 0 : index
    %166 = vector.load %arg4[%c0_153, %c2_154, %c0_155, %c0_156] : memref<3x3x8x32xf32, #tpu.memory_space<vmem>>, vector<1x1x8x32xf32>
    %167 = vector.shape_cast %166 : vector<1x1x8x32xf32> to vector<8x32xf32>
    %cst_157 = arith.constant dense<0.000000e+00> : vector<8x256xf32>
    %168 = tpu.matmul %167, %165, %cst_157 {dimension_numbers = #tpu.dot_dimension_numbers<[1], [0], [0], [1], [0, 0, 1, 1], [], []>} : vector<8x32xf32>, vector<32x256xf32>, vector<8x256xf32> -> vector<8x256xf32>
    %169 = arith.addf %162, %168 : vector<8x256xf32>
    %c0_158 = arith.constant 0 : index
    %c16_159 = arith.constant 16 : index
    %170 = vector.load %arg13[%c0_158, %c16_159] : memref<48x290xf32, #tpu.memory_space<vmem>>, vector<32x256xf32>
    %171 = vector.broadcast %11 : vector<1x256xf32> to vector<32x256xf32>
    %172 = arith.mulf %170, %171 : vector<32x256xf32>
    %c1_160 = arith.constant 1 : index
    %c0_161 = arith.constant 0 : index
    %c0_162 = arith.constant 0 : index
    %c0_163 = arith.constant 0 : index
    %173 = vector.load %arg4[%c1_160, %c0_161, %c0_162, %c0_163] : memref<3x3x8x32xf32, #tpu.memory_space<vmem>>, vector<1x1x8x32xf32>
    %174 = vector.shape_cast %173 : vector<1x1x8x32xf32> to vector<8x32xf32>
    %cst_164 = arith.constant dense<0.000000e+00> : vector<8x256xf32>
    %175 = tpu.matmul %174, %172, %cst_164 {dimension_numbers = #tpu.dot_dimension_numbers<[1], [0], [0], [1], [0, 0, 1, 1], [], []>} : vector<8x32xf32>, vector<32x256xf32>, vector<8x256xf32> -> vector<8x256xf32>
    %176 = arith.addf %169, %175 : vector<8x256xf32>
    %c0_165 = arith.constant 0 : index
    %c17_166 = arith.constant 17 : index
    %177 = vector.load %arg13[%c0_165, %c17_166] : memref<48x290xf32, #tpu.memory_space<vmem>>, vector<32x256xf32>
    %c1_167 = arith.constant 1 : index
    %c1_168 = arith.constant 1 : index
    %c0_169 = arith.constant 0 : index
    %c0_170 = arith.constant 0 : index
    %178 = vector.load %arg4[%c1_167, %c1_168, %c0_169, %c0_170] : memref<3x3x8x32xf32, #tpu.memory_space<vmem>>, vector<1x1x8x32xf32>
    %179 = vector.shape_cast %178 : vector<1x1x8x32xf32> to vector<8x32xf32>
    %cst_171 = arith.constant dense<0.000000e+00> : vector<8x256xf32>
    %180 = tpu.matmul %179, %177, %cst_171 {dimension_numbers = #tpu.dot_dimension_numbers<[1], [0], [0], [1], [0, 0, 1, 1], [], []>} : vector<8x32xf32>, vector<32x256xf32>, vector<8x256xf32> -> vector<8x256xf32>
    %181 = arith.addf %176, %180 : vector<8x256xf32>
    %c0_172 = arith.constant 0 : index
    %c18_173 = arith.constant 18 : index
    %182 = vector.load %arg13[%c0_172, %c18_173] : memref<48x290xf32, #tpu.memory_space<vmem>>, vector<32x256xf32>
    %183 = vector.broadcast %15 : vector<1x256xf32> to vector<32x256xf32>
    %184 = arith.mulf %182, %183 : vector<32x256xf32>
    %c1_174 = arith.constant 1 : index
    %c2_175 = arith.constant 2 : index
    %c0_176 = arith.constant 0 : index
    %c0_177 = arith.constant 0 : index
    %185 = vector.load %arg4[%c1_174, %c2_175, %c0_176, %c0_177] : memref<3x3x8x32xf32, #tpu.memory_space<vmem>>, vector<1x1x8x32xf32>
    %186 = vector.shape_cast %185 : vector<1x1x8x32xf32> to vector<8x32xf32>
    %cst_178 = arith.constant dense<0.000000e+00> : vector<8x256xf32>
    %187 = tpu.matmul %186, %184, %cst_178 {dimension_numbers = #tpu.dot_dimension_numbers<[1], [0], [0], [1], [0, 0, 1, 1], [], []>} : vector<8x32xf32>, vector<32x256xf32>, vector<8x256xf32> -> vector<8x256xf32>
    %188 = arith.addf %181, %187 : vector<8x256xf32>
    %c0_179 = arith.constant 0 : index
    %c32_180 = arith.constant 32 : index
    %189 = vector.load %arg13[%c0_179, %c32_180] : memref<48x290xf32, #tpu.memory_space<vmem>>, vector<32x256xf32>
    %190 = vector.broadcast %11 : vector<1x256xf32> to vector<32x256xf32>
    %191 = arith.mulf %189, %190 : vector<32x256xf32>
    %c2_181 = arith.constant 2 : index
    %c0_182 = arith.constant 0 : index
    %c0_183 = arith.constant 0 : index
    %c0_184 = arith.constant 0 : index
    %192 = vector.load %arg4[%c2_181, %c0_182, %c0_183, %c0_184] : memref<3x3x8x32xf32, #tpu.memory_space<vmem>>, vector<1x1x8x32xf32>
    %193 = vector.shape_cast %192 : vector<1x1x8x32xf32> to vector<8x32xf32>
    %cst_185 = arith.constant dense<0.000000e+00> : vector<8x256xf32>
    %194 = tpu.matmul %193, %191, %cst_185 {dimension_numbers = #tpu.dot_dimension_numbers<[1], [0], [0], [1], [0, 0, 1, 1], [], []>} : vector<8x32xf32>, vector<32x256xf32>, vector<8x256xf32> -> vector<8x256xf32>
    %195 = arith.addf %188, %194 : vector<8x256xf32>
    %c0_186 = arith.constant 0 : index
    %c33_187 = arith.constant 33 : index
    %196 = vector.load %arg13[%c0_186, %c33_187] : memref<48x290xf32, #tpu.memory_space<vmem>>, vector<32x256xf32>
    %c2_188 = arith.constant 2 : index
    %c1_189 = arith.constant 1 : index
    %c0_190 = arith.constant 0 : index
    %c0_191 = arith.constant 0 : index
    %197 = vector.load %arg4[%c2_188, %c1_189, %c0_190, %c0_191] : memref<3x3x8x32xf32, #tpu.memory_space<vmem>>, vector<1x1x8x32xf32>
    %198 = vector.shape_cast %197 : vector<1x1x8x32xf32> to vector<8x32xf32>
    %cst_192 = arith.constant dense<0.000000e+00> : vector<8x256xf32>
    %199 = tpu.matmul %198, %196, %cst_192 {dimension_numbers = #tpu.dot_dimension_numbers<[1], [0], [0], [1], [0, 0, 1, 1], [], []>} : vector<8x32xf32>, vector<32x256xf32>, vector<8x256xf32> -> vector<8x256xf32>
    %200 = arith.addf %195, %199 : vector<8x256xf32>
    %c0_193 = arith.constant 0 : index
    %c34_194 = arith.constant 34 : index
    %201 = vector.load %arg13[%c0_193, %c34_194] : memref<48x290xf32, #tpu.memory_space<vmem>>, vector<32x256xf32>
    %202 = vector.broadcast %15 : vector<1x256xf32> to vector<32x256xf32>
    %203 = arith.mulf %201, %202 : vector<32x256xf32>
    %c2_195 = arith.constant 2 : index
    %c2_196 = arith.constant 2 : index
    %c0_197 = arith.constant 0 : index
    %c0_198 = arith.constant 0 : index
    %204 = vector.load %arg4[%c2_195, %c2_196, %c0_197, %c0_198] : memref<3x3x8x32xf32, #tpu.memory_space<vmem>>, vector<1x1x8x32xf32>
    %205 = vector.shape_cast %204 : vector<1x1x8x32xf32> to vector<8x32xf32>
    %cst_199 = arith.constant dense<0.000000e+00> : vector<8x256xf32>
    %206 = tpu.matmul %205, %203, %cst_199 {dimension_numbers = #tpu.dot_dimension_numbers<[1], [0], [0], [1], [0, 0, 1, 1], [], []>} : vector<8x32xf32>, vector<32x256xf32>, vector<8x256xf32> -> vector<8x256xf32>
    %207 = arith.addf %200, %206 : vector<8x256xf32>
    %cst_200 = arith.constant 0.000000e+00 : f32
    %208 = vector.broadcast %cst_200 : f32 to vector<8x256xf32>
    %209 = arith.cmpf oge, %207, %208 : vector<8x256xf32>
    %cst_201 = arith.constant 2.000000e-01 : f32
    %210 = vector.broadcast %cst_201 : f32 to vector<8x256xf32>
    %211 = arith.mulf %207, %210 : vector<8x256xf32>
    %212 = arith.select %209, %207, %211 : vector<8x256xi1>, vector<8x256xf32>
    %c32_202 = arith.constant 32 : index
    %c17_203 = arith.constant 17 : index
    %213 = vector.load %arg13[%c32_202, %c17_203] : memref<48x290xf32, #tpu.memory_space<vmem>>, vector<8x256xf32>
    tpu.vector_store %arg13[%c32_202, %c17_203], %212 {strides = array<i32>} : memref<48x290xf32, #tpu.memory_space<vmem>>, vector<8x256xf32>,
    %c0_204 = arith.constant 0 : index
    %c0_205 = arith.constant 0 : index
    %214 = vector.load %arg10[%c0_204, %c0_205] : memref<8x1xf32, #tpu.memory_space<vmem>>, vector<8x1xf32>
    %215 = vector.shape_cast %214 : vector<8x1xf32> to vector<8x1xf32>
    %216 = vector.broadcast %215 : vector<8x1xf32> to vector<8x256xf32>
    %c0_206 = arith.constant 0 : index
    %c0_207 = arith.constant 0 : index
    %217 = vector.load %arg13[%c0_206, %c0_207] : memref<48x290xf32, #tpu.memory_space<vmem>>, vector<40x256xf32>
    %218 = vector.broadcast %11 : vector<1x256xf32> to vector<40x256xf32>
    %219 = arith.mulf %217, %218 : vector<40x256xf32>
    %c0_208 = arith.constant 0 : index
    %c0_209 = arith.constant 0 : index
    %c0_210 = arith.constant 0 : index
    %c0_211 = arith.constant 0 : index
    %220 = vector.load %arg5[%c0_208, %c0_209, %c0_210, %c0_211] : memref<3x3x8x40xf32, #tpu.memory_space<vmem>>, vector<1x1x8x40xf32>
    %221 = vector.shape_cast %220 : vector<1x1x8x40xf32> to vector<8x40xf32>
    %cst_212 = arith.constant dense<0.000000e+00> : vector<8x256xf32>
    %222 = tpu.matmul %221, %219, %cst_212 {dimension_numbers = #tpu.dot_dimension_numbers<[1], [0], [0], [1], [0, 0, 1, 1], [], []>} : vector<8x40xf32>, vector<40x256xf32>, vector<8x256xf32> -> vector<8x256xf32>
    %223 = arith.addf %216, %222 : vector<8x256xf32>
    %c0_213 = arith.constant 0 : index
    %c1_214 = arith.constant 1 : index
    %224 = vector.load %arg13[%c0_213, %c1_214] : memref<48x290xf32, #tpu.memory_space<vmem>>, vector<40x256xf32>
    %c0_215 = arith.constant 0 : index
    %c1_216 = arith.constant 1 : index
    %c0_217 = arith.constant 0 : index
    %c0_218 = arith.constant 0 : index
    %225 = vector.load %arg5[%c0_215, %c1_216, %c0_217, %c0_218] : memref<3x3x8x40xf32, #tpu.memory_space<vmem>>, vector<1x1x8x40xf32>
    %226 = vector.shape_cast %225 : vector<1x1x8x40xf32> to vector<8x40xf32>
    %cst_219 = arith.constant dense<0.000000e+00> : vector<8x256xf32>
    %227 = tpu.matmul %226, %224, %cst_219 {dimension_numbers = #tpu.dot_dimension_numbers<[1], [0], [0], [1], [0, 0, 1, 1], [], []>} : vector<8x40xf32>, vector<40x256xf32>, vector<8x256xf32> -> vector<8x256xf32>
    %228 = arith.addf %223, %227 : vector<8x256xf32>
    %c0_220 = arith.constant 0 : index
    %c2_221 = arith.constant 2 : index
    %229 = vector.load %arg13[%c0_220, %c2_221] : memref<48x290xf32, #tpu.memory_space<vmem>>, vector<40x256xf32>
    %230 = vector.broadcast %15 : vector<1x256xf32> to vector<40x256xf32>
    %231 = arith.mulf %229, %230 : vector<40x256xf32>
    %c0_222 = arith.constant 0 : index
    %c2_223 = arith.constant 2 : index
    %c0_224 = arith.constant 0 : index
    %c0_225 = arith.constant 0 : index
    %232 = vector.load %arg5[%c0_222, %c2_223, %c0_224, %c0_225] : memref<3x3x8x40xf32, #tpu.memory_space<vmem>>, vector<1x1x8x40xf32>
    %233 = vector.shape_cast %232 : vector<1x1x8x40xf32> to vector<8x40xf32>
    %cst_226 = arith.constant dense<0.000000e+00> : vector<8x256xf32>
    %234 = tpu.matmul %233, %231, %cst_226 {dimension_numbers = #tpu.dot_dimension_numbers<[1], [0], [0], [1], [0, 0, 1, 1], [], []>} : vector<8x40xf32>, vector<40x256xf32>, vector<8x256xf32> -> vector<8x256xf32>
    %235 = arith.addf %228, %234 : vector<8x256xf32>
    %c0_227 = arith.constant 0 : index
    %c16_228 = arith.constant 16 : index
    %236 = vector.load %arg13[%c0_227, %c16_228] : memref<48x290xf32, #tpu.memory_space<vmem>>, vector<40x256xf32>
    %237 = vector.broadcast %11 : vector<1x256xf32> to vector<40x256xf32>
    %238 = arith.mulf %236, %237 : vector<40x256xf32>
    %c1_229 = arith.constant 1 : index
    %c0_230 = arith.constant 0 : index
    %c0_231 = arith.constant 0 : index
    %c0_232 = arith.constant 0 : index
    %239 = vector.load %arg5[%c1_229, %c0_230, %c0_231, %c0_232] : memref<3x3x8x40xf32, #tpu.memory_space<vmem>>, vector<1x1x8x40xf32>
    %240 = vector.shape_cast %239 : vector<1x1x8x40xf32> to vector<8x40xf32>
    %cst_233 = arith.constant dense<0.000000e+00> : vector<8x256xf32>
    %241 = tpu.matmul %240, %238, %cst_233 {dimension_numbers = #tpu.dot_dimension_numbers<[1], [0], [0], [1], [0, 0, 1, 1], [], []>} : vector<8x40xf32>, vector<40x256xf32>, vector<8x256xf32> -> vector<8x256xf32>
    %242 = arith.addf %235, %241 : vector<8x256xf32>
    %c0_234 = arith.constant 0 : index
    %c17_235 = arith.constant 17 : index
    %243 = vector.load %arg13[%c0_234, %c17_235] : memref<48x290xf32, #tpu.memory_space<vmem>>, vector<40x256xf32>
    %c1_236 = arith.constant 1 : index
    %c1_237 = arith.constant 1 : index
    %c0_238 = arith.constant 0 : index
    %c0_239 = arith.constant 0 : index
    %244 = vector.load %arg5[%c1_236, %c1_237, %c0_238, %c0_239] : memref<3x3x8x40xf32, #tpu.memory_space<vmem>>, vector<1x1x8x40xf32>
    %245 = vector.shape_cast %244 : vector<1x1x8x40xf32> to vector<8x40xf32>
    %cst_240 = arith.constant dense<0.000000e+00> : vector<8x256xf32>
    %246 = tpu.matmul %245, %243, %cst_240 {dimension_numbers = #tpu.dot_dimension_numbers<[1], [0], [0], [1], [0, 0, 1, 1], [], []>} : vector<8x40xf32>, vector<40x256xf32>, vector<8x256xf32> -> vector<8x256xf32>
    %247 = arith.addf %242, %246 : vector<8x256xf32>
    %c0_241 = arith.constant 0 : index
    %c18_242 = arith.constant 18 : index
    %248 = vector.load %arg13[%c0_241, %c18_242] : memref<48x290xf32, #tpu.memory_space<vmem>>, vector<40x256xf32>
    %249 = vector.broadcast %15 : vector<1x256xf32> to vector<40x256xf32>
    %250 = arith.mulf %248, %249 : vector<40x256xf32>
    %c1_243 = arith.constant 1 : index
    %c2_244 = arith.constant 2 : index
    %c0_245 = arith.constant 0 : index
    %c0_246 = arith.constant 0 : index
    %251 = vector.load %arg5[%c1_243, %c2_244, %c0_245, %c0_246] : memref<3x3x8x40xf32, #tpu.memory_space<vmem>>, vector<1x1x8x40xf32>
    %252 = vector.shape_cast %251 : vector<1x1x8x40xf32> to vector<8x40xf32>
    %cst_247 = arith.constant dense<0.000000e+00> : vector<8x256xf32>
    %253 = tpu.matmul %252, %250, %cst_247 {dimension_numbers = #tpu.dot_dimension_numbers<[1], [0], [0], [1], [0, 0, 1, 1], [], []>} : vector<8x40xf32>, vector<40x256xf32>, vector<8x256xf32> -> vector<8x256xf32>
    %254 = arith.addf %247, %253 : vector<8x256xf32>
    %c0_248 = arith.constant 0 : index
    %c32_249 = arith.constant 32 : index
    %255 = vector.load %arg13[%c0_248, %c32_249] : memref<48x290xf32, #tpu.memory_space<vmem>>, vector<40x256xf32>
    %256 = vector.broadcast %11 : vector<1x256xf32> to vector<40x256xf32>
    %257 = arith.mulf %255, %256 : vector<40x256xf32>
    %c2_250 = arith.constant 2 : index
    %c0_251 = arith.constant 0 : index
    %c0_252 = arith.constant 0 : index
    %c0_253 = arith.constant 0 : index
    %258 = vector.load %arg5[%c2_250, %c0_251, %c0_252, %c0_253] : memref<3x3x8x40xf32, #tpu.memory_space<vmem>>, vector<1x1x8x40xf32>
    %259 = vector.shape_cast %258 : vector<1x1x8x40xf32> to vector<8x40xf32>
    %cst_254 = arith.constant dense<0.000000e+00> : vector<8x256xf32>
    %260 = tpu.matmul %259, %257, %cst_254 {dimension_numbers = #tpu.dot_dimension_numbers<[1], [0], [0], [1], [0, 0, 1, 1], [], []>} : vector<8x40xf32>, vector<40x256xf32>, vector<8x256xf32> -> vector<8x256xf32>
    %261 = arith.addf %254, %260 : vector<8x256xf32>
    %c0_255 = arith.constant 0 : index
    %c33_256 = arith.constant 33 : index
    %262 = vector.load %arg13[%c0_255, %c33_256] : memref<48x290xf32, #tpu.memory_space<vmem>>, vector<40x256xf32>
    %c2_257 = arith.constant 2 : index
    %c1_258 = arith.constant 1 : index
    %c0_259 = arith.constant 0 : index
    %c0_260 = arith.constant 0 : index
    %263 = vector.load %arg5[%c2_257, %c1_258, %c0_259, %c0_260] : memref<3x3x8x40xf32, #tpu.memory_space<vmem>>, vector<1x1x8x40xf32>
    %264 = vector.shape_cast %263 : vector<1x1x8x40xf32> to vector<8x40xf32>
    %cst_261 = arith.constant dense<0.000000e+00> : vector<8x256xf32>
    %265 = tpu.matmul %264, %262, %cst_261 {dimension_numbers = #tpu.dot_dimension_numbers<[1], [0], [0], [1], [0, 0, 1, 1], [], []>} : vector<8x40xf32>, vector<40x256xf32>, vector<8x256xf32> -> vector<8x256xf32>
    %266 = arith.addf %261, %265 : vector<8x256xf32>
    %c0_262 = arith.constant 0 : index
    %c34_263 = arith.constant 34 : index
    %267 = vector.load %arg13[%c0_262, %c34_263] : memref<48x290xf32, #tpu.memory_space<vmem>>, vector<40x256xf32>
    %268 = vector.broadcast %15 : vector<1x256xf32> to vector<40x256xf32>
    %269 = arith.mulf %267, %268 : vector<40x256xf32>
    %c2_264 = arith.constant 2 : index
    %c2_265 = arith.constant 2 : index
    %c0_266 = arith.constant 0 : index
    %c0_267 = arith.constant 0 : index
    %270 = vector.load %arg5[%c2_264, %c2_265, %c0_266, %c0_267] : memref<3x3x8x40xf32, #tpu.memory_space<vmem>>, vector<1x1x8x40xf32>
    %271 = vector.shape_cast %270 : vector<1x1x8x40xf32> to vector<8x40xf32>
    %cst_268 = arith.constant dense<0.000000e+00> : vector<8x256xf32>
    %272 = tpu.matmul %271, %269, %cst_268 {dimension_numbers = #tpu.dot_dimension_numbers<[1], [0], [0], [1], [0, 0, 1, 1], [], []>} : vector<8x40xf32>, vector<40x256xf32>, vector<8x256xf32> -> vector<8x256xf32>
    %273 = arith.addf %266, %272 : vector<8x256xf32>
    %cst_269 = arith.constant 0.000000e+00 : f32
    %274 = vector.broadcast %cst_269 : f32 to vector<8x256xf32>
    %275 = arith.cmpf oge, %273, %274 : vector<8x256xf32>
    %cst_270 = arith.constant 2.000000e-01 : f32
    %276 = vector.broadcast %cst_270 : f32 to vector<8x256xf32>
    %277 = arith.mulf %273, %276 : vector<8x256xf32>
    %278 = arith.select %275, %273, %277 : vector<8x256xi1>, vector<8x256xf32>
    %c40 = arith.constant 40 : index
    %c17_271 = arith.constant 17 : index
    %279 = vector.load %arg13[%c40, %c17_271] : memref<48x290xf32, #tpu.memory_space<vmem>>, vector<8x256xf32>
    tpu.vector_store %arg13[%c40, %c17_271], %278 {strides = array<i32>} : memref<48x290xf32, #tpu.memory_space<vmem>>, vector<8x256xf32>,
    %c0_272 = arith.constant 0 : index
    %c0_273 = arith.constant 0 : index
    %280 = vector.load %arg11[%c0_272, %c0_273] : memref<16x1xf32, #tpu.memory_space<vmem>>, vector<16x1xf32>
    %281 = vector.shape_cast %280 : vector<16x1xf32> to vector<16x1xf32>
    %282 = vector.broadcast %281 : vector<16x1xf32> to vector<16x256xf32>
    %c0_274 = arith.constant 0 : index
    %c0_275 = arith.constant 0 : index
    %283 = vector.load %arg13[%c0_274, %c0_275] : memref<48x290xf32, #tpu.memory_space<vmem>>, vector<48x256xf32>
    %284 = vector.broadcast %11 : vector<1x256xf32> to vector<48x256xf32>
    %285 = arith.mulf %283, %284 : vector<48x256xf32>
    %c0_276 = arith.constant 0 : index
    %c0_277 = arith.constant 0 : index
    %c0_278 = arith.constant 0 : index
    %c0_279 = arith.constant 0 : index
    %286 = vector.load %arg6[%c0_276, %c0_277, %c0_278, %c0_279] : memref<3x3x16x48xf32, #tpu.memory_space<vmem>>, vector<1x1x16x48xf32>
    %287 = vector.shape_cast %286 : vector<1x1x16x48xf32> to vector<16x48xf32>
    %cst_280 = arith.constant dense<0.000000e+00> : vector<16x256xf32>
    %288 = tpu.matmul %287, %285, %cst_280 {dimension_numbers = #tpu.dot_dimension_numbers<[1], [0], [0], [1], [0, 0, 1, 1], [], []>} : vector<16x48xf32>, vector<48x256xf32>, vector<16x256xf32> -> vector<16x256xf32>
    %289 = arith.addf %282, %288 : vector<16x256xf32>
    %c0_281 = arith.constant 0 : index
    %c1_282 = arith.constant 1 : index
    %290 = vector.load %arg13[%c0_281, %c1_282] : memref<48x290xf32, #tpu.memory_space<vmem>>, vector<48x256xf32>
    %c0_283 = arith.constant 0 : index
    %c1_284 = arith.constant 1 : index
    %c0_285 = arith.constant 0 : index
    %c0_286 = arith.constant 0 : index
    %291 = vector.load %arg6[%c0_283, %c1_284, %c0_285, %c0_286] : memref<3x3x16x48xf32, #tpu.memory_space<vmem>>, vector<1x1x16x48xf32>
    %292 = vector.shape_cast %291 : vector<1x1x16x48xf32> to vector<16x48xf32>
    %cst_287 = arith.constant dense<0.000000e+00> : vector<16x256xf32>
    %293 = tpu.matmul %292, %290, %cst_287 {dimension_numbers = #tpu.dot_dimension_numbers<[1], [0], [0], [1], [0, 0, 1, 1], [], []>} : vector<16x48xf32>, vector<48x256xf32>, vector<16x256xf32> -> vector<16x256xf32>
    %294 = arith.addf %289, %293 : vector<16x256xf32>
    %c0_288 = arith.constant 0 : index
    %c2_289 = arith.constant 2 : index
    %295 = vector.load %arg13[%c0_288, %c2_289] : memref<48x290xf32, #tpu.memory_space<vmem>>, vector<48x256xf32>
    %296 = vector.broadcast %15 : vector<1x256xf32> to vector<48x256xf32>
    %297 = arith.mulf %295, %296 : vector<48x256xf32>
    %c0_290 = arith.constant 0 : index
    %c2_291 = arith.constant 2 : index
    %c0_292 = arith.constant 0 : index
    %c0_293 = arith.constant 0 : index
    %298 = vector.load %arg6[%c0_290, %c2_291, %c0_292, %c0_293] : memref<3x3x16x48xf32, #tpu.memory_space<vmem>>, vector<1x1x16x48xf32>
    %299 = vector.shape_cast %298 : vector<1x1x16x48xf32> to vector<16x48xf32>
    %cst_294 = arith.constant dense<0.000000e+00> : vector<16x256xf32>
    %300 = tpu.matmul %299, %297, %cst_294 {dimension_numbers = #tpu.dot_dimension_numbers<[1], [0], [0], [1], [0, 0, 1, 1], [], []>} : vector<16x48xf32>, vector<48x256xf32>, vector<16x256xf32> -> vector<16x256xf32>
    %301 = arith.addf %294, %300 : vector<16x256xf32>
    %c0_295 = arith.constant 0 : index
    %c16_296 = arith.constant 16 : index
    %302 = vector.load %arg13[%c0_295, %c16_296] : memref<48x290xf32, #tpu.memory_space<vmem>>, vector<48x256xf32>
    %303 = vector.broadcast %11 : vector<1x256xf32> to vector<48x256xf32>
    %304 = arith.mulf %302, %303 : vector<48x256xf32>
    %c1_297 = arith.constant 1 : index
    %c0_298 = arith.constant 0 : index
    %c0_299 = arith.constant 0 : index
    %c0_300 = arith.constant 0 : index
    %305 = vector.load %arg6[%c1_297, %c0_298, %c0_299, %c0_300] : memref<3x3x16x48xf32, #tpu.memory_space<vmem>>, vector<1x1x16x48xf32>
    %306 = vector.shape_cast %305 : vector<1x1x16x48xf32> to vector<16x48xf32>
    %cst_301 = arith.constant dense<0.000000e+00> : vector<16x256xf32>
    %307 = tpu.matmul %306, %304, %cst_301 {dimension_numbers = #tpu.dot_dimension_numbers<[1], [0], [0], [1], [0, 0, 1, 1], [], []>} : vector<16x48xf32>, vector<48x256xf32>, vector<16x256xf32> -> vector<16x256xf32>
    %308 = arith.addf %301, %307 : vector<16x256xf32>
    %c0_302 = arith.constant 0 : index
    %c17_303 = arith.constant 17 : index
    %309 = vector.load %arg13[%c0_302, %c17_303] : memref<48x290xf32, #tpu.memory_space<vmem>>, vector<48x256xf32>
    %c1_304 = arith.constant 1 : index
    %c1_305 = arith.constant 1 : index
    %c0_306 = arith.constant 0 : index
    %c0_307 = arith.constant 0 : index
    %310 = vector.load %arg6[%c1_304, %c1_305, %c0_306, %c0_307] : memref<3x3x16x48xf32, #tpu.memory_space<vmem>>, vector<1x1x16x48xf32>
    %311 = vector.shape_cast %310 : vector<1x1x16x48xf32> to vector<16x48xf32>
    %cst_308 = arith.constant dense<0.000000e+00> : vector<16x256xf32>
    %312 = tpu.matmul %311, %309, %cst_308 {dimension_numbers = #tpu.dot_dimension_numbers<[1], [0], [0], [1], [0, 0, 1, 1], [], []>} : vector<16x48xf32>, vector<48x256xf32>, vector<16x256xf32> -> vector<16x256xf32>
    %313 = arith.addf %308, %312 : vector<16x256xf32>
    %c0_309 = arith.constant 0 : index
    %c18_310 = arith.constant 18 : index
    %314 = vector.load %arg13[%c0_309, %c18_310] : memref<48x290xf32, #tpu.memory_space<vmem>>, vector<48x256xf32>
    %315 = vector.broadcast %15 : vector<1x256xf32> to vector<48x256xf32>
    %316 = arith.mulf %314, %315 : vector<48x256xf32>
    %c1_311 = arith.constant 1 : index
    %c2_312 = arith.constant 2 : index
    %c0_313 = arith.constant 0 : index
    %c0_314 = arith.constant 0 : index
    %317 = vector.load %arg6[%c1_311, %c2_312, %c0_313, %c0_314] : memref<3x3x16x48xf32, #tpu.memory_space<vmem>>, vector<1x1x16x48xf32>
    %318 = vector.shape_cast %317 : vector<1x1x16x48xf32> to vector<16x48xf32>
    %cst_315 = arith.constant dense<0.000000e+00> : vector<16x256xf32>
    %319 = tpu.matmul %318, %316, %cst_315 {dimension_numbers = #tpu.dot_dimension_numbers<[1], [0], [0], [1], [0, 0, 1, 1], [], []>} : vector<16x48xf32>, vector<48x256xf32>, vector<16x256xf32> -> vector<16x256xf32>
    %320 = arith.addf %313, %319 : vector<16x256xf32>
    %c0_316 = arith.constant 0 : index
    %c32_317 = arith.constant 32 : index
    %321 = vector.load %arg13[%c0_316, %c32_317] : memref<48x290xf32, #tpu.memory_space<vmem>>, vector<48x256xf32>
    %322 = vector.broadcast %11 : vector<1x256xf32> to vector<48x256xf32>
    %323 = arith.mulf %321, %322 : vector<48x256xf32>
    %c2_318 = arith.constant 2 : index
    %c0_319 = arith.constant 0 : index
    %c0_320 = arith.constant 0 : index
    %c0_321 = arith.constant 0 : index
    %324 = vector.load %arg6[%c2_318, %c0_319, %c0_320, %c0_321] : memref<3x3x16x48xf32, #tpu.memory_space<vmem>>, vector<1x1x16x48xf32>
    %325 = vector.shape_cast %324 : vector<1x1x16x48xf32> to vector<16x48xf32>
    %cst_322 = arith.constant dense<0.000000e+00> : vector<16x256xf32>
    %326 = tpu.matmul %325, %323, %cst_322 {dimension_numbers = #tpu.dot_dimension_numbers<[1], [0], [0], [1], [0, 0, 1, 1], [], []>} : vector<16x48xf32>, vector<48x256xf32>, vector<16x256xf32> -> vector<16x256xf32>
    %327 = arith.addf %320, %326 : vector<16x256xf32>
    %c0_323 = arith.constant 0 : index
    %c33_324 = arith.constant 33 : index
    %328 = vector.load %arg13[%c0_323, %c33_324] : memref<48x290xf32, #tpu.memory_space<vmem>>, vector<48x256xf32>
    %c2_325 = arith.constant 2 : index
    %c1_326 = arith.constant 1 : index
    %c0_327 = arith.constant 0 : index
    %c0_328 = arith.constant 0 : index
    %329 = vector.load %arg6[%c2_325, %c1_326, %c0_327, %c0_328] : memref<3x3x16x48xf32, #tpu.memory_space<vmem>>, vector<1x1x16x48xf32>
    %330 = vector.shape_cast %329 : vector<1x1x16x48xf32> to vector<16x48xf32>
    %cst_329 = arith.constant dense<0.000000e+00> : vector<16x256xf32>
    %331 = tpu.matmul %330, %328, %cst_329 {dimension_numbers = #tpu.dot_dimension_numbers<[1], [0], [0], [1], [0, 0, 1, 1], [], []>} : vector<16x48xf32>, vector<48x256xf32>, vector<16x256xf32> -> vector<16x256xf32>
    %332 = arith.addf %327, %331 : vector<16x256xf32>
    %c0_330 = arith.constant 0 : index
    %c34_331 = arith.constant 34 : index
    %333 = vector.load %arg13[%c0_330, %c34_331] : memref<48x290xf32, #tpu.memory_space<vmem>>, vector<48x256xf32>
    %334 = vector.broadcast %15 : vector<1x256xf32> to vector<48x256xf32>
    %335 = arith.mulf %333, %334 : vector<48x256xf32>
    %c2_332 = arith.constant 2 : index
    %c2_333 = arith.constant 2 : index
    %c0_334 = arith.constant 0 : index
    %c0_335 = arith.constant 0 : index
    %336 = vector.load %arg6[%c2_332, %c2_333, %c0_334, %c0_335] : memref<3x3x16x48xf32, #tpu.memory_space<vmem>>, vector<1x1x16x48xf32>
    %337 = vector.shape_cast %336 : vector<1x1x16x48xf32> to vector<16x48xf32>
    %cst_336 = arith.constant dense<0.000000e+00> : vector<16x256xf32>
    %338 = tpu.matmul %337, %335, %cst_336 {dimension_numbers = #tpu.dot_dimension_numbers<[1], [0], [0], [1], [0, 0, 1, 1], [], []>} : vector<16x48xf32>, vector<48x256xf32>, vector<16x256xf32> -> vector<16x256xf32>
    %339 = arith.addf %332, %338 : vector<16x256xf32>
    %cst_337 = arith.constant 2.000000e-01 : f32
    %340 = vector.broadcast %cst_337 : f32 to vector<16x256xf32>
    %341 = arith.mulf %339, %340 : vector<16x256xf32>
    %342 = arith.addf %341, %3 : vector<16x256xf32>
    %c0_338 = arith.constant 0 : index
    %c0_339 = arith.constant 0 : index
    %c0_340 = arith.constant 0 : index
    %343 = vector.load %arg12[%c0_338, %c0_339, %c0_340] : memref<1x16x256xf32, #tpu.memory_space<vmem>>, vector<1x16x256xf32>
    %344 = vector.shape_cast %343 : vector<1x16x256xf32> to vector<16x256xf32>
    %345 = vector.shape_cast %342 : vector<16x256xf32> to vector<1x16x256xf32>
    tpu.vector_store %arg12[%c0_338, %c0_339, %c0_340], %345 {strides = array<i32>} : memref<1x16x256xf32, #tpu.memory_space<vmem>>, vector<1x16x256xf32>,
    return
  }
  func.func @transform_0(%arg0: i32) -> (i32, i32, i32) {
    %c0_i32 = arith.constant 0 : i32
    %c0_i32_0 = arith.constant 0 : i32
    %c0_i32_1 = arith.constant 0 : i32
    return %arg0, %c0_i32, %c0_i32_0 : i32, i32, i32
  }
  func.func @transform_1(%arg0: i32) -> (i32, i32, i32, i32) {
    %c0_i32 = arith.constant 0 : i32
    %c0_i32_0 = arith.constant 0 : i32
    %c0_i32_1 = arith.constant 0 : i32
    %c0_i32_2 = arith.constant 0 : i32
    %c0_i32_3 = arith.constant 0 : i32
    return %c0_i32, %c0_i32_0, %c0_i32_1, %c0_i32_2 : i32, i32, i32, i32
  }
  func.func @transform_2(%arg0: i32) -> (i32, i32, i32, i32) {
    %c0_i32 = arith.constant 0 : i32
    %c0_i32_0 = arith.constant 0 : i32
    %c0_i32_1 = arith.constant 0 : i32
    %c0_i32_2 = arith.constant 0 : i32
    %c0_i32_3 = arith.constant 0 : i32
    return %c0_i32, %c0_i32_0, %c0_i32_1, %c0_i32_2 : i32, i32, i32, i32
  }
  func.func @transform_3(%arg0: i32) -> (i32, i32, i32, i32) {
    %c0_i32 = arith.constant 0 : i32
    %c0_i32_0 = arith.constant 0 : i32
    %c0_i32_1 = arith.constant 0 : i32
    %c0_i32_2 = arith.constant 0 : i32
    %c0_i32_3 = arith.constant 0 : i32
    return %c0_i32, %c0_i32_0, %c0_i32_1, %c0_i32_2 : i32, i32, i32, i32
  }
  func.func @transform_4(%arg0: i32) -> (i32, i32, i32, i32) {
    %c0_i32 = arith.constant 0 : i32
    %c0_i32_0 = arith.constant 0 : i32
    %c0_i32_1 = arith.constant 0 : i32
    %c0_i32_2 = arith.constant 0 : i32
    %c0_i32_3 = arith.constant 0 : i32
    return %c0_i32, %c0_i32_0, %c0_i32_1, %c0_i32_2 : i32, i32, i32, i32
  }
  func.func @transform_5(%arg0: i32) -> (i32, i32, i32, i32) {
    %c0_i32 = arith.constant 0 : i32
    %c0_i32_0 = arith.constant 0 : i32
    %c0_i32_1 = arith.constant 0 : i32
    %c0_i32_2 = arith.constant 0 : i32
    %c0_i32_3 = arith.constant 0 : i32
    return %c0_i32, %c0_i32_0, %c0_i32_1, %c0_i32_2 : i32, i32, i32, i32
  }
  func.func @transform_6(%arg0: i32) -> (i32, i32) {
    %c0_i32 = arith.constant 0 : i32
    %c0_i32_0 = arith.constant 0 : i32
    %c0_i32_1 = arith.constant 0 : i32
    return %c0_i32, %c0_i32_0 : i32, i32
  }
  func.func @transform_7(%arg0: i32) -> (i32, i32) {
    %c0_i32 = arith.constant 0 : i32
    %c0_i32_0 = arith.constant 0 : i32
    %c0_i32_1 = arith.constant 0 : i32
    return %c0_i32, %c0_i32_0 : i32, i32
  }
  func.func @transform_8(%arg0: i32) -> (i32, i32) {
    %c0_i32 = arith.constant 0 : i32
    %c0_i32_0 = arith.constant 0 : i32
    %c0_i32_1 = arith.constant 0 : i32
    return %c0_i32, %c0_i32_0 : i32, i32
  }
  func.func @transform_9(%arg0: i32) -> (i32, i32) {
    %c0_i32 = arith.constant 0 : i32
    %c0_i32_0 = arith.constant 0 : i32
    %c0_i32_1 = arith.constant 0 : i32
    return %c0_i32, %c0_i32_0 : i32, i32
  }
  func.func @transform_10(%arg0: i32) -> (i32, i32) {
    %c0_i32 = arith.constant 0 : i32
    %c0_i32_0 = arith.constant 0 : i32
    %c0_i32_1 = arith.constant 0 : i32
    return %c0_i32, %c0_i32_0 : i32, i32
  }
  func.func @transform_11(%arg0: i32) -> (i32, i32, i32) {
    %c0_i32 = arith.constant 0 : i32
    %c0_i32_0 = arith.constant 0 : i32
    %c0_i32_1 = arith.constant 0 : i32
    return %arg0, %c0_i32, %c0_i32_0 : i32, i32, i32
  }
}

</mosaic_0001>

<bundles_post_ra>
// kernel: tpu_custom_call.1
= control target key start
LH: loop header
LB: loop body
LE: loop exit
PB: predicated region body
PF: predicated region fallthrough
CT: control target
= control target key end

     0   :  { %s10338_s0 = inlined_call_operand.hbm [shape: f32[2,16,256], index: 0, kind: input, shape index: {}]   ;;  %s10339_s1 = inlined_call_operand.hbm [shape: f32[3,3,8,16], index: 1, kind: input, shape index: {}]   ;;  %s10340_s2 = inlined_call_operand.hbm [shape: f32[3,3,8,24], index: 2, kind: input, shape index: {}]   ;;  %s10341_s3 = inlined_call_operand.hbm [shape: f32[3,3,8,32], index: 3, kind: input, shape index: {}]   ;;  %s10342_s4 = inlined_call_operand.hbm [shape: f32[3,3,8,40], index: 4, kind: input, shape index: {}]   ;;  %s10343_s5 = inlined_call_operand.hbm [shape: f32[3,3,16,48], index: 5, kind: input, shape index: {}]   ;;  %s10344_s6 = inlined_call_operand.vmem [shape: f32[8,1], index: 6, kind: input, shape index: {}]   ;;  %s10345_s7 = inlined_call_operand.vmem [shape: f32[8,1], index: 7, kind: input, shape index: {}]   ;;  %s10346_s8 = inlined_call_operand.vmem [shape: f32[8,1], index: 8, kind: input, shape index: {}]   ;;  %s10347_s9 = inlined_call_operand.vmem [shape: f32[8,1], index: 9, kind: input, shape index: {}]   ;;  %s10348_s10 = inlined_call_operand.vmem [shape: f32[16,1], index: 10, kind: input, shape index: {}]   ;;  %s10349_s11 = inlined_call_operand.hbm [shape: f32[2,16,256], index: 11, kind: output, shape index: {}]  }
   0x1   :  { %10500 = sst [smem:[#allocation73_spill]] %s10339_s1 }
   0x2   :  { %10501 = sst [smem:[#allocation74_spill]] %s10340_s2 }
   0x3   :  { %10502 = sst [smem:[#allocation75_spill]] %s10341_s3 }
   0x4   :  { %10503 = sst [smem:[#allocation76_spill]] %s10342_s4 }
   0x5   :  { %10504 = sst [smem:[#allocation77_spill]] %s10343_s5 }
   0x6   :  { %16 = vsyncpa [#allocation4], 0 }
   0x7   :  { %18 = vsyncpa [#allocation4 + $0x1], 0 }
   0x8   :  { %19 = vsyncpa [#allocation7], 0 }
   0x9   :  { %20 = vsyncpa [#allocation10], 0 }
   0xa   :  { %21 = vsyncpa [#allocation13], 0 }
   0xb   :  { %22 = vsyncpa [#allocation5], 0 }
   0xc   :  { %24 = vsyncpa [#allocation5 + $0x1], 0  ;;  %s7363_s17 = smov 0   ;;  %s7365_s18 = smov 0  }
   0xd   :  { %s7367_s19 = smov 0   ;;  %s7369_s20 = smov 0  }
   0xe LB: > { %s10505_s1 = sld [smem:[#allocation73_spill]]  ;;  %s7387_s24 = sadd.s32 4294967295, %s7275_s20   ;;  %s7275_s20 = sphi %s7369_s20, %s10771_s20   ;;  %s7271_s19 = sphi %s7367_s19, %s10770_s19   ;;  %s7267_s18 = sphi %s7365_s18, %s10769_s18   ;;  %s7263_s17 = sphi %s7363_s17, %s10768_s17  }
   0xf   : > { %p5509_p0 = scmp.ge.s32.totalorder %s7275_s20, 1  ;;  %p51_p1 = scmp.eq.s32.totalorder %s7387_s24, 0 }
  0x10   : > { %p297_p2 = scmp.lt.s32.totalorder %s7275_s20, 3  ;;  %s7277_s26 = smov [#allocation6]  }
  0x11   : > { %s310_s27 = sshll.u32 %s7277_s26, 4  ;;  %s10507_s3 = sld [smem:[#allocation75_spill]]  ;;  %s311_s27 = int_to_ptr.vmem [resolvable:$true] %s310_s27 }
  0x12   : > { %p7392_p3 = pnand %p5509_p0, %p297_p2  ;;  %s10509_s2 = sld [smem:[#allocation74_spill]] }
  0x13   : > { %s7278_s16 = smov [#allocation9]   ;;  %s7279_s22 = smov 128  }
  0x14   : > { %s308_s23 = sshll.u32 %s10505_s1, 4  ;;  %p5670_p4 = pneg %p7392_p3  ;;  %s309_s23 = int_to_ptr.hbm [resolvable:$true] %s308_s23 }
  0x15   : > { %s338_s21 = sshll.u32 %s7278_s16, 4  ;;  %s7280_s26 = smov 8   ;;  %s339_s21 = int_to_ptr.vmem [resolvable:$true] %s338_s21 }
  0x16   : > { %p7404_p6 = pnand %p5670_p4, %p51_p1  ;;  %s10510_s4 = sld [smem:[#allocation76_spill]] }
  0x17   : > { %s336_s30 = sshll.u32 %s10507_s3, 4  ;;  %s7281_s3 = smov [#allocation8]   ;;  %s337_s30 = int_to_ptr.hbm [resolvable:$true] %s336_s30 }
  0x18   : > { %s322_s15 = sshll.u32 %s10509_s2, 4  ;;  %s324_s13 = sshll.u32 %s7281_s3, 4  ;;  %s323_s15 = int_to_ptr.hbm [resolvable:$true] %s322_s15  ;;  %s325_s13 = int_to_ptr.vmem [resolvable:$true] %s324_s13 }
  0x19   : > { %5673 = dma.hbm_to_vmem [thread:$0]  (!%p7404_p6), %s309_s23, 1152, %s311_s27, [#allocation7], %s7279_s22, %s7279_s22, %s7280_s26  }
  0x1a   : > { %5679 = dma.hbm_to_vmem [thread:$0]  (!%p7404_p6), %s337_s30, 1152, %s339_s21, [#allocation10], %s7279_s22, %s7279_s22, %s7280_s26  }
  0x1b   : > { %5676 = dma.hbm_to_vmem [thread:$0]  (!%p7404_p6), %s323_s15, 1152, %s325_s13, [#allocation7], %s7279_s22, %s7279_s22, %s7280_s26  }
  0x1c   : > { %s350_s1 = sshll.u32 %s10510_s4, 4  ;;  %s7282_s23 = smov [#allocation11]   ;;  %s351_s1 = int_to_ptr.hbm [resolvable:$true] %s350_s1 }
  0x1d   : > { %s352_s27 = sshll.u32 %s7282_s23, 4  ;;  %s10511_s5 = sld [smem:[#allocation77_spill]]  ;;  %s353_s27 = int_to_ptr.vmem [resolvable:$true] %s352_s27 }
  0x1e   : > { %5682 = dma.hbm_to_vmem [thread:$0]  (!%p7404_p6), %s351_s1, 1152, %s353_s27, [#allocation10], %s7279_s22, %s7279_s22, %s7280_s26  }
  0x1f   : > { %s7283_s3 = smov [#allocation12]   ;;  %s5508_s15 = sadd.s32 4294967294, %s7275_s20  }
  0x20   : > { %s366_s21 = sshll.u32 %s7283_s3, 4  ;;  %s7429_s28 = sadd.s32 1, %s7275_s20   ;;  %s367_s21 = int_to_ptr.vmem [resolvable:$true] %s366_s21 }
  0x21   : > { %s37_s29 = sadd.s32 1, %s7271_s19  ;;  %s34_s13 = ssub.s32 %s7275_s20, %s7429_s28 }
  0x22   : > { %p44_p7 = scmp.ne.s32.totalorder %s7271_s19, %s7267_s18  ;;  %p35_p8 = scmp.eq.s32.totalorder %s34_s13, 0 }
  0x23   : > { %s364_s16 = sshll.u32 %s10511_s5, 4  ;;  %p45_p9 = scmp.eq.s32.totalorder %s7275_s20, 0  ;;  %s365_s16 = int_to_ptr.hbm [resolvable:$true] %s364_s16 }
  0x24   : > { %5685 = dma.hbm_to_vmem [thread:$0]  (!%p7404_p6), %s365_s16, 2304, %s367_s21, [#allocation13], %s7279_s22, %s7279_s22, %s7280_s26  }
  0x25   : > { %p50_p10 = scmp.ne.s32.totalorder %s7267_s18, %s7263_s17  ;;  %p284_p11 = scmp.eq.s32.totalorder %s7387_s24, 1 }
  0x26   : > { %s7441_s1 = scalar_select %p35_p8, %s7271_s19, %s37_s29  }
  0x27   : > { %p7443_p12 = por %p45_p9, %p44_p7  ;;  %p7449_p13 = por %p51_p1, %p50_p10 }
  0x28   : > { %10512 = sst [smem:[#allocation20_spill]] %s7441_s1  ;;  %p7453_p0 = por %p284_p11, %p44_p7 }
  0x29   : > { %p290_p2 = scmp.eq.s32.totalorder %s5508_s15, 1  ;;  %p5699_p4 = scmp.lt.s32.totalorder %s7275_s20, 2 }
  0x2a   : > { %s395_s26 = sand.u32 1, %s7271_s19   ;;  %s5644_s14 = sshll.u32 %s7275_s20, 5 }
  0x2b   : > { %p7459_p6 = por %p290_p2, %p50_p10  ;;  %s5516_s30 = sshll.u32 %s395_s26, 5 }
  0x2c   : > { %s404_s21 = scalar_lea.hbm %s10338_s0, %s5644_s14  ;;  %s399_s13 = scalar_lea.vmem [#allocation3], %s5516_s30 }
  0x2d   : > { %s405_s29 = sshll.u32 %s404_s21, 4  ;;  %s407_s2 = sshll.u32 %s399_s13, 4  ;;  %s406_s29 = int_to_ptr.hbm [resolvable:$true] %s405_s29  ;;  %s408_s2 = int_to_ptr.vmem [resolvable:$true] %s407_s2 }
  0x2e   : > { %p7469_p7 = pnand %p5699_p4, %p7443_p12  ;;  %s396_s4 = scalar_lea.sflag [#allocation4], %s395_s26 }
  0x2f   : > { %s7167_s5 = sshra.s32 %s406_s29, 4  ;;  %s7174_s16 = scalar_lea.hbm %s10338_s0, 64  ;;  %s7168_s5 = int_to_ptr.hbm [resolvable:$true] %s7167_s5 }
  0x30   : > { %s7169_s1 = scalar_lea.hbm %s7168_s5, 32  ;;  %p7171_p9 = pneg %p7469_p7 }
  0x31   : > { %p7170_p8 = scmp.ne.s32.totalorder %s7168_s5, %s7169_s1  ;;  %p7175_p12 = scmp.lt.s32.totalorder %s7168_s5, %s10338_s0 }
  0x32   : > { %p7176_p2 = scmp.lt.s32.totalorder %s7174_s16, %s7169_s1 }
  0x33   : > { %p7172_p10 = pnand %p7171_p9, %p7170_p8 }
  0x34   : > { %p7177_p4 = por %p7176_p2, %p7175_p12 }
  0x35   : > { %p7173_p11 = pneg %p7172_p10 }
  0x37   : > { %p7178_p5 = pnand %p7177_p4, %p7173_p11 }
  0x39   : > { %7181 = shalt.err (!%p7178_p5)
}
  0x3a   : > { %s7284_s26 = smov 256   ;;  %s7285_s21 = smov 16  }
  0x3b   : > { %5689 = dma.hbm_to_vmem [thread:$0]  (!%p7469_p7), %s406_s29, 512, %s408_s2, %s396_s4, %s7284_s26, %s7284_s26, %s7285_s21  }
  0x3c   : > { %419 = sbr.rel (%p7392_p3) target bundleno = 2416 (0x970), region = 64 }
  0x41   : > { %s7486_s13 = sand.u32 1, %s7267_s18  }
  0x42   : > { %s5520_s5 = sshll.u32 %s7486_s13, 5  ;;  %s422_s1 = scalar_lea.sflag [#allocation4], %s7486_s13 }
  0x43   : > { %s7492_s14 = scalar_lea.vmem [#allocation3], %s5520_s5 }
  0x44   : > { %7242 = dma.done.wait (%p7449_p13), %s422_s1, 512  }
  0x45   : > { %7244 = vsyncadd (%p7449_p13), %s422_s1, 4294966784 }
  0x46   : > { %7246 = dma.done.wait (%p51_p1), [#allocation7], 2304  }
  0x47   : > { %7248 = vsyncadd (%p51_p1), [#allocation7], 4294964992 }
  0x48   : > { %7250 = dma.done.wait (%p51_p1), [#allocation10], 2304  }
  0x49   : > { %7252 = vsyncadd (%p51_p1), [#allocation10], 4294964992 }
  0x4a   : > { %7254 = dma.done.wait (%p51_p1), [#allocation13], 2304  }
  0x4b   : > { %7256 = vsyncadd (%p51_p1), [#allocation13], 4294964992  ;;  %v541_v0 = vlaneseq  ;;  %v7286_v1 = vmov 0   ;;  %v7287_v2 = vmov 0.0   ;;  %v511_v7 = vld [vmem:[%s7492_s14 + $0x10] sm:$0xff]  ;;  %v509_v8 = vld [vmem:[%s7492_s14] sm:$0xff] }
  0x4c   : > { %5764 = vset.pattern.permute.xlu2 %v7286_v1  ;;  %490 = vst [vmem:[#allocation2] sm:$0xff] %v7287_v2  ;;  %5910 = vset.pattern.permute.xlu0 %v7286_v1  ;;  %s7288_s2 = smov 17   ;;  %v570_v9 = vld [vmem:[%s10344_s6] sm:$0xff]  ;;  %v512_v12 = vld [vmem:[%s7492_s14 + $0x18] sm:$0xff]  ;;  %v510_v13 = vld [vmem:[%s7492_s14 + $0x8] sm:$0xff]  ;;  %s7289_s12 = smov 2  }
  0x4d   : > { %v542_v3 = vand.u32 127, %v541_v0  ;;  %494 = vst [vmem:[#allocation2 + $0x18] sm:$0xff] %v7287_v2  ;;  %6621 = vset.pattern.permute.xlu1 %v7286_v1  ;;  %517 = vrot.lane.b32.xlu0 %v509_v8, %s7288_s2  ;;  %s7290_s29 = smov 18   ;;  %s10468_s15 = smov 16   ;;  %vm492_vm4 = vcmask 277504   ;;  %vm534_vm5 = vcmask 1047688  }
  0x4e   : > { %497 = vst [vmem:[#allocation2 + $0x30] sm:$0xff] %v7287_v2  ;;  %521 = vrot.lane.b32.xlu1 %v511_v7, %s7288_s2  ;;  %573 = vperm.xlu2 %5764, %v570_v9   ;;  %s7292_s30 = smov 32   ;;  %vm525_vm6 = vcmask 138240   ;;  %v584_v29 = vld [vmem:[#allocation6] sm:$0xff]  ;;  %vm585_vm7 = vcmask 130048   ;;  %s7293_s16 = smov 127  }
  0x4f   : > { %v543_v4 = vadd.s32 128, %v542_v3  ;;  %500 = vst [vmem:[#allocation2 + $0x48] sm:$0xff] %v7287_v2  ;;  %v548_v5 = vand.u32 15, %v542_v3  ;;  %s7294_s3 = smov 111   ;;  %vm717_vm8 = vcmask 15360   ;;  %s7295_s23 = smov 126  }
  0x50   : > { %503 = vst [vmem:[#allocation2 + $0x60] sm:$0xff] %v7287_v2  ;;  %s7296_s26 = smov 110   ;;  %s7297_s21 = smov 112   ;;  %vm964_vm9 = vcmask 146432   ;;  %vm1053_vm10 = vcmask 261120   ;;  %vm748_vm11 = vcmask 1031168  }
  0x51   : > { %v555_v6 = vand.u32 15, %v543_v4  ;;  %506 = vst [vmem:[#allocation2 + $0x78] sm:$0xff] %v7287_v2  ;;  %vm564_vm0 = vcmp.ne.s32.totalorder %v548_v5, 15  ;;  %vm558_vm2 = vcmp.ne.s32.totalorder %v548_v5, 0  ;;  %s7298_s1 = smov 96   ;;  %s7299_s4 = smov 95  }
  0x52   : > { %v5529_v10 = vsel %vm564_vm0, 1.0, %v7287_v2  ;;  %v7523_v15 = vsel %vm558_vm2, 1.0, %v7287_v2  ;;  %496 = vst.msk [vmem:[#allocation2 + $0x28] sm:$0xff] %vm492_vm4, %v7287_v2  ;;  %s7300_s25 = smov 34   ;;  %vm657_vm12 = vcmask 1039360   ;;  %vm906_vm13 = vcmask 908288  }
  0x53   : > { %vm565_vm1 = vcmp.ne.s32.totalorder %v555_v6, 15  ;;  %vm559_vm3 = vcmp.ne.s32.totalorder %v555_v6, 0  ;;  %10518 = vst [vmem:[#allocation21_spill] sm:$0xff] %v7523_v15  ;;  %vm1084_vm14 = vcmask 785408   ;;  %vm838_vm15 = vcmask 916480  }
  0x54   : > { %v5530_v11 = vsel %vm565_vm1, 1.0, %v7287_v2  ;;  %v7525_v16 = vsel %vm559_vm3, 1.0, %v7287_v2  ;;  %493 = vst.msk [vmem:[#allocation2 + $0x10] sm:$0xff] %vm492_vm4, %v7287_v2  ;;  %vm995_vm0 = vcmask 900096   ;;  %vm1152_vm1 = vcmask 777216  }
  0x55   : > { %v7519_v14 = vpack.i.bf16 %v5530_v11, %v5529_v10  ;;  %519 = vrot.lane.b32.xlu0 %v510_v13, %s7288_s2  ;;  %10519 = vst [vmem:[#allocation22_spill] sm:$0xff] %v7525_v16  ;;  %v5770_v17 = vpack.i.bf16 %v7525_v16, %v7523_v15  ;;  %vm1240_vm2 = vcmask 769024  }
  0x56   : > { %523 = vrot.lane.b32.xlu1 %v512_v12, %s7288_s2  ;;  %499 = vst.msk [vmem:[#allocation2 + $0x40] sm:$0xff] %vm492_vm4, %v7287_v2 }
  0x57   : > { %5766 = vrot.lane.b32.xlu2 %v7519_v14, %s7289_s12  ;;  %502 = vst.msk [vmem:[#allocation2 + $0x58] sm:$0xff] %vm492_vm4, %v7287_v2  ;;  %s7301_s12 = smov 94  }
  0x58   : > { %505 = vst.msk [vmem:[#allocation2 + $0x70] sm:$0xff] %vm492_vm4, %v7287_v2 }
  0x59   : > { %508 = vst.msk [vmem:[#allocation2 + $0x88] sm:$0xff] %vm492_vm4, %v7287_v2 }
  0x5d   : > { %5771 = vrot.lane.b32.xlu0 %v5770_v17, %s10468_s15  ;;  %s489_s15 = scalar_lea.vmem [#allocation14], %s5520_s5  ;;  %s5372_s5 = scalar_lea.sflag [#allocation5], %s7486_s13 }
  0x5e   : > { %5776 = vrot.lane.b32.xlu1 %v7519_v14, %s7290_s29  ;;  %s7217_s29 = scalar_lea.hbm %s10349_s11, 64 }
  0x5f   : > { %5781 = vrot.lane.b32.xlu2 %v5770_v17, %s7292_s30 }
  0xa8   : > { %v7570_v31 = vpop.permute.xlu2 %573 }
  0xb1   : > { %v5767_v38 = vpop.permute.xlu2 %5766 }
  0xb2   : > { %v7594_v40 = vunpack.i.h.bf16 %v5767_v38  ;;  %v7596_v41 = vunpack.i.l.bf16 %v5767_v38 }
  0xb4   : > { %10520 = vst [vmem:[#allocation23_spill] sm:$0xff] %v7594_v40  ;;  %v7639_v56 = vsel %vm717_vm8, %v7596_v41, %v7594_v40 }
  0xb5   : > { %10521 = vst [vmem:[#allocation24_spill] sm:$0xff] %v7596_v41 }
  0xb6   : > { %10526 = vst [vmem:[#allocation29_spill] sm:$0xff] %v7639_v56 }
  0xb9   : > { %v5782_v5 = vpop.permute.xlu2 %5781 }
  0xba   : > { %v7695_v11 = vunpack.i.h.bf16 %v5782_v5  ;;  %v7697_v12 = vunpack.i.l.bf16 %v5782_v5 }
  0xbc   : > { %10529 = vst [vmem:[#allocation32_spill] sm:$0xff] %v7697_v12 }
  0xbf   : > { %v518_v19 = vpop.permute.xlu0 %517 }
  0xc0   : > { %v522_v18 = vpop.permute.xlu1 %521  ;;  %535 = vst.msk [vmem:[#allocation2] sm:$0xff] %vm534_vm5, %v518_v19 }
  0xc1   : > { %538 = vst.msk [vmem:[#allocation2 + $0x18] sm:$0xff] %vm534_vm5, %v522_v18 }
  0xc7   : > { %v520_v21 = vpop.permute.xlu0 %519  ;;  %v7553_v26 = vld [vmem:[#allocation2] sm:$0xff] }
  0xc8   : > { %v524_v20 = vpop.permute.xlu1 %523  ;;  %v7540_v22 = vld [vmem:[#allocation2 + $0x18] sm:$0xff]  ;;  %v7547_v24 = vsel %vm525_vm6, %v518_v19, %v520_v21  ;;  %v7562_v28 = vmul.f32 %v7523_v15, %v7553_v26  ;;  %537 = vst.msk [vmem:[#allocation2 + $0x10] sm:$0xff] %vm525_vm6, %v520_v21  ;;  %v7655_v60 = vmul.f32 %v7596_v41, %v7553_v26 }
  0xc9   : > { %v7543_v23 = vsel %vm525_vm6, %v522_v18, %v524_v20  ;;  %540 = vst.msk [vmem:[#allocation2 + $0x28] sm:$0xff] %vm525_vm6, %v524_v20  ;;  %v7551_v25 = vmul.f32 %v7523_v15, %v7540_v22  ;;  %v581_v30 = vmul.f32 %v7525_v16, %v7547_v24  ;;  %v7592_v39 = vpack.i.bf16 %v7547_v24, %v7553_v26 }
  0xca   : > { %539 = vst [vmem:[#allocation2 + $0x20] sm:$0xff] %v7543_v23  ;;  %v583_v27 = vmul.f32 %v7525_v16, %v7543_v23  ;;  %v725_v47 = vmul.f32 %v7596_v41, %v7540_v22  ;;  %v723_v61 = vmul.f32 %v7639_v56, %v7547_v24  ;;  %v726_v62 = vmul.f32 %v7639_v56, %v7543_v23 }
  0xcb   : > { %536 = vst [vmem:[#allocation2 + $0x8] sm:$0xff] %v7547_v24  ;;  %603 = vmatpush.msra.mxu2 %v7551_v25  ;;  %v1061_v19 = vmul.f32 %v7697_v12, %v7540_v22  ;;  %v7717_v20 = vsel %vm1053_vm10, %v7697_v12, %v7695_v11 }
  0xcc   : > { %623 = vmatpush.msra.mxu3 %v583_v27  ;;  %v7671_v2 = vpack.i.bf16 %v723_v61, %v7655_v60  ;;  %10530 = vst [vmem:[#allocation33_spill] sm:$0xff] %v7717_v20  ;;  %v1062_v27 = vmul.f32 %v7717_v20, %v7543_v23 }
  0xcd   : > { %604 = vmatpush.msra.mxu2 %v7562_v28 }
  0xce   : > { %5531 = vmatmul.msk.f32.vlgmr.msra.gmra.mxu2 %vm585_vm7, %v584_v29  ;;  %624 = vmatpush.msra.mxu3 %v581_v30 }
  0xcf   : > { %5532 = vmatmul.msk.f32.vlgmr.msra.gmra.mxu3 %vm585_vm7, %v584_v29  ;;  %v7578_v34 = vld [vmem:[#allocation2 + $0x10] sm:$0xff]  ;;  %v5772_v37 = vpop.permute.xlu0 %5771 }
  0xd0   : > { %v7572_v32 = vld [vmem:[#allocation2 + $0x28] sm:$0xff]  ;;  %v7582_v35 = vpack.i.bf16 %v7540_v22, %v7578_v34  ;;  %v5777_v36 = vpop.permute.xlu1 %5776  ;;  %v7602_v44 = vunpack.i.h.bf16 %v5772_v37  ;;  %v7604_v45 = vunpack.i.l.bf16 %v5772_v37  ;;  %v724_v46 = vmul.f32 %v7594_v40, %v7578_v34 }
  0xd1   : > { %v7576_v33 = vpack.i.bf16 %v7572_v32, %v7543_v23  ;;  %v7598_v42 = vunpack.i.h.bf16 %v5777_v36  ;;  %v7600_v43 = vunpack.i.l.bf16 %v5777_v36  ;;  %v727_v59 = vmul.f32 %v7594_v40, %v7572_v32 }
  0xd2   : > { %5791 = vrot.lane.b32.xlu2 %v7582_v35, %s7294_s3  ;;  %5786 = vrot.lane.b32.xlu0 %v7582_v35, %s7293_s16  ;;  %10523 = vst [vmem:[#allocation26_spill] sm:$0xff] %v7602_v44  ;;  %v814_v50 = vmul.f32 %v7602_v44, %v7578_v34  ;;  %v815_v51 = vmul.f32 %v7604_v45, %v7540_v22 }
  0xd3   : > { %5801 = vrot.lane.b32.xlu1 %v7576_v33, %s7293_s16  ;;  %10522 = vst [vmem:[#allocation25_spill] sm:$0xff] %v7600_v43  ;;  %v971_v48 = vmul.f32 %v7598_v42, %v7578_v34  ;;  %v972_v49 = vmul.f32 %v7600_v43, %v7540_v22  ;;  %v7624_v52 = vpack.i.bf16 %v725_v47, %v724_v46 }
  0xd4   : > { %10524 = vst [vmem:[#allocation27_spill] sm:$0xff] %v7604_v45  ;;  %v7629_v53 = vsel %vm585_vm7, %v7604_v45, %v7602_v44  ;;  %v7633_v55 = vpack.i.bf16 %v815_v51, %v814_v50  ;;  %v7647_v57 = vmul.f32 %v7604_v45, %v7553_v26  ;;  %v7666_v0 = vsel %vm964_vm9, %v7600_v43, %v7598_v42 }
  0xd5   : > { %10525 = vst [vmem:[#allocation28_spill] sm:$0xff] %v7629_v53  ;;  %v7631_v54 = vpack.i.bf16 %v972_v49, %v971_v48  ;;  %v813_v58 = vmul.f32 %v7629_v53, %v7547_v24  ;;  %v7668_v1 = vpack.i.bf16 %v727_v59, %v726_v62  ;;  %v973_v3 = vmul.f32 %v7666_v0, %v7543_v23 }
  0xd6   : > { %10527 = vst [vmem:[#allocation30_spill] sm:$0xff] %v7666_v0  ;;  %v974_v4 = vmul.f32 %v7598_v42, %v7572_v32  ;;  %v7685_v6 = vmul.f32 %v7600_v43, %v7553_v26  ;;  %v970_v7 = vmul.f32 %v7666_v0, %v7547_v24  ;;  %v816_v8 = vmul.f32 %v7629_v53, %v7543_v23 }
  0xd7   : > { %v7662_v63 = vpack.i.bf16 %v813_v58, %v7647_v57  ;;  %v817_v9 = vmul.f32 %v7602_v44, %v7572_v32  ;;  %v1060_v18 = vmul.f32 %v7695_v11, %v7578_v34  ;;  %v1063_v21 = vmul.f32 %v7695_v11, %v7572_v32 }
  0xd8   : > { %10528 = vst [vmem:[#allocation31_spill] sm:$0xff] %v7685_v6  ;;  %v7693_v10 = vpack.i.bf16 %v974_v4, %v973_v3  ;;  %v7700_v13 = vpack.i.bf16 %v970_v7, %v7685_v6  ;;  %v7735_v36 = vmul.f32 %v7697_v12, %v7553_v26  ;;  %v1059_v37 = vmul.f32 %v7717_v20, %v7547_v24 }
  0xd9   : > { %v7702_v17 = vpack.i.bf16 %v817_v9, %v816_v8  ;;  %v7723_v29 = vpack.i.bf16 %v1061_v19, %v1060_v18  ;;  %v7725_v30 = vpack.i.bf16 %v1063_v21, %v1062_v27  ;;  %v638_v18 = vld [vmem:[#allocation6 + $0x8] sm:$0xff] }
  0xda   : > { %5811 = vrot.lane.b32.xlu0 %v7576_v33, %s7294_s3  ;;  %5796 = vrot.lane.b32.xlu2 %v7592_v39, %s7293_s16  ;;  %v7740_v38 = vpack.i.bf16 %v1059_v37, %v7735_v36 }
  0xdb   : > { %5806 = vrot.lane.b32.xlu1 %v7592_v39, %s7294_s3 }
  0xe2   : > { %5826 = vrot.lane.b32.xlu0 %v7631_v54, %s7296_s26  ;;  %5821 = vrot.lane.b32.xlu2 %v7633_v55, %s7297_s21 }
  0xe3   : > { %5816 = vrot.lane.b32.xlu1 %v7624_v52, %s7295_s23 }
  0xea   : > { %5836 = vrot.lane.b32.xlu2 %v7668_v1, %s7295_s23  ;;  %5831 = vrot.lane.b32.xlu0 %v7671_v2, %s7295_s23 }
  0xeb   : > { %5841 = vrot.lane.b32.xlu1 %v7662_v63, %s7297_s21 }
  0xf2   : > { %5851 = vrot.lane.b32.xlu2 %v7700_v13, %s7296_s26  ;;  %5846 = vrot.lane.b32.xlu0 %v7702_v17, %s7297_s21 }
  0xf3   : > { %5856 = vrot.lane.b32.xlu1 %v7693_v10, %s7296_s26 }
  0xfa   : > { %5881 = vrot.lane.b32.xlu2 %v7725_v30, %s7298_s1  ;;  %5866 = vrot.lane.b32.xlu0 %v7592_v39, %s7299_s4 }
  0xfb   : > { %5861 = vrot.lane.b32.xlu1 %v7723_v29, %s7298_s1 }
 0x102   : > { %5886 = vrot.lane.b32.xlu2 %v7576_v33, %s7299_s4  ;;  %5876 = vrot.lane.b32.xlu0 %v7740_v38, %s7298_s1 }
 0x103   : > { %5871 = vrot.lane.b32.xlu1 %v7582_v35, %s7299_s4 }
 0x10a   : > { %5891 = vrot.lane.b32.xlu0 %v7519_v14, %s7300_s25 }
 0x12c   : > { %v7749_v46 = vpop.permute.xlu2 %5791 }
 0x134   : > { %v5797_v47 = vpop.permute.xlu2 %5796 }
 0x135   : > { %v5799_v58 = vunpack.i.h.bf16 %v5797_v47  ;;  %v5798_v59 = vunpack.i.l.bf16 %v5797_v47 }
 0x137   : > { %v658_v21 = vsel %vm657_vm12, %v5798_v59, %v5799_v58 }
 0x13c   : > { %v7751_v48 = vpop.permute.xlu2 %5821 }
 0x144   : > { %v5787_v61 = vpop.permute.xlu0 %5786  ;;  %v5837_v62 = vpop.permute.xlu2 %5836 }
 0x145   : > { %v5802_v49 = vpop.permute.xlu1 %5801  ;;  %v5789_v3 = vunpack.i.h.bf16 %v5787_v61  ;;  %v5788_v4 = vunpack.i.l.bf16 %v5787_v61  ;;  %v5839_v5 = vunpack.i.h.bf16 %v5837_v62  ;;  %v5838_v7 = vunpack.i.l.bf16 %v5837_v62 }
 0x146   : > { %v5804_v50 = vunpack.i.h.bf16 %v5802_v49  ;;  %v5803_v51 = vunpack.i.l.bf16 %v5802_v49 }
 0x147   : > { %v752_v8 = vsel %vm748_vm11, %v5838_v7, %v5839_v5  ;;  %v659_v19 = vsel %vm657_vm12, %v5799_v58, %v5788_v4 }
 0x148   : > { %v661_v14 = vsel %vm657_vm12, %v5803_v51, %v5804_v50  ;;  %v660_v9 = vsel %vm657_vm12, %v5789_v3, %v5803_v51  ;;  %794 = vmatpush.msra.mxu1 %v752_v8 }
 0x149   : > { %703 = vmatpush.msrb.mxu3 %v661_v14  ;;  %683 = vmatpush.msrb.mxu2 %v660_v9  ;;  %v5794_v9 = vunpack.i.h.bf16 %v7749_v46 }
 0x14b   : > { %704 = vmatpush.msrb.mxu3 %v659_v19  ;;  %684 = vmatpush.msrb.mxu2 %v658_v21 }
 0x14c   : > { %5534 = vmatmul.msk.f32.vlgmr.msrb.gmra.mxu3 %vm585_vm7, %v638_v18  ;;  %5533 = vmatmul.msk.f32.vlgmr.msrb.gmra.mxu2 %vm585_vm7, %v638_v18  ;;  %v5812_v37 = vpop.permute.xlu0 %5811  ;;  %v7760_v49 = vpop.permute.xlu2 %5851  ;;  %v729_v18 = vld [vmem:[#allocation6 + $0x10] sm:$0xff] }
 0x14d   : > { %v5807_v27 = vpop.permute.xlu1 %5806  ;;  %v5814_v3 = vunpack.i.h.bf16 %v5812_v37  ;;  %v5813_v59 = vunpack.i.l.bf16 %v5812_v37  ;;  %v5793_v37 = vunpack.i.l.bf16 %v7749_v46 }
 0x14e   : > { %v5809_v19 = vunpack.i.h.bf16 %v5807_v27  ;;  %v5808_v21 = vunpack.i.l.bf16 %v5807_v27 }
 0x14f   : > { %v910_v27 = vsel %vm906_vm13, %v5813_v59, %v5814_v3  ;;  %v5823_v3 = vunpack.i.l.bf16 %v7751_v48 }
 0x154   : > { %v7762_v51 = vpop.permute.xlu0 %5826  ;;  %v7765_v4 = vpop.permute.xlu2 %5881 }
 0x155   : > { %v5817_v47 = vpop.permute.xlu1 %5816 }
 0x156   : > { %v5819_v50 = vunpack.i.h.bf16 %v5817_v47  ;;  %v5818_v5 = vunpack.i.l.bf16 %v5817_v47  ;;  %v909_v47 = vsel %vm906_vm13, %v5794_v9, %v5813_v59  ;;  %v893_v59 = vld [vmem:[#allocation6 + $0x20] sm:$0xff] }
 0x158   : > { %v751_v61 = vsel %vm748_vm11, %v5819_v50, %v5838_v7  ;;  %v5884_v50 = vunpack.i.h.bf16 %v7765_v4 }
 0x159   : > { %774 = vmatpush.msra.mxu0 %v751_v61  ;;  %v5883_v61 = vunpack.i.l.bf16 %v7765_v4  ;;  %v908_v4 = vsel %vm906_vm13, %v5809_v19, %v5793_v37 }
 0x15c   : > { %v5832_v58 = vpop.permute.xlu0 %5831 }
 0x15d   : > { %v5842_v62 = vpop.permute.xlu1 %5841  ;;  %v5834_v14 = vunpack.i.h.bf16 %v5832_v58  ;;  %v5833_v8 = vunpack.i.l.bf16 %v5832_v58 }
 0x15f   : > { %v749_v6 = vsel %vm748_vm11, %v5833_v8, %v5834_v14  ;;  %v750_v7 = vsel %vm748_vm11, %v5834_v14, %v5818_v5  ;;  %v907_v5 = vsel %vm906_vm13, %v5808_v21, %v5809_v19  ;;  %v1088_v14 = vsel %vm1084_vm14, %v5883_v61, %v5884_v50 }
 0x160   : > { %775 = vmatpush.msra.mxu0 %v749_v6  ;;  %795 = vmatpush.msra.mxu1 %v750_v7  ;;  %v5824_v6 = vunpack.i.h.bf16 %v7751_v48  ;;  %v5844_v8 = vunpack.i.h.bf16 %v5842_v62  ;;  %v5853_v50 = vunpack.i.l.bf16 %v7760_v49  ;;  %v5828_v48 = vunpack.i.l.bf16 %v7762_v51 }
 0x161   : > { %5535 = vmatmul.msk.f32.vlgmr.msra.gmra.mxu0 %vm585_vm7, %v729_v18  ;;  %5536 = vmatmul.msk.f32.vlgmr.msra.gmra.mxu1 %vm585_vm7, %v729_v18  ;;  %v5843_v18 = vunpack.i.l.bf16 %v5842_v62  ;;  %v819_v62 = vld [vmem:[#allocation6 + $0x18] sm:$0xff] }
 0x162   : > { %932 = vmatpush.msrb.mxu0 %v909_v47  ;;  %952 = vmatpush.msrb.mxu1 %v910_v27  ;;  %v5887_v47 = vpop.permute.xlu2 %5886 }
 0x164   : > { %933 = vmatpush.msrb.mxu0 %v907_v5  ;;  %953 = vmatpush.msrb.mxu1 %v908_v4  ;;  %v5847_v46 = vpop.permute.xlu0 %5846  ;;  %v5854_v5 = vunpack.i.h.bf16 %v7760_v49  ;;  %v5829_v4 = vunpack.i.h.bf16 %v7762_v51 }
 0x165   : > { %v5857_v58 = vpop.permute.xlu1 %5856  ;;  %v5849_v9 = vunpack.i.h.bf16 %v5847_v46  ;;  %v5848_v7 = vunpack.i.l.bf16 %v5847_v46  ;;  %v839_v46 = vsel %vm838_vm15, %v5843_v18, %v5844_v8 }
 0x166   : > { %1130 = vmatpush.msra.mxu1 %v1088_v14  ;;  %v5859_v21 = vunpack.i.h.bf16 %v5857_v58  ;;  %v5858_v27 = vunpack.i.l.bf16 %v5857_v58  ;;  %v840_v14 = vsel %vm838_vm15, %v5844_v8, %v5823_v3  ;;  %v5889_v58 = vunpack.i.h.bf16 %v5887_v47 }
 0x167   : > { %v841_v19 = vsel %vm838_vm15, %v5824_v6, %v5848_v7  ;;  %v842_v37 = vsel %vm838_vm15, %v5848_v7, %v5849_v9  ;;  %v5888_v6 = vunpack.i.l.bf16 %v5887_v47  ;;  %v996_v7 = vsel %vm995_vm0, %v5853_v50, %v5854_v5 }
 0x168   : > { %864 = vmatpush.msra.mxu2 %v841_v19  ;;  %884 = vmatpush.msra.mxu3 %v842_v37  ;;  %v998_v51 = vsel %vm995_vm0, %v5829_v4, %v5858_v27  ;;  %v999_v18 = vsel %vm995_vm0, %v5858_v27, %v5859_v21  ;;  %v997_v3 = vsel %vm995_vm0, %v5854_v5, %v5828_v48  ;;  %v976_v19 = vld [vmem:[#allocation6 + $0x28] sm:$0xff] }
 0x169   : > { %5539 = vmatmul.msk.f32.vlgmr.msrb.gmra.mxu0 %vm585_vm7, %v893_v59  ;;  %5540 = vmatmul.msk.f32.vlgmr.msrb.gmra.mxu1 %vm585_vm7, %v893_v59  ;;  %v1156_v47 = vsel %vm1152_vm1, %v5888_v6, %v5889_v58  ;;  %v1065_v58 = vld [vmem:[#allocation6 + $0x30] sm:$0xff] }
 0x16a   : > { %865 = vmatpush.msra.mxu2 %v839_v46  ;;  %885 = vmatpush.msra.mxu3 %v840_v14 }
 0x16b   : > { %5537 = vmatmul.msk.f32.vlgmr.msra.gmra.mxu2 %vm585_vm7, %v819_v62  ;;  %5538 = vmatmul.msk.f32.vlgmr.msra.gmra.mxu3 %vm585_vm7, %v819_v62 }
 0x16c   : > { %1021 = vmatpush.msrb.mxu2 %v998_v51  ;;  %1041 = vmatpush.msrb.mxu3 %v999_v18  ;;  %v5867_v8 = vpop.permute.xlu0 %5866 }
 0x16d   : > { %v5862_v49 = vpop.permute.xlu1 %5861  ;;  %v5869_v21 = vunpack.i.h.bf16 %v5867_v8  ;;  %v5868_v50 = vunpack.i.l.bf16 %v5867_v8 }
 0x16e   : > { %v5864_v9 = vunpack.i.h.bf16 %v5862_v49  ;;  %1022 = vmatpush.msrb.mxu2 %v996_v7  ;;  %1042 = vmatpush.msrb.mxu3 %v997_v3  ;;  %v5863_v4 = vunpack.i.l.bf16 %v5862_v49 }
 0x16f   : > { %v1153_v49 = vsel %vm1152_vm1, %v5868_v50, %v5869_v21 }
 0x170   : > { %v1087_v59 = vsel %vm1084_vm14, %v5864_v9, %v5883_v61  ;;  %1198 = vmatpush.msra.mxu3 %v1156_v47  ;;  %v1139_v9 = vld [vmem:[#allocation6 + $0x38] sm:$0xff] }
 0x171   : > { %1110 = vmatpush.msra.mxu0 %v1087_v59 }
 0x173   : > { %5541 = vmatmul.msk.f32.vlgmr.msrb.gmra.mxu2 %vm585_vm7, %v976_v19  ;;  %5542 = vmatmul.msk.f32.vlgmr.msrb.gmra.mxu3 %vm585_vm7, %v976_v19 }
 0x174   : > { %v5877_v5 = vpop.permute.xlu0 %5876 }
 0x175   : > { %v5872_v37 = vpop.permute.xlu1 %5871  ;;  %v5879_v48 = vunpack.i.h.bf16 %v5877_v5  ;;  %v5878_v61 = vunpack.i.l.bf16 %v5877_v5 }
 0x176   : > { %v5874_v27 = vunpack.i.h.bf16 %v5872_v37  ;;  %v5873_v62 = vunpack.i.l.bf16 %v5872_v37 }
 0x177   : > { %v1085_v51 = vsel %vm1084_vm14, %v5878_v61, %v5879_v48  ;;  %v1086_v18 = vsel %vm1084_vm14, %v5879_v48, %v5863_v4  ;;  %v606_v48 = vpop.f32.mrf.mxu2  ;;  %v626_v61 = vpop.f32.mrf.mxu3 }
 0x178   : > { %v1155_v46 = vsel %vm1152_vm1, %v5874_v27, %v5888_v6  ;;  %v1154_v14 = vsel %vm1152_vm1, %v5869_v21, %v5873_v62  ;;  %1111 = vmatpush.msra.mxu0 %v1085_v51  ;;  %1131 = vmatpush.msra.mxu1 %v1086_v18 }
 0x179   : > { %1178 = vmatpush.msra.mxu2 %v1155_v46  ;;  %1199 = vmatpush.msra.mxu3 %v1154_v14 }
 0x17a   : > { %5543 = vmatmul.msk.f32.vlgmr.msra.gmra.mxu0 %vm585_vm7, %v1065_v58  ;;  %5544 = vmatmul.msk.f32.vlgmr.msra.gmra.mxu1 %vm585_vm7, %v1065_v58 }
 0x17b   : > { %1179 = vmatpush.msra.mxu2 %v1153_v49  ;;  %5546 = vmatmul.msk.f32.vlgmr.msra.gmra.mxu3 %vm585_vm7, %v1139_v9  ;;  %v629_v49 = vadd.f32 %v606_v48, %v7570_v31 }
 0x17c   : > { %5545 = vmatmul.msk.f32.vlgmr.msra.gmra.mxu2 %vm585_vm7, %v1139_v9  ;;  %v5892_v6 = vpop.permute.xlu0 %5891 }
 0x17d   : > { %v7811_v8 = vunpack.i.h.bf16 %v5892_v6  ;;  %v7813_v7 = vunpack.i.l.bf16 %v5892_v6  ;;  %v630_v6 = vadd.f32 %v626_v61, %v7570_v31 }
 0x17f   : > { %10531 = vst [vmem:[#allocation34_spill] sm:$0xff] %v7811_v8  ;;  %v1216_v3 = vmul.f32 %v7811_v8, %v7578_v34  ;;  %v1217_v59 = vmul.f32 %v7813_v7, %v7540_v22  ;;  %v7822_v47 = vsel %vm492_vm4, %v7813_v7, %v7811_v8  ;;  %v1219_v19 = vmul.f32 %v7811_v8, %v7572_v32 }
 0x180   : > { %10532 = vst [vmem:[#allocation35_spill] sm:$0xff] %v7813_v7  ;;  %v1218_v37 = vmul.f32 %v7822_v47, %v7543_v23  ;;  %v7830_v21 = vmul.f32 %v7813_v7, %v7553_v26  ;;  %v1215_v34 = vmul.f32 %v7822_v47, %v7547_v24  ;;  %v1313_v23 = vld [vmem:[%s10345_s7] sm:$0xff] }
 0x181   : > { %10533 = vst [vmem:[#allocation36_spill] sm:$0xff] %v7822_v47  ;;  %v7834_v27 = vpack.i.bf16 %v1217_v59, %v1216_v3 }
 0x182   : > { %v7836_v22 = vpack.i.bf16 %v1219_v19, %v1218_v37  ;;  %v7839_v62 = vpack.i.bf16 %v1215_v34, %v7830_v21 }
 0x183   : > { %5901 = vrot.lane.b32.xlu2 %v7834_v27, %s7301_s12 }
 0x184   : > { %5906 = vrot.lane.b32.xlu0 %v7836_v22, %s7301_s12  ;;  %5896 = vrot.lane.b32.xlu1 %v7839_v62, %s7301_s12 }
 0x18b   : > { %5917 = vrot.lane.b32.xlu2 %v7582_v35, %s7293_s16 }
 0x18c   : > { %1316 = vperm.xlu0 %5910, %v1313_v23   ;;  %5912 = vrot.lane.b32.xlu1 %v7592_v39, %s7293_s16 }
 0x193   : > { %5927 = vrot.lane.b32.xlu2 %v7624_v52, %s7295_s23 }
 0x194   : > { %5942 = vrot.lane.b32.xlu0 %v7582_v35, %s7294_s3  ;;  %5922 = vrot.lane.b32.xlu1 %v7576_v33, %s7293_s16 }
 0x19b   : > { %5937 = vrot.lane.b32.xlu2 %v7592_v39, %s7294_s3 }
 0x19c   : > { %5952 = vrot.lane.b32.xlu0 %v7668_v1, %s7295_s23  ;;  %5932 = vrot.lane.b32.xlu1 %v7633_v55, %s7297_s21 }
 0x1a3   : > { %5962 = vrot.lane.b32.xlu2 %v7702_v17, %s7297_s21 }
 0x1a4   : > { %5957 = vrot.lane.b32.xlu0 %v7662_v63, %s7297_s21  ;;  %5947 = vrot.lane.b32.xlu1 %v7671_v2, %s7295_s23 }
 0x1ac   : > { %5982 = vrot.lane.b32.xlu0 %v7693_v10, %s7296_s26 }
 0x1b4   : > { %5987 = vrot.lane.b32.xlu0 %v7740_v38, %s7298_s1  ;;  %v1221_v38 = vld [vmem:[#allocation6 + $0x40] sm:$0xff] }
 0x1bc   : > { %6007 = vrot.lane.b32.xlu0 %v7582_v35, %s7299_s4 }
 0x1cf   : > { %v686_v46 = vpop.f32.mrf.mxu2  ;;  %v706_v14 = vpop.f32.mrf.mxu3 }
 0x1d0   : > { %v709_v19 = vadd.f32 %v686_v46, %v629_v49  ;;  %v710_v37 = vadd.f32 %v706_v14, %v630_v6 }
 0x1dd   : > { %v5902_v24 = vpop.permute.xlu2 %5901 }
 0x1de   : > { %v5904_v32 = vunpack.i.h.bf16 %v5902_v24  ;;  %v5903_v4 = vunpack.i.l.bf16 %v5902_v24  ;;  %v777_v58 = vpop.f32.mrf.mxu0  ;;  %v797_v51 = vpop.f32.mrf.mxu1 }
 0x1df   : > { %v800_v34 = vadd.f32 %v777_v58, %v709_v19  ;;  %v801_v23 = vadd.f32 %v797_v51, %v710_v37 }
 0x1e5   : > { %v7902_v6 = vpop.permute.xlu2 %5917 }
 0x1e6   : > { %v935_v3 = vpop.f32.mrf.mxu0  ;;  %v955_v59 = vpop.f32.mrf.mxu1 }
 0x1ee   : > { %v867_v18 = vpop.f32.mrf.mxu2  ;;  %v887_v9 = vpop.f32.mrf.mxu3 }
 0x1f6   : > { %v5907_v52 = vpop.permute.xlu0 %5906  ;;  %v5897_v55 = vpop.permute.xlu1 %5896 }
 0x1f7   : > { %v5909_v1 = vunpack.i.h.bf16 %v5907_v52  ;;  %v5908_v17 = vunpack.i.l.bf16 %v5907_v52  ;;  %v5899_v63 = vunpack.i.h.bf16 %v5897_v55  ;;  %v5898_v50 = vunpack.i.l.bf16 %v5897_v55  ;;  %v1024_v24 = vpop.f32.mrf.mxu2 }
 0x1f8   : > { %v890_v52 = vadd.f32 %v867_v18, %v800_v34  ;;  %v891_v55 = vadd.f32 %v887_v9, %v801_v23 }
 0x1f9   : > { %v1243_v2 = vsel %vm1240_vm2, %v5904_v32, %v5908_v17  ;;  %v1244_v10 = vsel %vm1240_vm2, %v5908_v17, %v5909_v1  ;;  %v1241_v5 = vsel %vm1240_vm2, %v5898_v50, %v5899_v63  ;;  %v1242_v35 = vsel %vm1240_vm2, %v5899_v63, %v5903_v4  ;;  %v1044_v32 = vpop.f32.mrf.mxu3  ;;  %v1113_v63 = vpop.f32.mrf.mxu0 }
 0x1fa   : > { %1266 = vmatpush.msrb.mxu0 %v1243_v2  ;;  %1286 = vmatpush.msrb.mxu1 %v1244_v10  ;;  %v958_v1 = vadd.f32 %v935_v3, %v890_v52  ;;  %v959_v17 = vadd.f32 %v955_v59, %v891_v55  ;;  %v1133_v50 = vpop.f32.mrf.mxu1 }
 0x1fc   : > { %1267 = vmatpush.msrb.mxu0 %v1241_v5  ;;  %1287 = vmatpush.msrb.mxu1 %v1242_v35  ;;  %v1047_v4 = vadd.f32 %v1024_v24, %v958_v1  ;;  %v1048_v2 = vadd.f32 %v1044_v32, %v959_v17  ;;  %v7956_v17 = vld [vmem:[#allocation2 + $0x8] sm:$0xff] }
 0x1fd   : > { %5547 = vmatmul.msk.f32.vlgmr.msrb.gmra.mxu0 %vm585_vm7, %v1221_v38  ;;  %5548 = vmatmul.msk.f32.vlgmr.msrb.gmra.mxu1 %vm585_vm7, %v1221_v38  ;;  %vm1332_vm7 = vcmask 195584  }
 0x1fe   : > { %v1136_v5 = vadd.f32 %v1113_v63, %v1047_v4  ;;  %v1137_v31 = vadd.f32 %v1133_v50, %v1048_v2  ;;  %v7908_v59 = vpop.permute.xlu1 %5912 }
 0x1ff   : > { %v1181_v38 = vpop.f32.mrf.mxu2 }
 0x200   : > { %v1204_v48 = vadd.f32 %v1181_v38, %v1136_v5  ;;  %v2121_v38 = vld [vmem:[%s10346_s8] sm:$0xff] }
 0x201   : > { %v1201_v10 = vpop.f32.mrf.mxu3 }
 0x202   : > { %v1205_v35 = vadd.f32 %v1201_v10, %v1137_v31 }
 0x27a   : > { %v1269_v61 = vpop.f32.mrf.mxu0  ;;  %v1289_v46 = vpop.f32.mrf.mxu1 }
 0x27b   : > { %v1292_v14 = vadd.f32 %v1269_v61, %v1204_v48  ;;  %v1293_v58 = vadd.f32 %v1289_v46, %v1205_v35  ;;  %v1331_v48 = vld [vmem:[#allocation8] sm:$0xff]  ;;  %v1326_v61 = vmul.f32 %v7525_v16, %v7956_v17  ;;  %v2301_v35 = vmul.f32 %v7956_v17, %v7639_v56 }
 0x27d   : > { %v1296_v51 = vmul.f32 0.2, %v1292_v14  ;;  %v1297_v49 = vmul.f32 0.2, %v1293_v58  ;;  %vm1295_vm3 = vcmp.ge.f32.partialorder %v1293_v58, 0.0  ;;  %vm1294_vm4 = vcmp.ge.f32.partialorder %v1292_v14, 0.0 }
 0x27f   : > { %v1299_v18 = vsel %vm1295_vm3, %v1293_v58, %v1297_v49  ;;  %v1298_v9 = vsel %vm1294_vm4, %v1292_v14, %v1296_v51  ;;  %vm3075_vm4 = vcmask 326656  }
 0x280   : > { %1304 = vrot.lane.b32.xlu2 %v1299_v18, %s7288_s2  ;;  %1302 = vrot.lane.b32.xlu1 %v1298_v9, %s7288_s2 }
 0x288   : > { %5977 = vrot.lane.b32.xlu2 %v7631_v54, %s7296_s26  ;;  %5967 = vrot.lane.b32.xlu1 %v7576_v33, %s7294_s3  ;;  %v7904_v54 = vpop.permute.xlu2 %5927 }
 0x290   : > { %5997 = vrot.lane.b32.xlu2 %v7725_v30, %s7298_s1  ;;  %5972 = vrot.lane.b32.xlu1 %v7700_v13, %s7296_s26  ;;  %v7906_v3 = vpop.permute.xlu2 %5937  ;;  %v7912_v13 = vpop.permute.xlu1 %5922 }
 0x298   : > { %6002 = vrot.lane.b32.xlu2 %v7592_v39, %s7299_s4  ;;  %5992 = vrot.lane.b32.xlu1 %v7723_v29, %s7298_s1  ;;  %v7910_v30 = vpop.permute.xlu2 %5962  ;;  %v7915_v39 = vpop.permute.xlu1 %5932 }
 0x2a0   : > { %6012 = vrot.lane.b32.xlu1 %v7576_v33, %s7299_s4  ;;  %v7933_v24 = vpop.permute.xlu1 %5947 }
 0x2da   : > { %v1305_v19 = vpop.permute.xlu2 %1304 }
 0x2db   : > { %1312 = vst.msk [vmem:[#allocation2 + $0x40] sm:$0xff] %vm525_vm6, %v1305_v19 }
 0x2e2   : > { %v7917_v29 = vld [vmem:[#allocation2 + $0x40] sm:$0xff] }
 0x2e3   : > { %v6016_v33 = vpack.i.bf16 %v7553_v26, %v7917_v29  ;;  %v7923_v37 = vmul.f32 %v7602_v44, %v7917_v29  ;;  %v7931_v23 = vmul.f32 %v7695_v11, %v7917_v29  ;;  %v7968_v4 = vmul.f32 %v7598_v42, %v7917_v29 }
 0x2e4   : > { %v7972_v2 = vmul.f32 %v7811_v8, %v7917_v29 }
 0x2e5   : > { %6017 = vrot.lane.b32.xlu0 %v6016_v33, %s7293_s16  ;;  %v6046_v34 = vpack.i.bf16 %v7647_v57, %v7923_v37  ;;  %v6056_v26 = vpack.i.bf16 %v7735_v36, %v7931_v23  ;;  %v7943_v57 = vld [vmem:[#allocation2 + $0x20] sm:$0xff] }
 0x2e6   : > { %10535 = vst [vmem:[#allocation38_spill] sm:$0xff] %v7972_v2  ;;  %v1328_v10 = vmul.f32 %v7525_v16, %v7943_v57 }
 0x2e7   : > { %6047 = vrot.lane.b32.xlu1 %v6046_v34, %s7297_s21  ;;  %v8016_v34 = vld [vmem:[#allocation2 + $0x28] sm:$0xff] }
 0x2ed   : > { %6022 = vrot.lane.b32.xlu0 %v6016_v33, %s7294_s3 }
 0x2ef   : > { %6057 = vrot.lane.b32.xlu1 %v6056_v26, %s7298_s1  ;;  %v2614_v26 = vmul.f32 %v7598_v42, %v8016_v34 }
 0x2f2   : > { %v1303_v32 = vpop.permute.xlu1 %1302 }
 0x2f3   : > { %v7940_v52 = vsel %vm525_vm6, %v1303_v32, %v1305_v19  ;;  %1310 = vst.msk [vmem:[#allocation2 + $0x30] sm:$0xff] %vm534_vm5, %v1303_v32 }
 0x2f4   : > { %1311 = vst [vmem:[#allocation2 + $0x38] sm:$0xff] %v7940_v52  ;;  %v1330_v55 = vmul.f32 %v7525_v16, %v7940_v52  ;;  %v7950_v1 = vmul.f32 %v7940_v52, %v7629_v53  ;;  %v7954_v36 = vmul.f32 %v7940_v52, %v7717_v20  ;;  %v7960_v63 = vmul.f32 %v7940_v52, %v7666_v0 }
 0x2f5   : > { %v7964_v50 = vmul.f32 %v7940_v52, %v7822_v47  ;;  %v8005_v18 = vmul.f32 %v7940_v52, %v7639_v56 }
 0x2f6   : > { %1369 = vmatpush.msrb.mxu3 %v1330_v55 }
 0x2f7   : > { %10534 = vst [vmem:[#allocation37_spill] sm:$0xff] %v7964_v50 }
 0x2f8   : > { %1370 = vmatpush.msrb.mxu3 %v1328_v10 }
 0x2fa   : > { %v7986_v46 = vld [vmem:[#allocation2 + $0x30] sm:$0xff]  ;;  %1371 = vmatpush.msrb.mxu3 %v1326_v61 }
 0x2fb   : > { %v1329_v14 = vmul.f32 %v7523_v15, %v7986_v46  ;;  %v7992_v58 = vpack.i.bf16 %v7940_v52, %v7986_v46  ;;  %5550 = vmatmul.msk.f32.vlgmr.msrb.gmra.mxu3 %vm1332_vm7, %v1331_v48  ;;  %v7997_v51 = vmul.f32 %v7604_v45, %v7986_v46  ;;  %v8001_v49 = vmul.f32 %v7596_v41, %v7986_v46 }
 0x2fc   : > { %v3605_v32 = vmul.f32 %v7600_v43, %v7986_v46  ;;  %v8026_v55 = vmul.f32 %v7697_v12, %v7986_v46  ;;  %v8046_v61 = vmul.f32 %v7813_v7, %v7986_v46 }
 0x2fd   : > { %10536 = vst [vmem:[#allocation39_spill] sm:$0xff] %v7992_v58  ;;  %1349 = vmatpush.msrb.mxu2 %v1329_v14  ;;  %6027 = vrot.lane.b32.xlu2 %v7992_v58, %s7293_s16  ;;  %v6066_v9 = vpack.i.bf16 %v7950_v1, %v7997_v51  ;;  %v6061_v19 = vpack.i.bf16 %v8005_v18, %v8001_v49  ;;  %v8048_v14 = vpop.permute.xlu0 %1316 }
 0x2fe   : > { %v6071_v10 = vpack.i.bf16 %v7960_v63, %v3605_v32 }
 0x2ff   : > { %1350 = vmatpush.msrb.mxu2 %v7551_v25  ;;  %6067 = vrot.lane.b32.xlu0 %v6066_v9, %s7297_s21  ;;  %v8028_v25 = vpack.i.bf16 %v3605_v32, %v2614_v26  ;;  %v8059_v26 = vld [vmem:[#allocation2 + $0x10] sm:$0xff]  ;;  %v8061_v32 = vld [vmem:[#allocation2 + $0x18] sm:$0xff] }
 0x300   : > { %6062 = vrot.lane.b32.xlu1 %v6061_v19, %s7295_s23  ;;  %v6101_v19 = vpack.i.bf16 %v7964_v50, %v8046_v61  ;;  %v8100_v5 = vmul.f32 %v7594_v40, %v8059_v26  ;;  %v5950_v50 = vunpack.i.h.bf16 %v7933_v24 }
 0x301   : > { %1351 = vmatpush.msrb.mxu2 %v7562_v28  ;;  %10537 = vst [vmem:[#allocation40_spill] sm:$0xff] %v8028_v25  ;;  %v6076_v28 = vpack.i.bf16 %v7954_v36, %v8026_v55 }
 0x302   : > { %5549 = vmatmul.msk.f32.vlgmr.msrb.gmra.mxu2 %vm1332_vm7, %v1331_v48  ;;  %v1481_v48 = vmul.f32 %v7594_v40, %v7917_v29  ;;  %10540 = vst [vmem:[#allocation41_spill] sm:$0xff] %v8100_v5 }
 0x304   : > { %v6041_v9 = vpack.i.bf16 %v7655_v60, %v1481_v48  ;;  %v8068_v60 = vpack.i.bf16 %v8059_v26, %v7956_v17 }
 0x305   : > { %6032 = vrot.lane.b32.xlu2 %v7992_v58, %s7294_s3 }
 0x307   : > { %6077 = vrot.lane.b32.xlu0 %v6076_v28, %s7298_s1  ;;  %v8063_v28 = vpop.permute.xlu0 %5942 }
 0x308   : > { %6072 = vrot.lane.b32.xlu1 %v6071_v10, %s7296_s26  ;;  %v8080_v10 = vmul.f32 %v7596_v41, %v8061_v32  ;;  %v5925_v41 = vunpack.i.h.bf16 %v7912_v13 }
 0x30d   : > { %6037 = vrot.lane.b32.xlu2 %v7992_v58, %s7299_s4 }
 0x30f   : > { %6082 = vrot.lane.b32.xlu0 %v6016_v33, %s7299_s4 }
 0x310   : > { %6087 = vrot.lane.b32.xlu1 %v7839_v62, %s7301_s12  ;;  %v10538_v62 = vld [vmem:[#allocation31_spill] sm:$0xff] }
 0x311   : > { %v6051_v33 = vpack.i.bf16 %v10538_v62, %v7968_v4  ;;  %10539 = vst [vmem:[#allocation31_spill] sm:$0xff] %v8080_v10 }
 0x315   : > { %6042 = vrot.lane.b32.xlu2 %v6041_v9, %s7295_s23  ;;  %v2304_v9 = vmul.f32 %v7943_v57, %v7639_v56 }
 0x317   : > { %6097 = vrot.lane.b32.xlu0 %v7836_v22, %s7301_s12  ;;  %v8072_v22 = vpack.i.bf16 %v7943_v57, %v8061_v32  ;;  %v6136_v62 = vpack.i.bf16 %v2304_v9, %v8080_v10  ;;  %v6131_v9 = vpack.i.bf16 %v8100_v5, %v2301_v35  ;;  %v8138_v5 = vpop.permute.xlu2 %5977  ;;  %v2723_v10 = vmul.f32 %v7697_v12, %v8061_v32 }
 0x318   : > { %6102 = vrot.lane.b32.xlu1 %v6101_v19, %s7301_s12  ;;  %v8088_v19 = vpack.i.bf16 %v7917_v29, %v7940_v52  ;;  %v2415_v29 = vmul.f32 %v7943_v57, %v7629_v53  ;;  %v6106_v52 = vpack.i.bf16 %v7830_v21, %v7972_v2  ;;  %v2412_v21 = vmul.f32 %v7956_v17, %v7629_v53 }
 0x319   : > { %v2724_v53 = vmul.f32 %v7943_v57, %v7717_v20  ;;  %v5914_v12 = vunpack.i.l.bf16 %v7908_v59 }
 0x31d   : > { %6052 = vrot.lane.b32.xlu2 %v6051_v33, %s7296_s26  ;;  %v8091_v33 = vpop.permute.xlu0 %5952 }
 0x31f   : > { %6112 = vrot.lane.b32.xlu0 %v8068_v60, %s7293_s16 }
 0x320   : > { %6117 = vrot.lane.b32.xlu1 %v8072_v22, %s7293_s16 }
 0x325   : > { %6092 = vrot.lane.b32.xlu2 %v7834_v27, %s7301_s12  ;;  %v2414_v27 = vmul.f32 %v7604_v45, %v8061_v32  ;;  %v8115_v31 = vpop.permute.xlu0 %5957 }
 0x327   : > { %6127 = vrot.lane.b32.xlu0 %v8088_v19, %s7293_s16 }
 0x328   : > { %6137 = vrot.lane.b32.xlu1 %v6136_v62, %s7295_s23  ;;  %v8110_v62 = vpack.i.bf16 %v2415_v29, %v2414_v27  ;;  %v8130_v27 = vpop.permute.xlu1 %5967  ;;  %v2612_v29 = vmul.f32 %v7600_v43, %v8061_v32 }
 0x32a   : > { %10541 = vst [vmem:[#allocation42_spill] sm:$0xff] %v8110_v62 }
 0x32d   : > { %6107 = vrot.lane.b32.xlu2 %v6106_v52, %s7301_s12  ;;  %v8124_v52 = vmul.f32 %v7602_v44, %v8059_v26  ;;  %v8136_v58 = vpop.permute.xlu0 %5982 }
 0x32f   : > { %6132 = vrot.lane.b32.xlu0 %v6131_v9, %s7295_s23  ;;  %10542 = vst [vmem:[#allocation43_spill] sm:$0xff] %v8124_v52  ;;  %v6146_v35 = vpack.i.bf16 %v8124_v52, %v2412_v21  ;;  %v2613_v9 = vmul.f32 %v7943_v57, %v7666_v0  ;;  %v6161_v21 = vpack.i.bf16 %v1481_v48, %v8005_v18  ;;  %v8159_v48 = vpop.permute.xlu2 %5997 }
 0x330   : > { %6152 = vrot.lane.b32.xlu1 %v8110_v62, %s7297_s21  ;;  %v2305_v52 = vmul.f32 %v7594_v40, %v8016_v34  ;;  %v8155_v45 = vpop.permute.xlu1 %5972  ;;  %v5915_v40 = vunpack.i.h.bf16 %v7908_v59 }
 0x332   : > { %v1416_v59 = vsel %vm657_vm12, %v5914_v12, %v5915_v40 }
 0x335   : > { %2124 = vperm.xlu2 %5764, %v2121_v38   ;;  %v6121_v38 = vpack.i.bf16 %v7986_v46, %v8016_v34  ;;  %v8153_v46 = vpack.i.bf16 %v8001_v49, %v2305_v52  ;;  %v8157_v18 = vpop.permute.xlu0 %5987 }
 0x337   : > { %6147 = vrot.lane.b32.xlu0 %v6146_v35, %s7297_s21  ;;  %v6196_v35 = vpack.i.bf16 %v2613_v9, %v2612_v29  ;;  %10543 = vst [vmem:[#allocation44_spill] sm:$0xff] %v8153_v46  ;;  %v8163_v29 = vpack.i.bf16 %v2724_v53, %v2723_v10  ;;  %v2416_v9 = vmul.f32 %v7602_v44, %v8016_v34 }
 0x338   : > { %6177 = vrot.lane.b32.xlu1 %v8072_v22, %s7294_s3  ;;  %v8171_v52 = vpop.permute.xlu1 %5992 }
 0x339   : > { %10544 = vst [vmem:[#allocation45_spill] sm:$0xff] %v8163_v29  ;;  %v6156_v49 = vpack.i.bf16 %v7997_v51, %v2416_v9 }
 0x33d   : > { %6122 = vrot.lane.b32.xlu2 %v6121_v38, %s7293_s16 }
 0x33f   : > { %6162 = vrot.lane.b32.xlu0 %v6161_v21, %s7295_s23  ;;  %v8173_v21 = vpop.permute.xlu0 %6007 }
 0x340   : > { %6197 = vrot.lane.b32.xlu1 %v6196_v35, %s7296_s26  ;;  %v8175_v35 = vpop.permute.xlu2 %6002  ;;  %v8181_v56 = vpop.permute.xlu1 %6012 }
 0x345   : > { %6142 = vrot.lane.b32.xlu2 %v8153_v46, %s7295_s23 }
 0x348   : > { %6217 = vrot.lane.b32.xlu1 %v8163_v29, %s7298_s1  ;;  %v5924_v29 = vunpack.i.l.bf16 %v7912_v13 }
 0x34a   : > { %v1419_v13 = vsel %vm657_vm12, %v5924_v29, %v5925_v41 }
 0x34d   : > { %6157 = vrot.lane.b32.xlu2 %v6156_v49, %s7297_s21  ;;  %v5920_v49 = vunpack.i.h.bf16 %v7902_v6 }
 0x34f   : > { %v1418_v62 = vsel %vm657_vm12, %v5920_v49, %v5924_v29  ;;  %v5965_v29 = vunpack.i.h.bf16 %v7910_v30  ;;  %v5955_v49 = vunpack.i.h.bf16 %v8091_v33 }
 0x355   : > { %6182 = vrot.lane.b32.xlu2 %v6121_v38, %s7294_s3 }
 0x357   : > { %v8178_v53 = vpop.permute.xlu0 %6017  ;;  %v6028_v10 = vpop.permute.xlu2 %6027 }
 0x358   : > { %10545 = vst [vmem:[#allocation46_spill] sm:$0xff] %v8178_v53  ;;  %v6019_v44 = vunpack.i.l.bf16 %v8178_v53  ;;  %v6030_v51 = vunpack.i.h.bf16 %v6028_v10  ;;  %v6029_v9 = vunpack.i.l.bf16 %v6028_v10  ;;  %v5919_v53 = vunpack.i.l.bf16 %v7902_v6  ;;  %v1388_v10 = vld [vmem:[#allocation8 + $0x8] sm:$0xff] }
 0x35a   : > { %v1420_v43 = vsel %vm657_vm12, %v6029_v9, %v6030_v51  ;;  %v1421_v15 = vsel %vm657_vm12, %v6030_v51, %v6019_v44  ;;  %v2725_v44 = vmul.f32 %v7695_v11, %v8016_v34  ;;  %v2923_v51 = vmul.f32 %v7811_v8, %v8016_v34 }
 0x35b   : > { %1444 = vmatpush.msra.mxu0 %v1420_v43  ;;  %1464 = vmatpush.msra.mxu1 %v1421_v15  ;;  %v1417_v43 = vsel %vm657_vm12, %v5915_v40, %v5919_v53  ;;  %v8199_v15 = vpop.permute.xlu1 %6047  ;;  %v5964_v53 = vunpack.i.l.bf16 %v7910_v30  ;;  %v5929_v9 = vunpack.i.l.bf16 %v7904_v54 }
 0x35c   : > { %10546 = vst [vmem:[#allocation47_spill] sm:$0xff] %v8199_v15  ;;  %v6221_v41 = vpack.i.bf16 %v8026_v55, %v2725_v44  ;;  %v5930_v55 = vunpack.i.h.bf16 %v7904_v54  ;;  %v6261_v30 = vpack.i.bf16 %v8046_v61, %v2923_v51  ;;  %v5959_v54 = vunpack.i.l.bf16 %v8115_v31 }
 0x35d   : > { %6202 = vrot.lane.b32.xlu2 %v8028_v25, %s7296_s26  ;;  %1445 = vmatpush.msra.mxu0 %v1418_v62  ;;  %v1609_v2 = vsel %vm838_vm15, %v5964_v53, %v5965_v29  ;;  %v5985_v29 = vunpack.i.h.bf16 %v8136_v58 }
 0x35e   : > { %1465 = vmatpush.msra.mxu1 %v1419_v13  ;;  %v5954_v13 = vunpack.i.l.bf16 %v8091_v33  ;;  %v5949_v33 = vunpack.i.l.bf16 %v7933_v24 }
 0x35f   : > { %v8196_v16 = vpop.permute.xlu2 %6032  ;;  %1446 = vmatpush.msra.mxu0 %v1416_v59  ;;  %v8209_v6 = vpop.permute.xlu0 %6022 }
 0x360   : > { %1466 = vmatpush.msra.mxu1 %v1417_v43  ;;  %5551 = vmatmul.msk.f32.vlgmr.msra.gmra.mxu0 %vm1332_vm7, %v1388_v10  ;;  %v1513_v24 = vsel %vm748_vm11, %v5930_v55, %v5954_v13  ;;  %v5945_v55 = vunpack.i.h.bf16 %v8063_v28 }
 0x361   : > { %5552 = vmatmul.msk.f32.vlgmr.msra.gmra.mxu1 %vm1332_vm7, %v1388_v10  ;;  %v5935_v10 = vunpack.i.h.bf16 %v7915_v39 }
 0x363   : > { %v8211_v62 = vpop.permute.xlu1 %6057 }
 0x365   : > { %6222 = vrot.lane.b32.xlu2 %v6221_v41, %s7298_s1 }
 0x367   : > { %v8207_v12 = vpop.permute.xlu2 %6037 }
 0x36d   : > { %6242 = vrot.lane.b32.xlu2 %v6121_v38, %s7299_s4  ;;  %v6049_v38 = vunpack.i.l.bf16 %v8199_v15 }
 0x36f   : > { %v8214_v40 = vpop.permute.xlu2 %6042 }
 0x370   : > { %10547 = vst [vmem:[#allocation48_spill] sm:$0xff] %v8214_v40  ;;  %v6044_v59 = vunpack.i.l.bf16 %v8214_v40 }
 0x371   : > { %v6068_v43 = vpop.permute.xlu0 %6067 }
 0x372   : > { %v6063_v44 = vpop.permute.xlu1 %6062  ;;  %v6070_v41 = vunpack.i.h.bf16 %v6068_v43  ;;  %v6069_v34 = vunpack.i.l.bf16 %v6068_v43  ;;  %v5934_v43 = vunpack.i.l.bf16 %v7915_v39  ;;  %v1608_v39 = vsel %vm838_vm15, %v5935_v10, %v5964_v53 }
 0x373   : > { %v6065_v25 = vunpack.i.h.bf16 %v6063_v44  ;;  %v6064_v46 = vunpack.i.l.bf16 %v6063_v44  ;;  %v5960_v44 = vunpack.i.h.bf16 %v8115_v31  ;;  %v6024_v31 = vunpack.i.l.bf16 %v8209_v6 }
 0x374   : > { %v1610_v61 = vsel %vm838_vm15, %v6069_v34, %v6070_v41  ;;  %v1611_v51 = vsel %vm838_vm15, %v6070_v41, %v6049_v38  ;;  %v1514_v38 = vsel %vm748_vm11, %v5954_v13, %v5955_v49  ;;  %v1511_v49 = vsel %vm748_vm11, %v5949_v33, %v5950_v50  ;;  %v1483_v13 = vld [vmem:[#allocation8 + $0x10] sm:$0xff] }
 0x375   : > { %6262 = vrot.lane.b32.xlu2 %v6261_v30, %s7301_s12  ;;  %v1515_v15 = vsel %vm748_vm11, %v6064_v46, %v6065_v25  ;;  %v1516_v40 = vsel %vm748_vm11, %v6065_v25, %v6044_v59  ;;  %v5984_v46 = vunpack.i.l.bf16 %v8136_v58  ;;  %1634 = vmatpush.msrb.mxu0 %v1610_v61  ;;  %v5980_v59 = vunpack.i.h.bf16 %v8138_v5 }
 0x376   : > { %1539 = vmatpush.msra.mxu2 %v1515_v15  ;;  %1559 = vmatpush.msra.mxu3 %v1516_v40  ;;  %v6035_v15 = vunpack.i.h.bf16 %v8196_v16  ;;  %v6034_v40 = vunpack.i.l.bf16 %v8196_v16  ;;  %v5939_v58 = vunpack.i.l.bf16 %v7906_v3  ;;  %v1512_v53 = vsel %vm748_vm11, %v5950_v50, %v5929_v9 }
 0x377   : > { %1654 = vmatpush.msrb.mxu1 %v1611_v51  ;;  %v8243_v25 = vpop.permute.xlu2 %6052  ;;  %1635 = vmatpush.msrb.mxu0 %v1608_v39  ;;  %v5970_v10 = vunpack.i.h.bf16 %v8130_v27  ;;  %v5969_v30 = vunpack.i.l.bf16 %v8130_v27  ;;  %v1606_v16 = vsel %vm838_vm15, %v5959_v54, %v5960_v44  ;;  %v1607_v61 = vsel %vm838_vm15, %v5960_v44, %v5934_v43 }
 0x378   : > { %1540 = vmatpush.msra.mxu2 %v1513_v24  ;;  %1560 = vmatpush.msra.mxu3 %v1514_v38  ;;  %v6054_v51 = vunpack.i.l.bf16 %v8243_v25  ;;  %v1781_v50 = vsel %vm995_vm0, %v5984_v46, %v5985_v29  ;;  %v5944_v9 = vunpack.i.l.bf16 %v8063_v28  ;;  %v1687_v27 = vsel %vm906_vm13, %v6034_v40, %v6035_v15 }
 0x379   : > { %1655 = vmatpush.msrb.mxu1 %v1609_v2  ;;  %v6078_v41 = vpop.permute.xlu0 %6077  ;;  %1636 = vmatpush.msrb.mxu0 %v1606_v16  ;;  %v1688_v54 = vsel %vm906_vm13, %v6035_v15, %v6024_v31  ;;  %v1780_v43 = vsel %vm995_vm0, %v5980_v59, %v5984_v46  ;;  %v5975_v28 = vunpack.i.h.bf16 %v8155_v45  ;;  %v5974_v39 = vunpack.i.l.bf16 %v8155_v45 }
 0x37a   : > { %v6073_v34 = vpop.permute.xlu1 %6072  ;;  %1541 = vmatpush.msra.mxu2 %v1511_v49  ;;  %1561 = vmatpush.msra.mxu3 %v1512_v53  ;;  %v6080_v44 = vunpack.i.h.bf16 %v6078_v41  ;;  %v6079_v24 = vunpack.i.l.bf16 %v6078_v41  ;;  %v1685_v49 = vsel %vm906_vm13, %v5945_v55, %v5969_v30  ;;  %v1686_v40 = vsel %vm906_vm13, %v5969_v30, %v5970_v10 }
 0x37b   : > { %v6075_v2 = vunpack.i.h.bf16 %v6073_v34  ;;  %v6074_v33 = vunpack.i.l.bf16 %v6073_v34  ;;  %1656 = vmatpush.msrb.mxu1 %v1607_v61  ;;  %5553 = vmatmul.msk.f32.vlgmr.msra.gmra.mxu2 %vm1332_vm7, %v1483_v13  ;;  %v6000_v46 = vunpack.i.h.bf16 %v8159_v48  ;;  %v5999_v59 = vunpack.i.l.bf16 %v8159_v48 }
 0x37c   : > { %5554 = vmatmul.msk.f32.vlgmr.msra.gmra.mxu3 %vm1332_vm7, %v1483_v13  ;;  %1711 = vmatpush.msrb.mxu2 %v1687_v27  ;;  %v5995_v31 = vunpack.i.h.bf16 %v8171_v52  ;;  %v6059_v15 = vunpack.i.l.bf16 %v8211_v62  ;;  %v5979_v45 = vunpack.i.l.bf16 %v8138_v5  ;;  %v10548_v55 = vunpack.i.h.bf16 %v7906_v3  ;;  %v1664_v27 = vld [vmem:[#allocation8 + $0x20] sm:$0xff] }
 0x37d   : > { %1731 = vmatpush.msrb.mxu3 %v1688_v54  ;;  %v1782_v38 = vsel %vm995_vm0, %v6074_v33, %v6075_v2  ;;  %v1783_v29 = vsel %vm995_vm0, %v6075_v2, %v6054_v51  ;;  %v5990_v48 = vunpack.i.h.bf16 %v8157_v18  ;;  %v5989_v41 = vunpack.i.l.bf16 %v8157_v18  ;;  %v1578_v2 = vld [vmem:[#allocation8 + $0x18] sm:$0xff] }
 0x37e   : > { %1806 = vmatpush.msra.mxu0 %v1782_v38  ;;  %1826 = vmatpush.msra.mxu1 %v1783_v29  ;;  %v1683_v13 = vsel %vm906_vm13, %v5939_v58, %v10548_v55  ;;  %v10549_v10 = vmov %v10548_v55  ;;  %v1877_v16 = vsel %vm1084_vm14, %v6079_v24, %v6080_v44  ;;  %v1878_v5 = vsel %vm1084_vm14, %v6080_v44, %v6059_v15  ;;  %v1750_v15 = vld [vmem:[#allocation8 + $0x28] sm:$0xff] }
 0x37f   : > { %1712 = vmatpush.msrb.mxu2 %v1685_v49  ;;  %1732 = vmatpush.msrb.mxu3 %v1686_v40  ;;  %v8277_v53 = vpop.permute.xlu2 %6092  ;;  %v1684_v30 = vsel %vm906_vm13, %v10549_v10, %v5944_v9  ;;  %v6040_v34 = vunpack.i.h.bf16 %v8207_v12  ;;  %v6039_v58 = vunpack.i.l.bf16 %v8207_v12  ;;  %v1778_v51 = vsel %vm995_vm0, %v5974_v39, %v5975_v28 }
 0x380   : > { %1807 = vmatpush.msra.mxu0 %v1780_v43  ;;  %1827 = vmatpush.msra.mxu1 %v1781_v50  ;;  %v1779_v18 = vsel %vm995_vm0, %v5975_v28, %v5979_v45  ;;  %v5994_v33 = vunpack.i.l.bf16 %v8171_v52  ;;  %v1875_v9 = vsel %vm1084_vm14, %v5995_v31, %v5999_v59  ;;  %v1876_v12 = vsel %vm1084_vm14, %v5999_v59, %v6000_v46 }
 0x381   : > { %1713 = vmatpush.msrb.mxu2 %v1683_v13  ;;  %1733 = vmatpush.msrb.mxu3 %v1684_v30  ;;  %v8292_v3 = vpop.permute.xlu0 %6082  ;;  %v6014_v54 = vunpack.i.l.bf16 %v8181_v56  ;;  %v6015_v43 = vunpack.i.h.bf16 %v8181_v56  ;;  %v1873_v52 = vsel %vm1084_vm14, %v5989_v41, %v5990_v48  ;;  %v6010_v24 = vunpack.i.h.bf16 %v8173_v21  ;;  %v1845_v30 = vld [vmem:[#allocation8 + $0x30] sm:$0xff] }
 0x382   : > { %v8294_v61 = vpop.permute.xlu1 %6087  ;;  %v6084_v50 = vunpack.i.l.bf16 %v8292_v3  ;;  %1808 = vmatpush.msra.mxu0 %v1778_v51  ;;  %1828 = vmatpush.msra.mxu1 %v1779_v18  ;;  %v6005_v38 = vunpack.i.h.bf16 %v8175_v35  ;;  %v6004_v29 = vunpack.i.l.bf16 %v8175_v35  ;;  %v1954_v56 = vsel %vm1152_vm1, %v6039_v58, %v6040_v34 }
 0x383   : > { %1901 = vmatpush.msra.mxu2 %v1877_v16  ;;  %1921 = vmatpush.msra.mxu3 %v1878_v5  ;;  %v1874_v28 = vsel %vm1084_vm14, %v5990_v48, %v5994_v33  ;;  %v1952_v39 = vsel %vm1152_vm1, %v6010_v24, %v6014_v54  ;;  %v6009_v40 = vunpack.i.l.bf16 %v8173_v21  ;;  %v1953_v35 = vsel %vm1152_vm1, %v6014_v54, %v6015_v43 }
 0x384   : > { %5555 = vmatmul.msk.f32.vlgmr.msrb.gmra.mxu0 %vm1332_vm7, %v1578_v2  ;;  %5556 = vmatmul.msk.f32.vlgmr.msrb.gmra.mxu1 %vm1332_vm7, %v1578_v2  ;;  %v1955_v44 = vsel %vm1152_vm1, %v6040_v34, %v6084_v50  ;;  %v1950_v46 = vsel %vm1152_vm1, %v6004_v29, %v6005_v38  ;;  %v6095_v5 = vunpack.i.h.bf16 %v8277_v53  ;;  %v6090_v34 = vunpack.i.h.bf16 %v8294_v61 }
 0x385   : > { %1902 = vmatpush.msra.mxu2 %v1875_v9  ;;  %1922 = vmatpush.msra.mxu3 %v1876_v12  ;;  %v1951_v10 = vsel %vm1152_vm1, %v6005_v38, %v6009_v40  ;;  %v6089_v58 = vunpack.i.l.bf16 %v8294_v61  ;;  %v6094_v51 = vunpack.i.l.bf16 %v8277_v53  ;;  %v1931_v9 = vld [vmem:[#allocation8 + $0x38] sm:$0xff]  ;;  %v2017_v61 = vld [vmem:[#allocation8 + $0x40] sm:$0xff]  ;;  %v1353_v53 = vpop.f32.mrf.mxu2  ;;  %v1373_v12 = vpop.f32.mrf.mxu3 }
 0x386   : > { %5557 = vmatmul.msk.f32.vlgmr.msrb.gmra.mxu2 %vm1332_vm7, %v1664_v27  ;;  %5558 = vmatmul.msk.f32.vlgmr.msrb.gmra.mxu3 %vm1332_vm7, %v1664_v27  ;;  %v1376_v38 = vadd.f32 %v1353_v53, %v8048_v14  ;;  %v1377_v29 = vadd.f32 %v1373_v12, %v8048_v14  ;;  %v10551_v12 = vpack.i.bf16 %v7923_v37, %v7950_v1 }
 0x387   : > { %1978 = vmatpush.msrb.mxu0 %v1954_v56  ;;  %1903 = vmatpush.msra.mxu2 %v1873_v52  ;;  %v8316_v49 = vpop.permute.xlu2 %6107  ;;  %v2045_v33 = vsel %vm1240_vm2, %v6089_v58, %v6090_v34  ;;  %v2046_v50 = vsel %vm1240_vm2, %v6090_v34, %v6094_v51  ;;  %v2611_v37 = vmul.f32 %v7598_v42, %v8059_v26 }
 0x388   : > { %1923 = vmatpush.msra.mxu3 %v1874_v28  ;;  %1998 = vmatpush.msrb.mxu1 %v1955_v44  ;;  %10550 = vst [vmem:[#allocation49_spill] sm:$0xff] %v8316_v49  ;;  %v6109_v45 = vunpack.i.l.bf16 %v8316_v49 }
 0x389   : > { %1979 = vmatpush.msrb.mxu0 %v1952_v39  ;;  %v6098_v59 = vpop.permute.xlu0 %6097 }
 0x38a   : > { %1999 = vmatpush.msrb.mxu1 %v1953_v35  ;;  %v6103_v31 = vpop.permute.xlu1 %6102  ;;  %v6100_v48 = vunpack.i.h.bf16 %v6098_v59  ;;  %v6099_v41 = vunpack.i.l.bf16 %v6098_v59 }
 0x38b   : > { %1980 = vmatpush.msrb.mxu0 %v1950_v46  ;;  %v6105_v55 = vunpack.i.h.bf16 %v6103_v31  ;;  %v6104_v13 = vunpack.i.l.bf16 %v6103_v31 }
 0x38c   : > { %2000 = vmatpush.msrb.mxu1 %v1951_v10  ;;  %5559 = vmatmul.msk.f32.vlgmr.msra.gmra.mxu0 %vm1332_vm7, %v1750_v15  ;;  %v2047_v18 = vsel %vm1240_vm2, %v6095_v5, %v6099_v41  ;;  %v2048_v2 = vsel %vm1240_vm2, %v6099_v41, %v6100_v48 }
 0x38d   : > { %5560 = vmatmul.msk.f32.vlgmr.msra.gmra.mxu1 %vm1332_vm7, %v1750_v15  ;;  %v2049_v21 = vsel %vm1240_vm2, %v6104_v13, %v6105_v55  ;;  %v2050_v16 = vsel %vm1240_vm2, %v6105_v55, %v6109_v45 }
 0x38e   : > { %5561 = vmatmul.msk.f32.vlgmr.msra.gmra.mxu2 %vm1332_vm7, %v1845_v30  ;;  %5562 = vmatmul.msk.f32.vlgmr.msra.gmra.mxu3 %vm1332_vm7, %v1845_v30 }
 0x38f   : > { %2073 = vmatpush.msrb.mxu2 %v2049_v21  ;;  %2093 = vmatpush.msrb.mxu3 %v2050_v16 }
 0x391   : > { %2074 = vmatpush.msrb.mxu2 %v2047_v18  ;;  %2094 = vmatpush.msrb.mxu3 %v2048_v2 }
 0x393   : > { %2075 = vmatpush.msrb.mxu2 %v2045_v33  ;;  %2095 = vmatpush.msrb.mxu3 %v2046_v50 }
 0x394   : > { %5563 = vmatmul.msk.f32.vlgmr.msrb.gmra.mxu0 %vm1332_vm7, %v1931_v9 }
 0x395   : > { %5564 = vmatmul.msk.f32.vlgmr.msrb.gmra.mxu1 %vm1332_vm7, %v1931_v9 }
 0x396   : > { %5565 = vmatmul.msk.f32.vlgmr.msrb.gmra.mxu2 %vm1332_vm7, %v2017_v61  ;;  %5566 = vmatmul.msk.f32.vlgmr.msrb.gmra.mxu3 %vm1332_vm7, %v2017_v61 }
 0x3dd   : > { %v1448_v27 = vpop.f32.mrf.mxu0 }
 0x3de   : > { %v1468_v54 = vpop.f32.mrf.mxu1  ;;  %v1471_v56 = vadd.f32 %v1448_v27, %v1376_v38  ;;  %v2921_v27 = vmul.f32 %v7813_v7, %v8061_v32  ;;  %v8380_v38 = vpop.permute.xlu1 %6117 }
 0x3df   : > { %v1472_v28 = vadd.f32 %v1468_v54, %v1377_v29  ;;  %v2922_v54 = vmul.f32 %v7943_v57, %v7822_v47  ;;  %v10552_v57 = vpack.i.bf16 %v7968_v4, %v7960_v63  ;;  %v10553_v29 = vpack.i.bf16 %v7931_v23, %v7954_v36  ;;  %v8388_v63 = vpop.permute.xlu0 %6112 }
 0x3e6   : > { %v8390_v4 = vpop.permute.xlu1 %6137 }
 0x3ee   : > { %v8400_v23 = vpop.permute.xlu1 %6152 }
 0x3fe   : > { %v1543_v43 = vpop.f32.mrf.mxu2 }
 0x3ff   : > { %v1563_v52 = vpop.f32.mrf.mxu3  ;;  %v1566_v39 = vadd.f32 %v1543_v43, %v1471_v56  ;;  %v6256_v43 = vpack.i.bf16 %v2922_v54, %v2921_v27  ;;  %v2919_v56 = vmul.f32 %v7956_v17, %v7822_v47 }
 0x400   : > { %v1567_v40 = vadd.f32 %v1563_v52, %v1472_v28  ;;  %v2721_v52 = vmul.f32 %v7956_v17, %v7717_v20  ;;  %v2920_v28 = vmul.f32 %v7811_v8, %v8059_v26 }
 0x401   : > { %v1638_v44 = vpop.f32.mrf.mxu0  ;;  %v1658_v24 = vpop.f32.mrf.mxu1 }
 0x402   : > { %v1661_v15 = vadd.f32 %v1638_v44, %v1566_v39  ;;  %v1662_v45 = vadd.f32 %v1658_v24, %v1567_v40  ;;  %v2722_v44 = vmul.f32 %v7695_v11, %v8059_v26  ;;  %v8398_v39 = vpop.permute.xlu0 %6127  ;;  %v6251_v36 = vpack.i.bf16 %v2920_v28, %v2919_v56  ;;  %v10565_v28 = vld [vmem:[#allocation25_spill] sm:$0xff] }
 0x404   : > { %v8376_v24 = vpack.i.bf16 %v2722_v44, %v2721_v52 }
 0x409   : > { %v1715_v35 = vpop.f32.mrf.mxu2  ;;  %v1735_v46 = vpop.f32.mrf.mxu3 }
 0x40a   : > { %v1810_v59 = vpop.f32.mrf.mxu0  ;;  %v1830_v31 = vpop.f32.mrf.mxu1  ;;  %v1738_v55 = vadd.f32 %v1715_v35, %v1661_v15  ;;  %v1739_v13 = vadd.f32 %v1735_v46, %v1662_v45  ;;  %v10554_v46 = vld [vmem:[#allocation38_spill] sm:$0xff] }
 0x40b   : > { %v8403_v40 = vpop.permute.xlu0 %6132  ;;  %v8405_v35 = vpop.permute.xlu1 %6177 }
 0x40c   : > { %v1833_v48 = vadd.f32 %v1810_v59, %v1738_v55  ;;  %v1834_v41 = vadd.f32 %v1830_v31, %v1739_v13  ;;  %v10555_v59 = vld [vmem:[#allocation37_spill] sm:$0xff]  ;;  %v10557_v55 = vld [vmem:[#allocation44_spill] sm:$0xff] }
 0x40d   : > { %v10556_v31 = vpack.i.bf16 %v10554_v46, %v10555_v59 }
 0x411   : > { %v1905_v10 = vpop.f32.mrf.mxu2  ;;  %v1925_v30 = vpop.f32.mrf.mxu3 }
 0x412   : > { %v1928_v21 = vadd.f32 %v1905_v10, %v1833_v48  ;;  %v1929_v16 = vadd.f32 %v1925_v30, %v1834_v41  ;;  %v1982_v5 = vpop.f32.mrf.mxu0  ;;  %v2002_v14 = vpop.f32.mrf.mxu1  ;;  %v2132_v48 = vld [vmem:[#allocation2 + $0x38] sm:$0xff]  ;;  %v10558_v41 = vld [vmem:[#allocation22_spill] sm:$0xff] }
 0x413   : > { %v8413_v15 = vpop.permute.xlu1 %6197 }
 0x414   : > { %v2005_v34 = vadd.f32 %v1982_v5, %v1928_v21  ;;  %v2006_v58 = vadd.f32 %v2002_v14, %v1929_v16  ;;  %v2130_v16 = vld [vmem:[#allocation2 + $0x20] sm:$0xff]  ;;  %v2140_v5 = vmul.f32 %v10558_v41, %v2132_v48  ;;  %v2128_v14 = vld [vmem:[#allocation2 + $0x8] sm:$0xff] }
 0x419   : > { %v2077_v51 = vpop.f32.mrf.mxu2  ;;  %v2097_v18 = vpop.f32.mrf.mxu3 }
 0x41a   : > { %v2100_v2 = vadd.f32 %v2077_v51, %v2005_v34  ;;  %v2101_v33 = vadd.f32 %v2097_v18, %v2006_v58  ;;  %v10559_v34 = vld [vmem:[#allocation42_spill] sm:$0xff]  ;;  %v2138_v58 = vmul.f32 %v10558_v41, %v2130_v16  ;;  %v2143_v18 = vld [vmem:[#allocation9] sm:$0xff]  ;;  %v10573_v16 = vld [vmem:[#allocation40_spill] sm:$0xff] }
 0x41b   : > { %v8421_v45 = vpop.permute.xlu1 %6217 }
 0x41c   : > { %v2104_v50 = vmul.f32 0.2, %v2100_v2  ;;  %v2105_v9 = vmul.f32 0.2, %v2101_v33  ;;  %vm2103_vm8 = vcmp.ge.f32.partialorder %v2101_v33, 0.0  ;;  %vm2102_vm9 = vcmp.ge.f32.partialorder %v2100_v2, 0.0 }
 0x41e   : > { %v2107_v61 = vsel %vm2103_vm8, %v2101_v33, %v2105_v9  ;;  %v2106_v53 = vsel %vm2102_vm9, %v2100_v2, %v2104_v50  ;;  %v2136_v2 = vmul.f32 %v10558_v41, %v2128_v14  ;;  %v8440_v33 = vld [vmem:[#allocation2] sm:$0xff]  ;;  %v2131_v9 = vld [vmem:[#allocation2 + $0x30] sm:$0xff] }
 0x41f   : > { %2112 = vrot.lane.b32.xlu1 %v2107_v61, %s7288_s2  ;;  %2110 = vrot.lane.b32.xlu0 %v2106_v53, %s7288_s2  ;;  %v10560_v53 = vld [vmem:[#allocation21_spill] sm:$0xff] }
 0x420   : > { %v2139_v54 = vmul.f32 %v10560_v53, %v2131_v9  ;;  %v10576_v9 = vld [vmem:[#allocation29_spill] sm:$0xff] }
 0x427   : > { %6237 = vrot.lane.b32.xlu1 %v8072_v22, %s7299_s4  ;;  %6167 = vrot.lane.b32.xlu0 %v10551_v12, %s7297_s21  ;;  %v2610_v22 = vmul.f32 %v7956_v17, %v7666_v0  ;;  %v8411_v17 = vpop.permute.xlu0 %6147 }
 0x429   : > { %v8364_v1 = vpack.i.bf16 %v2611_v37, %v2610_v22  ;;  %v2137_v22 = vmul.f32 %v10560_v53, %v8061_v32  ;;  %v2135_v37 = vmul.f32 %v10560_v53, %v8440_v33 }
 0x42f   : > { %6257 = vrot.lane.b32.xlu1 %v6256_v43, %s7301_s12  ;;  %6172 = vrot.lane.b32.xlu0 %v8068_v60, %s7294_s3  ;;  %v8419_v26 = vpop.permute.xlu0 %6162  ;;  %v8457_v43 = vpop.permute.xlu2 %2124 }
 0x430   : > { %10561 = vst [vmem:[#allocation38_spill] sm:$0xff] %v8457_v43  ;;  %v6120_v43 = vunpack.i.h.bf16 %v8380_v38 }
 0x437   : > { %6187 = vrot.lane.b32.xlu0 %v8088_v19, %s7294_s3  ;;  %v8481_v56 = vpop.permute.xlu2 %6122 }
 0x43f   : > { %6192 = vrot.lane.b32.xlu0 %v8364_v1, %s7296_s26 }
 0x447   : > { %6207 = vrot.lane.b32.xlu0 %v10552_v57, %s7296_s26 }
 0x44f   : > { %6212 = vrot.lane.b32.xlu0 %v8376_v24, %s7298_s1 }
 0x457   : > { %6227 = vrot.lane.b32.xlu0 %v10553_v29, %s7298_s1 }
 0x45f   : > { %6232 = vrot.lane.b32.xlu0 %v8068_v60, %s7299_s4 }
 0x467   : > { %6247 = vrot.lane.b32.xlu0 %v8088_v19, %s7299_s4 }
 0x46f   : > { %6252 = vrot.lane.b32.xlu0 %v6251_v36, %s7301_s12 }
 0x477   : > { %6267 = vrot.lane.b32.xlu0 %v10556_v31, %s7301_s12  ;;  %v10568_v31 = vld [vmem:[#allocation32_spill] sm:$0xff] }
 0x47f   : > { %6342 = vrot.lane.b32.xlu0 %v8068_v60, %s7293_s16 }
 0x487   : > { %6357 = vrot.lane.b32.xlu0 %v8088_v19, %s7293_s16 }
 0x48f   : > { %6377 = vrot.lane.b32.xlu0 %v10557_v55, %s7295_s23 }
 0x491   : > { %v2113_v13 = vpop.permute.xlu1 %2112  ;;  %v2111_v10 = vpop.permute.xlu0 %2110 }
 0x492   : > { %2120 = vst.msk [vmem:[#allocation2 + $0x58] sm:$0xff] %vm525_vm6, %v2113_v13  ;;  %v8427_v30 = vsel %vm525_vm6, %v2111_v10, %v2113_v13 }
 0x493   : > { %2118 = vst.msk [vmem:[#allocation2 + $0x48] sm:$0xff] %vm534_vm5, %v2111_v10  ;;  %v2142_v21 = vmul.f32 %v10558_v41, %v8427_v30  ;;  %v3960_v52 = vmul.f32 %v8427_v30, %v7822_v47  ;;  %v8639_v41 = vld [vmem:[#allocation2 + $0x38] sm:$0xff] }
 0x494   : > { %2119 = vst [vmem:[#allocation2 + $0x50] sm:$0xff] %v8427_v30 }
 0x495   : > { %2179 = vmatpush.msra.mxu1 %v2142_v21 }
 0x497   : > { %6392 = vrot.lane.b32.xlu0 %v10559_v34, %s7297_s21  ;;  %2180 = vmatpush.msra.mxu1 %v2140_v5  ;;  %v10574_v5 = vld [vmem:[#allocation23_spill] sm:$0xff] }
 0x499   : > { %v8437_v51 = vld [vmem:[#allocation2 + $0x58] sm:$0xff]  ;;  %2181 = vmatpush.msra.mxu1 %v2138_v58 }
 0x49a   : > { %v8442_v50 = vld [vmem:[#allocation2 + $0x48] sm:$0xff]  ;;  %v6271_v61 = vpack.i.bf16 %v8440_v33, %v8437_v51  ;;  %v2311_v14 = vmul.f32 %v10574_v5, %v8437_v51  ;;  %v10575_v58 = vld [vmem:[#allocation24_spill] sm:$0xff] }
 0x49b   : > { %v2141_v12 = vmul.f32 %v10560_v53, %v8442_v50  ;;  %v8450_v27 = vpack.i.bf16 %v8427_v30, %v8442_v50  ;;  %2182 = vmatpush.msra.mxu1 %v2136_v2  ;;  %v3959_v57 = vmul.f32 %v7813_v7, %v8442_v50  ;;  %v8475_v44 = vld [vmem:[#allocation2 + $0x50] sm:$0xff]  ;;  %v3248_v2 = vmul.f32 %v10575_v58, %v8440_v33 }
 0x49c   : > { %5568 = vmatmul.msk.f32.vlgmr.msra.gmra.mxu1 %vm1053_vm10, %v2143_v18  ;;  %6272 = vrot.lane.b32.xlu2 %v6271_v61, %s7293_s16  ;;  %10563 = vst [vmem:[#allocation44_spill] sm:$0xff] %v8475_v44  ;;  %v8489_v46 = vmul.f32 %v8475_v44, %v7666_v0  ;;  %v8511_v48 = vmul.f32 %v8475_v44, %v7822_v47 }
 0x49d   : > { %2159 = vmatpush.msra.mxu0 %v2141_v12  ;;  %6282 = vrot.lane.b32.xlu1 %v8450_v27, %s7293_s16  ;;  %v8479_v29 = vpack.i.bf16 %v3960_v52, %v3959_v57  ;;  %v8529_v12 = vpop.permute.xlu2 %6142  ;;  %v10578_v57 = vld [vmem:[#allocation26_spill] sm:$0xff]  ;;  %v2618_v59 = vmul.f32 %v10565_v28, %v8442_v50 }
 0x49e   : > { %10567 = vst [vmem:[#allocation51_spill] sm:$0xff] %v8489_v46  ;;  %v8540_v52 = vmul.f32 %v10578_v57, %v8437_v51 }
 0x49f   : > { %2160 = vmatpush.msra.mxu0 %v2139_v54  ;;  %6407 = vrot.lane.b32.xlu0 %v8068_v60, %s7294_s3  ;;  %v8473_v60 = vld [vmem:[#allocation2 + $0x48] sm:$0xff]  ;;  %10564 = vst [vmem:[#allocation42_spill] sm:$0xff] %v8479_v29  ;;  %v6296_v54 = vpack.i.bf16 %v3248_v2, %v2311_v14 }
 0x4a0   : > { %10562 = vst [vmem:[#allocation37_spill] sm:$0xff] %v8473_v60  ;;  %v8485_v36 = vmul.f32 %v10565_v28, %v8473_v60  ;;  %v8495_v55 = vmul.f32 %v10568_v31, %v8473_v60  ;;  %v8507_v10 = vmul.f32 %v7813_v7, %v8473_v60  ;;  %v2729_v60 = vmul.f32 %v10568_v31, %v8442_v50  ;;  %v10587_v7 = vld [vmem:[#allocation41_spill] sm:$0xff] }
 0x4a1   : > { %2161 = vmatpush.msra.mxu0 %v2137_v22  ;;  %10572 = vst [vmem:[#allocation55_spill] sm:$0xff] %v8511_v48  ;;  %v8575_v48 = vmul.f32 %v7695_v11, %v8437_v51 }
 0x4a2   : > { %10566 = vst [vmem:[#allocation50_spill] sm:$0xff] %v8485_v36 }
 0x4a3   : > { %2162 = vmatpush.msra.mxu0 %v2135_v37  ;;  %10569 = vst [vmem:[#allocation52_spill] sm:$0xff] %v8495_v55  ;;  %v10577_v37 = vld [vmem:[#allocation45_spill] sm:$0xff]  ;;  %v8612_v55 = vld [vmem:[#allocation2 + $0x30] sm:$0xff] }
 0x4a4   : > { %5567 = vmatmul.msk.f32.vlgmr.msra.gmra.mxu0 %vm1053_vm10, %v2143_v18  ;;  %6277 = vrot.lane.b32.xlu2 %v6271_v61, %s7294_s3  ;;  %10571 = vst [vmem:[#allocation54_spill] sm:$0xff] %v8507_v10  ;;  %v2309_v18 = vmul.f32 %v10575_v58, %v8442_v50  ;;  %v2310_v61 = vmul.f32 %v8427_v30, %v10576_v9 }
 0x4a5   : > { %6287 = vrot.lane.b32.xlu1 %v8450_v27, %s7294_s3  ;;  %10579 = vst [vmem:[#allocation40_spill] sm:$0xff] %v8540_v52  ;;  %v8551_v21 = vpop.permute.xlu2 %6157  ;;  %v3599_v10 = vmul.f32 %v10565_v28, %v8440_v33 }
 0x4a6   : > { %v8531_v22 = vpack.i.bf16 %v2310_v61, %v2309_v18  ;;  %v10581_v18 = vld [vmem:[#allocation28_spill] sm:$0xff]  ;;  %v8548_v61 = vpop.permute.xlu0 %6167  ;;  %10582 = vst [vmem:[#allocation45_spill] sm:$0xff] %v8575_v48 }
 0x4a7   : > { %6422 = vrot.lane.b32.xlu0 %v8088_v19, %s7294_s3  ;;  %v8499_v19 = vmul.f32 %v8475_v44, %v7717_v20  ;;  %v2421_v2 = vmul.f32 %v8427_v30, %v10581_v18  ;;  %10584 = vst [vmem:[#allocation57_spill] sm:$0xff] %v8612_v55 }
 0x4a9   : > { %10570 = vst [vmem:[#allocation53_spill] sm:$0xff] %v8499_v19  ;;  %v8614_v19 = vld [vmem:[#allocation2 + $0x28] sm:$0xff] }
 0x4aa   : > { %v6351_v36 = vpack.i.bf16 %v8612_v55, %v8614_v19 }
 0x4ac   : > { %2855 = vrot.lane.b32.xlu2 %v8437_v51, %s7299_s4 }
 0x4ad   : > { %6292 = vrot.lane.b32.xlu1 %v8450_v27, %s7299_s4 }
 0x4af   : > { %6442 = vrot.lane.b32.xlu0 %v10573_v16, %s7296_s26  ;;  %v10580_v16 = vld [vmem:[#allocation27_spill] sm:$0xff] }
 0x4b0   : > { %v2420_v34 = vmul.f32 %v10580_v16, %v8442_v50  ;;  %v3375_v14 = vmul.f32 %v10580_v16, %v8440_v33  ;;  %v2929_v50 = vmul.f32 %v7811_v8, %v8437_v51  ;;  %v10586_v8 = vld [vmem:[#allocation31_spill] sm:$0xff] }
 0x4b2   : > { %v6321_v13 = vpack.i.bf16 %v2421_v2, %v2420_v34  ;;  %v2619_v34 = vmul.f32 %v8427_v30, %v7666_v0 }
 0x4b4   : > { %6297 = vrot.lane.b32.xlu2 %v6296_v54, %s7295_s23  ;;  %v6301_v54 = vpack.i.bf16 %v3375_v14, %v8540_v52  ;;  %v8564_v2 = vpack.i.bf16 %v2619_v34, %v2618_v59  ;;  %v3726_v59 = vmul.f32 %v10568_v31, %v8440_v33  ;;  %v8643_v31 = vld [vmem:[#allocation2 + $0x40] sm:$0xff] }
 0x4b5   : > { %6317 = vrot.lane.b32.xlu1 %v8531_v22, %s7295_s23 }
 0x4b7   : > { %6457 = vrot.lane.b32.xlu0 %v10577_v37, %s7298_s1  ;;  %v2620_v37 = vmul.f32 %v7598_v42, %v8437_v51 }
 0x4b9   : > { %v6306_v14 = vpack.i.bf16 %v3599_v10, %v2620_v37  ;;  %v2730_v10 = vmul.f32 %v8427_v30, %v7717_v20  ;;  %v6311_v37 = vpack.i.bf16 %v3726_v59, %v8575_v48 }
 0x4bb   : > { %v8584_v34 = vpack.i.bf16 %v2730_v10, %v2729_v60  ;;  %v3048_v60 = vld [vmem:[%s10347_s9] sm:$0xff] }
 0x4bc   : > { %6302 = vrot.lane.b32.xlu2 %v6301_v54, %s7297_s21  ;;  %v8566_v54 = vpop.permute.xlu0 %6172  ;;  %v8605_v10 = vld [vmem:[#allocation2 + $0x20] sm:$0xff] }
 0x4bd   : > { %6322 = vrot.lane.b32.xlu1 %v6321_v13, %s7297_s21  ;;  %10583 = vst [vmem:[#allocation56_spill] sm:$0xff] %v8584_v34 }
 0x4bf   : > { %6467 = vrot.lane.b32.xlu0 %v6321_v13, %s7297_s21  ;;  %v8571_v13 = vpop.permute.xlu2 %6182 }
 0x4c4   : > { %6307 = vrot.lane.b32.xlu2 %v6306_v14, %s7296_s26  ;;  %v8589_v14 = vpop.permute.xlu0 %6187 }
 0x4c5   : > { %6327 = vrot.lane.b32.xlu1 %v8564_v2, %s7296_s26 }
 0x4c7   : > { %v8591_v44 = vpop.permute.xlu2 %6202 }
 0x4cc   : > { %6312 = vrot.lane.b32.xlu2 %v6311_v37, %s7298_s1  ;;  %v8598_v33 = vpop.permute.xlu0 %6192  ;;  %v6346_v37 = vpack.i.bf16 %v8605_v10, %v8061_v32  ;;  %v3252_v32 = vmul.f32 %v8605_v10, %v10576_v9 }
 0x4cd   : > { %6332 = vrot.lane.b32.xlu1 %v8584_v34, %s7298_s1  ;;  %v3255_v34 = vmul.f32 %v8639_v41, %v10576_v9 }
 0x4ce   : > { %v6371_v47 = vpack.i.bf16 %v3252_v32, %v10586_v8  ;;  %v3256_v8 = vmul.f32 %v8643_v31, %v10574_v5  ;;  %v3383_v5 = vmul.f32 %v8643_v31, %v10578_v57 }
 0x4cf   : > { %v8603_v59 = vpop.permute.xlu2 %6222 }
 0x4d4   : > { %2966 = vrot.lane.b32.xlu2 %v2929_v50, %s7301_s12  ;;  %v8610_v50 = vpop.permute.xlu0 %6207 }
 0x4d5   : > { %6337 = vrot.lane.b32.xlu1 %v8479_v29, %s7301_s12 }
 0x4d7   : > { %v8618_v46 = vpop.permute.xlu2 %6242 }
 0x4dc   : > { %3051 = vperm.xlu2 %5764, %v3048_v60   ;;  %v8625_v60 = vld [vmem:[#allocation2 + $0x8] sm:$0xff]  ;;  %v8631_v58 = vpop.permute.xlu0 %6212 }
 0x4dd   : > { %6347 = vrot.lane.b32.xlu1 %v6346_v37, %s7293_s16  ;;  %10585 = vst [vmem:[#allocation58_spill] sm:$0xff] %v8625_v60  ;;  %v3249_v29 = vmul.f32 %v8625_v60, %v10576_v9  ;;  %v3376_v53 = vmul.f32 %v8625_v60, %v10581_v18  ;;  %v3382_v60 = vmul.f32 %v8639_v41, %v10581_v18 }
 0x4de   : > { %v3381_v9 = vmul.f32 %v8612_v55, %v10580_v16  ;;  %v8674_v16 = vld [vmem:[#allocation2 + $0x18] sm:$0xff] }
 0x4df   : > { %v6366_v48 = vpack.i.bf16 %v10587_v7, %v3249_v29  ;;  %v8635_v52 = vpop.permute.xlu2 %6262  ;;  %v10588_v7 = vld [vmem:[#allocation43_spill] sm:$0xff] }
 0x4e0   : > { %v6386_v29 = vpack.i.bf16 %v10588_v7, %v3376_v53  ;;  %v3380_v53 = vmul.f32 %v8614_v19, %v10578_v57  ;;  %v8663_v7 = vpop.permute.xlu1 %6237  ;;  %10591 = vst [vmem:[#allocation43_spill] sm:$0xff] %v8674_v16 }
 0x4e4   : > { %6352 = vrot.lane.b32.xlu2 %v6351_v36, %s7293_s16 }
 0x4e5   : > { %6362 = vrot.lane.b32.xlu1 %v8450_v27, %s7293_s16 }
 0x4ec   : > { %6372 = vrot.lane.b32.xlu2 %v6371_v47, %s7295_s23  ;;  %v6381_v47 = vpack.i.bf16 %v3256_v8, %v3255_v34  ;;  %v6401_v34 = vpack.i.bf16 %v3383_v5, %v3382_v60  ;;  %v6396_v8 = vpack.i.bf16 %v3381_v9, %v3380_v53  ;;  %v3602_v5 = vmul.f32 %v8674_v16, %v10565_v28  ;;  %v8680_v60 = vpop.permute.xlu1 %6257 }
 0x4ed   : > { %6367 = vrot.lane.b32.xlu1 %v6366_v48, %s7295_s23  ;;  %v8650_v48 = vpop.permute.xlu0 %6227  ;;  %v3603_v9 = vmul.f32 %v8605_v10, %v7666_v0  ;;  %10592 = vst [vmem:[#allocation59_spill] sm:$0xff] %v8680_v60  ;;  %v6129_v28 = vunpack.i.l.bf16 %v8398_v39 }
 0x4f4   : > { %6387 = vrot.lane.b32.xlu2 %v6386_v29, %s7297_s21 }
 0x4f5   : > { %6382 = vrot.lane.b32.xlu1 %v6381_v47, %s7295_s23  ;;  %v8668_v47 = vpop.permute.xlu0 %6232 }
 0x4f6   : > { %v8652_v32 = vpop.permute.xlu2 %6272 }
 0x4f7   : > { %10589 = vst [vmem:[#allocation31_spill] sm:$0xff] %v8652_v32  ;;  %v6274_v57 = vunpack.i.l.bf16 %v8652_v32  ;;  %v6114_v32 = vunpack.i.l.bf16 %v8388_v63 }
 0x4fc   : > { %6402 = vrot.lane.b32.xlu2 %v6401_v34, %s7297_s21  ;;  %v6436_v34 = vpack.i.bf16 %v3603_v9, %v3602_v5  ;;  %v6119_v5 = vunpack.i.l.bf16 %v8380_v38  ;;  %v6125_v9 = vunpack.i.h.bf16 %v8481_v56 }
 0x4fd   : > { %6397 = vrot.lane.b32.xlu1 %v6396_v8, %s7297_s21  ;;  %v8682_v53 = vpop.permute.xlu0 %6247 }
 0x4fe   : > { %v8666_v29 = vpop.permute.xlu2 %6277  ;;  %v2243_v38 = vsel %vm657_vm12, %v6125_v9, %v6129_v28  ;;  %v3606_v9 = vmul.f32 %v8639_v41, %v7666_v0 }
 0x4ff   : > { %10590 = vst [vmem:[#allocation41_spill] sm:$0xff] %v8666_v29 }
 0x504   : > { %6417 = vrot.lane.b32.xlu2 %v6351_v36, %s7294_s3 }
 0x505   : > { %6412 = vrot.lane.b32.xlu1 %v6346_v37, %s7294_s3  ;;  %v6130_v37 = vunpack.i.h.bf16 %v8398_v39  ;;  %v6115_v39 = vunpack.i.h.bf16 %v8388_v63  ;;  %v8700_v60 = vpop.permute.xlu0 %6252  ;;  %v2241_v63 = vsel %vm657_vm12, %v6119_v5, %v6120_v43 }
 0x506   : > { %v8672_v18 = vpop.permute.xlu2 %2855 }
 0x50c   : > { %6437 = vrot.lane.b32.xlu2 %v6436_v34, %s7296_s26  ;;  %v6124_v34 = vunpack.i.l.bf16 %v8481_v56  ;;  %v10594_v56 = vld [vmem:[#allocation46_spill] sm:$0xff] }
 0x50d   : > { %6427 = vrot.lane.b32.xlu1 %v8450_v27, %s7294_s3  ;;  %v8725_v5 = vpop.permute.xlu0 %6267 }
 0x50e   : > { %v8687_v36 = vpop.permute.xlu2 %6297 }
 0x50f   : > { %10593 = vst [vmem:[#allocation60_spill] sm:$0xff] %v8687_v36  ;;  %v6283_v8 = vpop.permute.xlu1 %6282 }
 0x510   : > { %v6285_v16 = vunpack.i.h.bf16 %v6283_v8  ;;  %v6284_v55 = vunpack.i.l.bf16 %v6283_v8  ;;  %v2244_v8 = vsel %vm657_vm12, %v6129_v28, %v6130_v37  ;;  %v2240_v37 = vsel %vm657_vm12, %v6114_v32, %v6115_v39 }
 0x511   : > { %v3734_v39 = vmul.f32 %v8643_v31, %v7695_v11 }
 0x512   : > { %v2245_v27 = vsel %vm657_vm12, %v6284_v55, %v6285_v16  ;;  %v2246_v49 = vsel %vm657_vm12, %v6285_v16, %v6274_v57  ;;  %v6020_v55 = vunpack.i.h.bf16 %v10594_v56  ;;  %v2242_v57 = vsel %vm657_vm12, %v6120_v43, %v6124_v34 }
 0x513   : > { %2270 = vmatpush.msra.mxu2 %v2245_v27  ;;  %2290 = vmatpush.msra.mxu3 %v2246_v49  ;;  %v3733_v27 = vmul.f32 %v8639_v41, %v7717_v20 }
 0x514   : > { %6452 = vrot.lane.b32.xlu2 %v8376_v24, %s7298_s1  ;;  %v2202_v24 = vld [vmem:[#allocation9 + $0x8] sm:$0xff]  ;;  %v2239_v28 = vsel %vm657_vm12, %v6020_v55, %v6114_v32  ;;  %v6164_v55 = vunpack.i.l.bf16 %v8419_v26 }
 0x515   : > { %2271 = vmatpush.msra.mxu2 %v2243_v38  ;;  %2291 = vmatpush.msra.mxu3 %v2244_v8  ;;  %v6481_v56 = vpack.i.bf16 %v3734_v39, %v3733_v27  ;;  %v10596_v39 = vld [vmem:[#allocation48_spill] sm:$0xff] }
 0x516   : > { %6432 = vrot.lane.b32.xlu1 %v8364_v1, %s7296_s26  ;;  %v8709_v49 = vpop.permute.xlu2 %6302  ;;  %v3607_v1 = vmul.f32 %v8643_v31, %v7598_v42 }
 0x517   : > { %v8713_v16 = vpop.permute.xlu1 %6287  ;;  %2272 = vmatpush.msra.mxu2 %v2241_v63  ;;  %2292 = vmatpush.msra.mxu3 %v2242_v57  ;;  %v8742_v63 = vpop.permute.xlu0 %6342  ;;  %v6299_v57 = vunpack.i.l.bf16 %v8687_v36 }
 0x518   : > { %v6446_v43 = vpack.i.bf16 %v3607_v1, %v3606_v9  ;;  %10595 = vst [vmem:[#allocation46_spill] sm:$0xff] %v8742_v63  ;;  %v6144_v9 = vunpack.i.l.bf16 %v8529_v12  ;;  %v6135_v1 = vunpack.i.h.bf16 %v8403_v40  ;;  %v6290_v63 = vunpack.i.h.bf16 %v8713_v16 }
 0x519   : > { %2273 = vmatpush.msra.mxu2 %v2239_v28  ;;  %2293 = vmatpush.msra.mxu3 %v2240_v37  ;;  %v6140_v28 = vunpack.i.h.bf16 %v8390_v4  ;;  %v6145_v37 = vunpack.i.h.bf16 %v8529_v12  ;;  %v6501_v12 = vpack.i.bf16 %v8614_v19, %v8605_v10 }
 0x51a   : > { %5569 = vmatmul.msk.f32.vlgmr.msra.gmra.mxu2 %vm1053_vm10, %v2202_v24  ;;  %5570 = vmatmul.msk.f32.vlgmr.msra.gmra.mxu3 %vm1053_vm10, %v2202_v24 }
 0x51c   : > { %6462 = vrot.lane.b32.xlu2 %v8531_v22, %s7295_s23  ;;  %v6165_v22 = vunpack.i.h.bf16 %v8419_v26 }
 0x51e   : > { %6447 = vrot.lane.b32.xlu1 %v6446_v43, %s7296_s26  ;;  %v8728_v32 = vpop.permute.xlu2 %6307  ;;  %v6134_v43 = vunpack.i.l.bf16 %v8403_v40  ;;  %v2355_v36 = vsel %vm748_vm11, %v6164_v55, %v6165_v22  ;;  %v6289_v40 = vunpack.i.l.bf16 %v8713_v16  ;;  %v6180_v16 = vunpack.i.h.bf16 %v8405_v35 }
 0x51f   : > { %v8730_v34 = vpop.permute.xlu1 %6292 }
 0x520   : > { %v2351_v10 = vsel %vm748_vm11, %v6134_v43, %v6135_v1  ;;  %v6185_v1 = vunpack.i.h.bf16 %v8571_v13 }
 0x524   : > { %6472 = vrot.lane.b32.xlu2 %v8564_v2, %s7296_s26  ;;  %v6139_v2 = vunpack.i.l.bf16 %v8390_v4  ;;  %v2354_v4 = vsel %vm748_vm11, %v6145_v37, %v6164_v55  ;;  %v6159_v55 = vunpack.i.l.bf16 %v8551_v21 }
 0x526   : > { %v8738_v38 = vpop.permute.xlu2 %6312 }
 0x527   : > { %v6318_v8 = vpop.permute.xlu1 %6317 }
 0x528   : > { %v6320_v24 = vunpack.i.h.bf16 %v6318_v8  ;;  %v6319_v41 = vunpack.i.l.bf16 %v6318_v8  ;;  %v6045_v8 = vunpack.i.h.bf16 %v10596_v39 }
 0x52a   : > { %v2356_v26 = vsel %vm748_vm11, %v6319_v41, %v6320_v24  ;;  %v2357_v27 = vsel %vm748_vm11, %v6320_v24, %v6299_v57  ;;  %v2352_v57 = vsel %vm748_vm11, %v6139_v2, %v6140_v28  ;;  %v2353_v24 = vsel %vm748_vm11, %v6140_v28, %v6144_v9  ;;  %v2313_v28 = vld [vmem:[#allocation9 + $0x10] sm:$0xff] }
 0x52b   : > { %2381 = vmatpush.msrb.mxu0 %v2356_v26  ;;  %2401 = vmatpush.msrb.mxu1 %v2357_v27  ;;  %v6155_v41 = vunpack.i.h.bf16 %v8400_v23  ;;  %v2350_v22 = vsel %vm748_vm11, %v6045_v8, %v6134_v43  ;;  %v6189_v2 = vunpack.i.l.bf16 %v8589_v14  ;;  %v6304_v9 = vunpack.i.l.bf16 %v8709_v49 }
 0x52c   : > { %6482 = vrot.lane.b32.xlu2 %v6481_v56, %s7298_s1  ;;  %v6154_v56 = vunpack.i.l.bf16 %v8400_v23  ;;  %v6279_v23 = vunpack.i.l.bf16 %v8666_v29  ;;  %v6169_v43 = vunpack.i.l.bf16 %v8548_v61  ;;  %v6190_v8 = vunpack.i.h.bf16 %v8589_v14 }
 0x52d   : > { %2382 = vmatpush.msrb.mxu0 %v2354_v4  ;;  %2402 = vmatpush.msrb.mxu1 %v2355_v36  ;;  %v6179_v36 = vunpack.i.l.bf16 %v8405_v35  ;;  %v2554_v35 = vsel %vm906_vm13, %v6289_v40, %v6290_v63  ;;  %v6170_v4 = vunpack.i.h.bf16 %v8548_v61  ;;  %v6160_v14 = vunpack.i.h.bf16 %v8551_v21 }
 0x52e   : > { %v8765_v37 = vpop.permute.xlu2 %2966  ;;  %v6149_v40 = vunpack.i.l.bf16 %v8411_v17  ;;  %v6184_v61 = vunpack.i.l.bf16 %v8571_v13  ;;  %v2553_v21 = vsel %vm906_vm13, %v6189_v2, %v6190_v8  ;;  %v2463_v13 = vsel %vm838_vm15, %v6154_v56, %v6155_v41 }
 0x52f   : > { %v6323_v26 = vpop.permute.xlu1 %6322  ;;  %2383 = vmatpush.msrb.mxu0 %v2352_v57  ;;  %2403 = vmatpush.msrb.mxu1 %v2353_v24  ;;  %v8780_v57 = vpop.permute.xlu0 %6357  ;;  %v2555_v24 = vsel %vm906_vm13, %v6290_v63, %v6279_v23  ;;  %v2552_v63 = vsel %vm906_vm13, %v6185_v1, %v6189_v2  ;;  %v6175_v23 = vunpack.i.h.bf16 %v8566_v54 }
 0x530   : > { %v6325_v27 = vunpack.i.h.bf16 %v6323_v26  ;;  %v6324_v39 = vunpack.i.l.bf16 %v6323_v26 }
 0x531   : > { %2384 = vmatpush.msrb.mxu0 %v2350_v22  ;;  %2404 = vmatpush.msrb.mxu1 %v2351_v10  ;;  %v6150_v22 = vunpack.i.h.bf16 %v8411_v17  ;;  %v10597_v10 = vld [vmem:[#allocation47_spill] sm:$0xff]  ;;  %v2465_v17 = vsel %vm838_vm15, %v6160_v14, %v6169_v43 }
 0x532   : > { %5571 = vmatmul.msk.f32.vlgmr.msrb.gmra.mxu0 %vm1053_vm10, %v2313_v28  ;;  %5572 = vmatmul.msk.f32.vlgmr.msrb.gmra.mxu1 %vm1053_vm10, %v2313_v28  ;;  %v2467_v26 = vsel %vm838_vm15, %v6324_v39, %v6325_v27  ;;  %v2468_v29 = vsel %vm838_vm15, %v6325_v27, %v6304_v9  ;;  %v6050_v0 = vunpack.i.h.bf16 %v10597_v10  ;;  %v6174_v28 = vunpack.i.l.bf16 %v8566_v54 }
 0x533   : > { %2579 = vmatpush.msra.mxu0 %v2554_v35  ;;  %2599 = vmatpush.msra.mxu1 %v2555_v24  ;;  %v6025_v9 = vunpack.i.h.bf16 %v8209_v6  ;;  %v2466_v27 = vsel %vm838_vm15, %v6169_v43, %v6170_v4  ;;  %v2550_v39 = vsel %vm906_vm13, %v6179_v36, %v6180_v16  ;;  %v2464_v54 = vsel %vm838_vm15, %v6155_v41, %v6159_v55  ;;  %v2424_v36 = vld [vmem:[#allocation9 + $0x18] sm:$0xff] }
 0x534   : > { %2492 = vmatpush.msrb.mxu2 %v2467_v26  ;;  %2512 = vmatpush.msrb.mxu3 %v2468_v29  ;;  %v2461_v1 = vsel %vm838_vm15, %v6050_v0, %v6149_v40  ;;  %v2462_v56 = vsel %vm838_vm15, %v6149_v40, %v6150_v22  ;;  %v6309_v6 = vunpack.i.l.bf16 %v8728_v32  ;;  %v6200_v41 = vunpack.i.h.bf16 %v8413_v15  ;;  %v2523_v40 = vld [vmem:[#allocation9 + $0x20] sm:$0xff] }
 0x535   : > { %6502 = vrot.lane.b32.xlu2 %v6501_v12, %s7299_s4  ;;  %2580 = vmatpush.msra.mxu0 %v2552_v63  ;;  %v2551_v12 = vsel %vm906_vm13, %v6180_v16, %v6184_v61  ;;  %v2548_v35 = vsel %vm906_vm13, %v6025_v9, %v6174_v28  ;;  %v6199_v55 = vunpack.i.l.bf16 %v8413_v15  ;;  %v6209_v16 = vunpack.i.l.bf16 %v8610_v50 }
 0x536   : > { %2600 = vmatpush.msra.mxu1 %v2553_v21  ;;  %2493 = vmatpush.msrb.mxu2 %v2465_v17  ;;  %v8801_v29 = vpop.permute.xlu2 %3051  ;;  %v2549_v0 = vsel %vm906_vm13, %v6174_v28, %v6175_v23  ;;  %v6204_v4 = vunpack.i.l.bf16 %v8591_v44  ;;  %v6210_v24 = vunpack.i.h.bf16 %v8610_v50  ;;  %v6205_v22 = vunpack.i.h.bf16 %v8591_v44 }
 0x537   : > { %10598 = vst [vmem:[#allocation48_spill] sm:$0xff] %v8801_v29  ;;  %2513 = vmatpush.msrb.mxu3 %v2466_v27  ;;  %2581 = vmatpush.msra.mxu0 %v2550_v39  ;;  %v6328_v2 = vpop.permute.xlu1 %6327  ;;  %v6516_v15 = vpack.i.bf16 %v8437_v51, %v8427_v30  ;;  %v6060_v61 = vunpack.i.h.bf16 %v8211_v62  ;;  %v6055_v10 = vunpack.i.h.bf16 %v8243_v25  ;;  %v8824_v50 = vpop.permute.xlu0 %6377  ;;  %v6085_v28 = vunpack.i.h.bf16 %v8292_v3 }
 0x538   : > { %2601 = vmatpush.msra.mxu1 %v2551_v12  ;;  %v6330_v8 = vunpack.i.h.bf16 %v6328_v2  ;;  %v6329_v43 = vunpack.i.l.bf16 %v6328_v2  ;;  %2494 = vmatpush.msrb.mxu2 %v2463_v13  ;;  %v6194_v44 = vunpack.i.l.bf16 %v8598_v33  ;;  %v2663_v63 = vsel %vm995_vm0, %v6205_v22, %v6209_v16 }
 0x539   : > { %2514 = vmatpush.msrb.mxu3 %v2464_v54  ;;  %2582 = vmatpush.msra.mxu0 %v2548_v35  ;;  %v2661_v30 = vsel %vm995_vm0, %v6199_v55, %v6200_v41  ;;  %v6220_v51 = vunpack.i.h.bf16 %v8421_v45  ;;  %v6195_v25 = vunpack.i.h.bf16 %v8598_v33  ;;  %v2664_v23 = vsel %vm995_vm0, %v6209_v16, %v6210_v24 }
 0x53a   : > { %2602 = vmatpush.msra.mxu1 %v2549_v0  ;;  %2495 = vmatpush.msrb.mxu2 %v2461_v1  ;;  %v2665_v26 = vsel %vm995_vm0, %v6329_v43, %v6330_v8  ;;  %v2666_v14 = vsel %vm995_vm0, %v6330_v8, %v6309_v6  ;;  %v2662_v17 = vsel %vm995_vm0, %v6200_v41, %v6204_v4  ;;  %v10436_v13 = vunpack.i.l.bf16 %v8780_v57 }
 0x53b   : > { %2515 = vmatpush.msrb.mxu3 %v2462_v56  ;;  %5573 = vmatmul.msk.f32.vlgmr.msrb.gmra.mxu2 %vm1053_vm10, %v2424_v36  ;;  %v6295_v9 = vunpack.i.h.bf16 %v8730_v34  ;;  %v6294_v27 = vunpack.i.l.bf16 %v8730_v34  ;;  %v6240_v33 = vunpack.i.h.bf16 %v8663_v7  ;;  %v6239_v12 = vunpack.i.l.bf16 %v8663_v7  ;;  %v2622_v56 = vld [vmem:[#allocation9 + $0x28] sm:$0xff] }
 0x53c   : > { %5574 = vmatmul.msk.f32.vlgmr.msrb.gmra.mxu3 %vm1053_vm10, %v2424_v36  ;;  %2690 = vmatpush.msra.mxu2 %v2665_v26  ;;  %v6249_v6 = vunpack.i.l.bf16 %v8682_v53  ;;  %v6314_v8 = vunpack.i.l.bf16 %v8738_v38  ;;  %v2659_v34 = vsel %vm995_vm0, %v6055_v10, %v6194_v44  ;;  %v6229_v35 = vunpack.i.l.bf16 %v8650_v48 }
 0x53d   : > { %2710 = vmatpush.msra.mxu3 %v2666_v14  ;;  %6517 = vrot.lane.b32.xlu2 %v6516_v15, %s7299_s4  ;;  %v6250_v7 = vunpack.i.h.bf16 %v8682_v53  ;;  %v2660_v36 = vsel %vm995_vm0, %v6194_v44, %v6195_v25  ;;  %v6245_v55 = vunpack.i.h.bf16 %v8618_v46  ;;  %v6230_v16 = vunpack.i.h.bf16 %v8650_v48 }
 0x53e   : > { %2691 = vmatpush.msra.mxu2 %v2663_v63  ;;  %v8835_v21 = vpop.permute.xlu2 %6352  ;;  %5575 = vmatmul.msk.f32.vlgmr.msra.gmra.mxu0 %vm1053_vm10, %v2523_v40  ;;  %v2863_v0 = vsel %vm1152_vm1, %v6294_v27, %v6295_v9  ;;  %v6219_v24 = vunpack.i.l.bf16 %v8421_v45  ;;  %v6225_v53 = vunpack.i.h.bf16 %v8603_v59  ;;  %v6224_v26 = vunpack.i.l.bf16 %v8603_v59 }
 0x53f   : > { %2711 = vmatpush.msra.mxu3 %v2664_v23  ;;  %v6355_v39 = vunpack.i.h.bf16 %v8835_v21  ;;  %v6333_v54 = vpop.permute.xlu1 %6332  ;;  %5576 = vmatmul.msk.f32.vlgmr.msra.gmra.mxu1 %vm1053_vm10, %v2523_v40  ;;  %v2864_v14 = vsel %vm1152_vm1, %v6295_v9, %v8672_v18  ;;  %v6244_v48 = vunpack.i.l.bf16 %v8618_v46  ;;  %v6234_v22 = vunpack.i.l.bf16 %v8668_v47  ;;  %v8875_v44 = vpop.permute.xlu0 %6392 }
 0x540   : > { %v6335_v2 = vunpack.i.h.bf16 %v6333_v54  ;;  %v6334_v1 = vunpack.i.l.bf16 %v6333_v54  ;;  %2692 = vmatpush.msra.mxu2 %v2661_v30  ;;  %v2861_v15 = vsel %vm1152_vm1, %v6245_v55, %v6249_v6  ;;  %v2859_v40 = vsel %vm1152_vm1, %v6239_v12, %v6240_v33 }
 0x541   : > { %2712 = vmatpush.msra.mxu3 %v2662_v17  ;;  %v8852_v43 = vsel %vm657_vm12, %v6355_v39, %v10436_v13  ;;  %v6214_v10 = vunpack.i.l.bf16 %v8631_v58  ;;  %v6235_v59 = vunpack.i.h.bf16 %v8668_v47  ;;  %v2862_v18 = vsel %vm1152_vm1, %v6249_v6, %v6250_v7 }
 0x542   : > { %2693 = vmatpush.msra.mxu2 %v2659_v34  ;;  %v2776_v41 = vsel %vm1084_vm14, %v6334_v1, %v6335_v2  ;;  %v2777_v4 = vsel %vm1084_vm14, %v6335_v2, %v6314_v8  ;;  %v2774_v46 = vsel %vm1084_vm14, %v6225_v53, %v6229_v35  ;;  %v6215_v30 = vunpack.i.h.bf16 %v8631_v58  ;;  %v2733_v2 = vld [vmem:[#allocation9 + $0x30] sm:$0xff] }
 0x543   : > { %2713 = vmatpush.msra.mxu3 %v2660_v36  ;;  %5577 = vmatmul.msk.f32.vlgmr.msra.gmra.mxu2 %vm1053_vm10, %v2622_v56  ;;  %v6379_v25 = vunpack.i.l.bf16 %v8824_v50  ;;  %v2775_v23 = vsel %vm1084_vm14, %v6229_v35, %v6230_v16  ;;  %v2860_v9 = vsel %vm1152_vm1, %v6240_v33, %v6244_v48  ;;  %v2772_v54 = vsel %vm1084_vm14, %v6219_v24, %v6220_v51 }
 0x544   : > { %5578 = vmatmul.msk.f32.vlgmr.msra.gmra.mxu3 %vm1053_vm10, %v2622_v56  ;;  %2888 = vmatpush.msrb.mxu2 %v2863_v0  ;;  %v2773_v58 = vsel %vm1084_vm14, %v6220_v51, %v6224_v26  ;;  %v2857_v12 = vsel %vm1152_vm1, %v6085_v28, %v6234_v22  ;;  %v2858_v1 = vsel %vm1152_vm1, %v6234_v22, %v6235_v59  ;;  %v2832_v56 = vld [vmem:[#allocation9 + $0x38] sm:$0xff]  ;;  %v6269_v51 = vunpack.i.l.bf16 %v8725_v5  ;;  %v10602_v26 = vld [vmem:[#allocation49_spill] sm:$0xff] }
 0x545   : > { %2908 = vmatpush.msrb.mxu3 %v2864_v14  ;;  %2801 = vmatpush.msrb.mxu0 %v2776_v41  ;;  %v2770_v45 = vsel %vm1084_vm14, %v6060_v61, %v6214_v10  ;;  %v2771_v3 = vsel %vm1084_vm14, %v6214_v10, %v6215_v30  ;;  %v6270_v6 = vunpack.i.h.bf16 %v8725_v5  ;;  %v6265_v62 = vunpack.i.h.bf16 %v8635_v52  ;;  %v10600_v61 = vld [vmem:[#allocation59_spill] sm:$0xff]  ;;  %v2931_v22 = vld [vmem:[#allocation9 + $0x40] sm:$0xff] }
 0x546   : > { %2821 = vmatpush.msrb.mxu1 %v2777_v4  ;;  %2889 = vmatpush.msrb.mxu2 %v2861_v15  ;;  %v8879_v63 = vpop.permute.xlu2 %6372  ;;  %v6260_v34 = vunpack.i.h.bf16 %v10600_v61  ;;  %v6259_v35 = vunpack.i.l.bf16 %v10600_v61  ;;  %v6264_v7 = vunpack.i.l.bf16 %v8635_v52  ;;  %v6254_v36 = vunpack.i.l.bf16 %v8700_v60 }
 0x547   : > { %2909 = vmatpush.msrb.mxu3 %v2862_v18  ;;  %2802 = vmatpush.msrb.mxu0 %v2774_v46  ;;  %v10430_v47 = vunpack.i.h.bf16 %v8879_v63  ;;  %v6338_v17 = vpop.permute.xlu1 %6337  ;;  %v2972_v41 = vsel %vm1240_vm2, %v6265_v62, %v6269_v51  ;;  %v6255_v0 = vunpack.i.h.bf16 %v8700_v60  ;;  %v8927_v4 = vpop.permute.xlu0 %6407  ;;  %v6354_v52 = vunpack.i.l.bf16 %v8835_v21 }
 0x548   : > { %2822 = vmatpush.msrb.mxu1 %v2775_v23  ;;  %2890 = vmatpush.msrb.mxu2 %v2859_v40  ;;  %v6340_v27 = vunpack.i.h.bf16 %v6338_v17  ;;  %v6339_v39 = vunpack.i.l.bf16 %v6338_v17  ;;  %10601 = vst [vmem:[#allocation59_spill] sm:$0xff] %v8927_v4  ;;  %v2973_v24 = vsel %vm1240_vm2, %v6269_v51, %v6270_v6  ;;  %v2970_v14 = vsel %vm1240_vm2, %v6259_v35, %v6260_v34 }
 0x549   : > { %2910 = vmatpush.msrb.mxu3 %v2860_v9  ;;  %2803 = vmatpush.msrb.mxu0 %v2772_v54  ;;  %v8898_v33 = vsel %vm748_vm11, %v10430_v47, %v6379_v25  ;;  %v2971_v60 = vsel %vm1240_vm2, %v6260_v34, %v6264_v7  ;;  %v2969_v40 = vsel %vm1240_vm2, %v6254_v36, %v6255_v0  ;;  %v6315_v34 = vunpack.i.h.bf16 %v8738_v38 }
 0x54a   : > { %10599 = vst [vmem:[#allocation47_spill] sm:$0xff] %v8898_v33  ;;  %2823 = vmatpush.msrb.mxu1 %v2773_v58  ;;  %2891 = vmatpush.msrb.mxu2 %v2857_v12  ;;  %v2974_v28 = vsel %vm1240_vm2, %v6339_v39, %v6340_v27  ;;  %v2975_v8 = vsel %vm1240_vm2, %v6340_v27, %v8765_v37  ;;  %v6305_v37 = vunpack.i.h.bf16 %v8709_v49  ;;  %v6110_v49 = vunpack.i.h.bf16 %v10602_v26 }
 0x54b   : > { %2911 = vmatpush.msrb.mxu3 %v2858_v1  ;;  %2804 = vmatpush.msrb.mxu0 %v2770_v45  ;;  %v6380_v12 = vunpack.i.h.bf16 %v8824_v50  ;;  %v6310_v38 = vunpack.i.h.bf16 %v8728_v32 }
 0x54c   : > { %2824 = vmatpush.msrb.mxu1 %v2771_v3  ;;  %5579 = vmatmul.msk.f32.vlgmr.msrb.gmra.mxu0 %vm1053_vm10, %v2733_v2  ;;  %v2968_v15 = vsel %vm1240_vm2, %v6110_v49, %v6254_v36  ;;  %v10433_v3 = vunpack.i.h.bf16 %v8875_v44  ;;  %v2164_v49 = vpop.f32.mrf.mxu0 }
 0x54d   : > { %5580 = vmatmul.msk.f32.vlgmr.msrb.gmra.mxu1 %vm1053_vm10, %v2733_v2  ;;  %5581 = vmatmul.msk.f32.vlgmr.msrb.gmra.mxu2 %vm1053_vm10, %v2832_v56 }
 0x54e   : > { %5582 = vmatmul.msk.f32.vlgmr.msrb.gmra.mxu3 %vm1053_vm10, %v2832_v56  ;;  %2999 = vmatpush.msra.mxu0 %v2974_v28  ;;  %v8918_v5 = vpop.permute.xlu2 %6387 }
 0x54f   : > { %3019 = vmatpush.msra.mxu1 %v2975_v8  ;;  %v10432_v55 = vunpack.i.l.bf16 %v8918_v5  ;;  %v8924_v16 = vpop.permute.xlu1 %6347  ;;  %v8953_v18 = vpop.permute.xlu0 %6422 }
 0x550   : > { %3000 = vmatpush.msra.mxu0 %v2972_v41  ;;  %v10435_v53 = vunpack.i.h.bf16 %v8924_v16  ;;  %10603 = vst [vmem:[#allocation49_spill] sm:$0xff] %v8953_v18  ;;  %v10429_v30 = vunpack.i.l.bf16 %v8953_v18 }
 0x551   : > { %3020 = vmatpush.msra.mxu1 %v2973_v24  ;;  %v8937_v48 = vsel %vm838_vm15, %v6305_v37, %v10432_v55 }
 0x552   : > { %3001 = vmatpush.msra.mxu0 %v2970_v14  ;;  %v8943_v21 = vsel %vm657_vm12, %v10435_v53, %v6354_v52  ;;  %v2184_v14 = vpop.f32.mrf.mxu1 }
 0x553   : > { %3021 = vmatpush.msra.mxu1 %v2971_v60 }
 0x554   : > { %3002 = vmatpush.msra.mxu0 %v2968_v15 }
 0x555   : > { %3022 = vmatpush.msra.mxu1 %v2969_v40  ;;  %5583 = vmatmul.msk.f32.vlgmr.msra.gmra.mxu0 %vm1053_vm10, %v2931_v22 }
 0x556   : > { %5584 = vmatmul.msk.f32.vlgmr.msra.gmra.mxu1 %vm1053_vm10, %v2931_v22  ;;  %v8949_v10 = vpop.permute.xlu2 %6402 }
 0x557   : > { %v8951_v59 = vpop.permute.xlu1 %6362  ;;  %v8963_v9 = vpop.permute.xlu0 %6442  ;;  %v10434_v28 = vunpack.i.l.bf16 %v8949_v10 }
 0x558   : > { %10605 = vst [vmem:[#allocation62_spill] sm:$0xff] %v8963_v9  ;;  %v6444_v39 = vunpack.i.l.bf16 %v8963_v9 }
 0x55e   : > { %v6418_v46 = vpop.permute.xlu2 %6417 }
 0x55f   : > { %v6420_v25 = vunpack.i.h.bf16 %v6418_v46  ;;  %v8956_v23 = vpop.permute.xlu1 %6367  ;;  %v6419_v36 = vunpack.i.l.bf16 %v6418_v46 }
 0x561   : > { %v8961_v17 = vsel %vm906_vm13, %v6420_v25, %v10429_v30  ;;  %v10616_v25 = vld [vmem:[#allocation38_spill] sm:$0xff] }
 0x562   : > { %10604 = vst [vmem:[#allocation61_spill] sm:$0xff] %v8961_v17  ;;  %v2188_v32 = vadd.f32 %v2184_v14, %v10616_v25 }
 0x566   : > { %v8965_v27 = vpop.permute.xlu2 %6437 }
 0x567   : > { %10606 = vst [vmem:[#allocation63_spill] sm:$0xff] %v8965_v27  ;;  %v10427_v54 = vunpack.i.h.bf16 %v8965_v27  ;;  %v8969_v58 = vpop.permute.xlu1 %6382 }
 0x568   : > { %v10431_v2 = vunpack.i.l.bf16 %v8969_v58 }
 0x569   : > { %v8976_v1 = vsel %vm995_vm0, %v10427_v54, %v6444_v39  ;;  %v2187_v39 = vadd.f32 %v2164_v49, %v10616_v25 }
 0x56a   : > { %10607 = vst [vmem:[#allocation64_spill] sm:$0xff] %v8976_v1  ;;  %v8981_v45 = vsel %vm748_vm11, %v6380_v12, %v10431_v2  ;;  %v3074_v1 = vld [vmem:[#allocation11] sm:$0xff] }
 0x56b   : > { %10608 = vst [vmem:[#allocation65_spill] sm:$0xff] %v8981_v45 }
 0x56e   : > { %v8983_v56 = vpop.permute.xlu2 %6452 }
 0x56f   : > { %10609 = vst [vmem:[#allocation66_spill] sm:$0xff] %v8983_v56  ;;  %v6398_v51 = vpop.permute.xlu1 %6397  ;;  %v10425_v8 = vunpack.i.l.bf16 %v8983_v56 }
 0x570   : > { %v6400_v50 = vunpack.i.h.bf16 %v6398_v51  ;;  %v6399_v6 = vunpack.i.l.bf16 %v6398_v51 }
 0x571   : > { %v9002_v35 = vsel %vm1084_vm14, %v6315_v34, %v10425_v8 }
 0x572   : > { %v8991_v62 = vsel %vm838_vm15, %v6400_v50, %v10434_v28  ;;  %v8996_v61 = vsel %vm838_vm15, %v10433_v3, %v6399_v6  ;;  %10610 = vst [vmem:[#allocation67_spill] sm:$0xff] %v9002_v35 }
 0x577   : > { %v9004_v7 = vpop.permute.xlu1 %6412 }
 0x578   : > { %10611 = vst [vmem:[#allocation68_spill] sm:$0xff] %v9004_v7  ;;  %v10428_v37 = vunpack.i.h.bf16 %v9004_v7 }
 0x57a   : > { %v9010_v41 = vsel %vm906_vm13, %v10428_v37, %v6419_v36 }
 0x57b   : > { %10612 = vst [vmem:[#allocation69_spill] sm:$0xff] %v9010_v41 }
 0x57f   : > { %v9012_v0 = vpop.permute.xlu1 %6427 }
 0x580   : > { %10613 = vst [vmem:[#allocation70_spill] sm:$0xff] %v9012_v0 }
 0x588   : > { %v9014_v52 = vpop.permute.xlu1 %6432 }
 0x589   : > { %10614 = vst [vmem:[#allocation71_spill] sm:$0xff] %v9014_v52  ;;  %v10426_v24 = vunpack.i.l.bf16 %v9014_v52 }
 0x58b   : > { %v9021_v26 = vsel %vm995_vm0, %v6310_v38, %v10426_v24 }
 0x58c   : > { %10615 = vst [vmem:[#allocation72_spill] sm:$0xff] %v9021_v26  ;;  %v9110_v26 = vld [vmem:[#allocation2 + $0x18] sm:$0xff] }
 0x59d   : > { %v2275_v60 = vpop.f32.mrf.mxu2  ;;  %v2295_v22 = vpop.f32.mrf.mxu3 }
 0x59e   : > { %v2298_v6 = vadd.f32 %v2275_v60, %v2187_v39  ;;  %v2299_v34 = vadd.f32 %v2295_v22, %v2188_v32  ;;  %v10622_v32 = vld [vmem:[#allocation39_spill] sm:$0xff] }
 0x5af   : > { %v2386_v15 = vpop.f32.mrf.mxu0  ;;  %v2406_v40 = vpop.f32.mrf.mxu1 }
 0x5b0   : > { %v2409_v36 = vadd.f32 %v2386_v15, %v2298_v6  ;;  %v2410_v8 = vadd.f32 %v2406_v40, %v2299_v34  ;;  %v9050_v6 = vpop.permute.xlu2 %6462 }
 0x5bb   : > { %v2584_v51 = vpop.f32.mrf.mxu0 }
 0x5bc   : > { %v2604_v50 = vpop.f32.mrf.mxu1 }
 0x5be   : > { %v2497_v46 = vpop.f32.mrf.mxu2 }
 0x5bf   : > { %v2517_v12 = vpop.f32.mrf.mxu3  ;;  %v2520_v38 = vadd.f32 %v2497_v46, %v2409_v36  ;;  %v9054_v36 = vpop.permute.xlu1 %6447 }
 0x5c0   : > { %v2521_v24 = vadd.f32 %v2517_v12, %v2410_v8  ;;  %10623 = vst [vmem:[#allocation38_spill] sm:$0xff] %v9054_v36 }
 0x5c1   : > { %v2607_v30 = vadd.f32 %v2584_v51, %v2520_v38  ;;  %v9056_v38 = vpop.permute.xlu2 %6472 }
 0x5c2   : > { %v2608_v2 = vadd.f32 %v2604_v50, %v2521_v24  ;;  %v9048_v50 = vpop.permute.xlu0 %6457 }
 0x5c6   : > { %v2695_v54 = vpop.f32.mrf.mxu2 }
 0x5c7   : > { %v2715_v37 = vpop.f32.mrf.mxu3  ;;  %v2718_v3 = vadd.f32 %v2695_v54, %v2607_v30  ;;  %v9034_v54 = vld [vmem:[#allocation2] sm:$0xff] }
 0x5c8   : > { %v2719_v28 = vadd.f32 %v2715_v37, %v2608_v2  ;;  %v10620_v2 = vld [vmem:[#allocation58_spill] sm:$0xff]  ;;  %v10621_v37 = vld [vmem:[#allocation43_spill] sm:$0xff] }
 0x5c9   : > { %v2806_v47 = vpop.f32.mrf.mxu0 }
 0x5ca   : > { %v2826_v55 = vpop.f32.mrf.mxu1  ;;  %v2829_v49 = vadd.f32 %v2806_v47, %v2718_v3  ;;  %v10617_v47 = vld [vmem:[#allocation32_spill] sm:$0xff]  ;;  %v6491_v3 = vpack.i.bf16 %v10620_v2, %v9034_v54  ;;  %v9052_v34 = vpop.permute.xlu0 %6467 }
 0x5cb   : > { %v2830_v53 = vadd.f32 %v2826_v55, %v2719_v28  ;;  %v10618_v55 = vld [vmem:[#allocation57_spill] sm:$0xff]  ;;  %v9038_v28 = vld [vmem:[#allocation2 + $0x10] sm:$0xff] }
 0x5cc   : > { %v3732_v30 = vmul.f32 %v10618_v55, %v10617_v47  ;;  %v6496_v24 = vpack.i.bf16 %v10621_v37, %v9038_v28  ;;  %10624 = vst [vmem:[#allocation57_spill] sm:$0xff] %v9056_v38 }
 0x5d0   : > { %v2893_v13 = vpop.f32.mrf.mxu2 }
 0x5d1   : > { %v2916_v29 = vadd.f32 %v2893_v13, %v2829_v49  ;;  %v2913_v14 = vpop.f32.mrf.mxu3  ;;  %v3731_v13 = vmul.f32 %v8614_v19, %v7695_v11  ;;  %v6991_v19 = vld [vmem:[#allocation2 + $0x48] sm:$0xff] }
 0x5d2   : > { %v2917_v25 = vadd.f32 %v2913_v14, %v2830_v53  ;;  %v3004_v60 = vpop.f32.mrf.mxu0  ;;  %v6511_v51 = vpack.i.bf16 %v6991_v19, %v8643_v31 }
 0x5d3   : > { %v3027_v22 = vadd.f32 %v3004_v60, %v2916_v29  ;;  %v3024_v15 = vpop.f32.mrf.mxu1  ;;  %v6476_v53 = vpack.i.bf16 %v3732_v30, %v3731_v13  ;;  %v10619_v29 = vld [vmem:[#allocation56_spill] sm:$0xff] }
 0x5d4   : > { %v3028_v40 = vadd.f32 %v3024_v15, %v2917_v25  ;;  %v10625_v25 = vld [vmem:[#allocation22_spill] sm:$0xff]  ;;  %v9068_v15 = vpop.permute.xlu2 %6482  ;;  %v9082_v13 = vld [vmem:[#allocation2 + $0x58] sm:$0xff] }
 0x5d5   : > { %vm3029_vm10 = vcmp.ge.f32.partialorder %v3027_v22, 0.0  ;;  %v3031_v8 = vmul.f32 0.2, %v3027_v22 }
 0x5d6   : > { %vm3030_vm3 = vcmp.ge.f32.partialorder %v3028_v40, 0.0  ;;  %v3032_v46 = vmul.f32 0.2, %v3028_v40 }
 0x5d7   : > { %v3033_v39 = vsel %vm3029_vm10, %v3027_v22, %v3031_v8  ;;  %v9066_v22 = vld [vmem:[#allocation2 + $0x38] sm:$0xff] }
 0x5d8   : > { %v3034_v12 = vsel %vm3030_vm3, %v3028_v40, %v3032_v46  ;;  %3037 = vrot.lane.b32.xlu0 %v3033_v39, %s7288_s2  ;;  %v9070_v40 = vld [vmem:[#allocation2 + $0x50] sm:$0xff]  ;;  %v3069_v46 = vmul.f32 %v10625_v25, %v9066_v22  ;;  %v9076_v39 = vld [vmem:[#allocation2 + $0x20] sm:$0xff] }
 0x5d9   : > { %3039 = vrot.lane.b32.xlu1 %v3034_v12, %s7288_s2  ;;  %v3071_v8 = vmul.f32 %v9070_v40, %v10625_v25 }
 0x5dc   : > { %v9131_v38 = vpop.permute.xlu2 %6502 }
 0x5dd   : > { %10633 = vst [vmem:[#allocation58_spill] sm:$0xff] %v9131_v38  ;;  %v10456_v0 = vunpack.i.l.bf16 %v9131_v38 }
 0x5e0   : > { %6487 = vrot.lane.b32.xlu0 %v10619_v29, %s7298_s1  ;;  %v10627_v29 = vld [vmem:[#allocation21_spill] sm:$0xff] }
 0x5e1   : > { %6477 = vrot.lane.b32.xlu1 %v6476_v53, %s7298_s1  ;;  %v3066_v41 = vmul.f32 %v10627_v29, %v9110_v26 }
 0x5e8   : > { %6492 = vrot.lane.b32.xlu0 %v6491_v3, %s7299_s4 }
 0x5e9   : > { %6497 = vrot.lane.b32.xlu1 %v6496_v24, %s7299_s4  ;;  %v9090_v24 = vld [vmem:[#allocation2 + $0x8] sm:$0xff] }
 0x5ea   : > { %v3065_v52 = vmul.f32 %v10625_v25, %v9090_v24 }
 0x5f0   : > { %6507 = vrot.lane.b32.xlu0 %v10622_v32, %s7299_s4 }
 0x5f1   : > { %6512 = vrot.lane.b32.xlu1 %v6511_v51, %s7299_s4  ;;  %v10628_v51 = vld [vmem:[#allocation27_spill] sm:$0xff] }
 0x64a   : > { %v3038_v49 = vpop.permute.xlu0 %3037 }
 0x64b   : > { %v3040_v14 = vpop.permute.xlu1 %3039  ;;  %3045 = vst.msk [vmem:[#allocation2 + $0x60] sm:$0xff] %vm534_vm5, %v3038_v49 }
 0x64c   : > { %3047 = vst.msk [vmem:[#allocation2 + $0x70] sm:$0xff] %vm525_vm6, %v3040_v14  ;;  %v9061_v31 = vsel %vm525_vm6, %v3038_v49, %v3040_v14  ;;  %v9098_v49 = vld [vmem:[#allocation2 + $0x30] sm:$0xff]  ;;  %v3067_v14 = vmul.f32 %v10625_v25, %v9076_v39 }
 0x64d   : > { %3046 = vst [vmem:[#allocation2 + $0x68] sm:$0xff] %v9061_v31  ;;  %v3073_v60 = vmul.f32 %v10625_v25, %v9061_v31  ;;  %v3068_v27 = vmul.f32 %v10627_v29, %v9098_v49 }
 0x64f   : > { %3110 = vmatpush.msra.mxu3 %v3073_v60  ;;  %v9103_v60 = vld [vmem:[#allocation2 + $0x48] sm:$0xff] }
 0x651   : > { %3111 = vmatpush.msra.mxu3 %v3071_v8  ;;  %v3070_v8 = vmul.f32 %v9103_v60, %v10627_v29 }
 0x652   : > { %v9078_v12 = vpop.permute.xlu0 %6487  ;;  %v9080_v55 = vld [vmem:[#allocation2 + $0x60] sm:$0xff] }
 0x653   : > { %10626 = vst [vmem:[#allocation56_spill] sm:$0xff] %v9078_v12  ;;  %v6478_v30 = vpop.permute.xlu1 %6477  ;;  %v6521_v53 = vpack.i.bf16 %v9080_v55, %v9082_v13  ;;  %v3072_v3 = vmul.f32 %v10627_v29, %v9080_v55  ;;  %v9088_v37 = vld [vmem:[#allocation2 + $0x70] sm:$0xff]  ;;  %3112 = vmatpush.msra.mxu3 %v3069_v46  ;;  %v9096_v32 = vmul.f32 %v10628_v51, %v9080_v55  ;;  %v10629_v46 = vld [vmem:[#allocation40_spill] sm:$0xff] }
 0x654   : > { %v6531_v19 = vpack.i.bf16 %v9088_v37, %v9061_v31  ;;  %v6480_v9 = vunpack.i.h.bf16 %v6478_v30  ;;  %v10632_v12 = vld [vmem:[#allocation28_spill] sm:$0xff]  ;;  %v3738_v17 = vmul.f32 %v10617_v47, %v9080_v55  ;;  %v10635_v47 = vunpack.i.l.bf16 %v9068_v15 }
 0x655   : > { %6522 = vrot.lane.b32.xlu2 %v6521_v53, %s7293_s16  ;;  %3090 = vmatpush.msra.mxu2 %v3072_v3  ;;  %v6551_v35 = vpack.i.bf16 %v9096_v32, %v10629_v46  ;;  %v10630_v3 = vld [vmem:[#allocation24_spill] sm:$0xff]  ;;  %v9121_v46 = vld [vmem:[#allocation2] sm:$0xff]  ;;  %v9129_v25 = vmul.f32 %v9061_v31, %v10632_v12 }
 0x656   : > { %6532 = vrot.lane.b32.xlu0 %v6531_v19, %s7293_s16  ;;  %3113 = vmatpush.msra.mxu3 %v3067_v14  ;;  %v9116_v56 = vmul.f32 %v10630_v3, %v9080_v55  ;;  %v10631_v14 = vld [vmem:[#allocation29_spill] sm:$0xff]  ;;  %v9153_v4 = vsel %vm1084_vm14, %v6480_v9, %v10635_v47 }
 0x657   : > { %3091 = vmatpush.msra.mxu2 %v3070_v8  ;;  %6552 = vrot.lane.b32.xlu1 %v6551_v35, %s7297_s21  ;;  %v9125_v36 = vmul.f32 %v9061_v31, %v10631_v14  ;;  %v6479_v8 = vunpack.i.l.bf16 %v6478_v30  ;;  %v3064_v35 = vmul.f32 %v10627_v29, %v9121_v46 }
 0x658   : > { %3114 = vmatpush.msra.mxu3 %v3065_v52 }
 0x659   : > { %3092 = vmatpush.msra.mxu2 %v3068_v27  ;;  %5586 = vmatmul.msk.f32.vlgmr.msra.gmra.mxu3 %vm3075_vm4, %v3074_v1  ;;  %v10457_v27 = vunpack.i.h.bf16 %v9048_v50 }
 0x65a   : > { %v9137_v52 = vpop.permute.xlu0 %6492 }
 0x65b   : > { %10634 = vst [vmem:[#allocation43_spill] sm:$0xff] %v9137_v52  ;;  %v6498_v30 = vpop.permute.xlu1 %6497  ;;  %3093 = vmatpush.msra.mxu2 %v3066_v41  ;;  %v9159_v7 = vsel %vm1084_vm14, %v10457_v27, %v6479_v8  ;;  %v10636_v41 = vld [vmem:[#allocation45_spill] sm:$0xff]  ;;  %v10638_v9 = vunpack.i.h.bf16 %v9137_v52  ;;  %v10647_v52 = vld [vmem:[#allocation34_spill] sm:$0xff] }
 0x65c   : > { %v6500_v33 = vunpack.i.h.bf16 %v6498_v30  ;;  %v6499_v45 = vunpack.i.l.bf16 %v6498_v30  ;;  %v6561_v18 = vpack.i.bf16 %v3738_v17, %v10636_v41  ;;  %v10643_v17 = vld [vmem:[#allocation23_spill] sm:$0xff]  ;;  %v3964_v38 = vmul.f32 %v10647_v52, %v9088_v37 }
 0x65d   : > { %6527 = vrot.lane.b32.xlu2 %v6521_v53, %s7294_s3  ;;  %3094 = vmatpush.msra.mxu2 %v3064_v35  ;;  %v10640_v53 = vld [vmem:[#allocation35_spill] sm:$0xff]  ;;  %v10641_v35 = vld [vmem:[#allocation36_spill] sm:$0xff]  ;;  %v3262_v41 = vmul.f32 %v10643_v17, %v9088_v37 }
 0x65e   : > { %5585 = vmatmul.msk.f32.vlgmr.msra.gmra.mxu2 %vm3075_vm4, %v3074_v1  ;;  %6537 = vrot.lane.b32.xlu0 %v6531_v19, %s7294_s3  ;;  %v9167_v30 = vsel %vm1152_vm1, %v6500_v33, %v10456_v0  ;;  %v9172_v47 = vsel %vm1152_vm1, %v10638_v9, %v6499_v45  ;;  %v3950_v8 = vmul.f32 %v9034_v54, %v10640_v53  ;;  %v10645_v9 = vld [vmem:[#allocation26_spill] sm:$0xff] }
 0x65f   : > { %10637 = vst [vmem:[#allocation39_spill] sm:$0xff] %v9167_v30  ;;  %v3951_v1 = vmul.f32 %v10620_v2, %v10641_v35  ;;  %6562 = vrot.lane.b32.xlu1 %v6561_v18, %s7298_s1  ;;  %v9189_v54 = vpack.i.bf16 %v9061_v31, %v9080_v55  ;;  %v6566_v18 = vpack.i.bf16 %v3262_v41, %v9125_v36 }
 0x660   : > { %10639 = vst [vmem:[#allocation27_spill] sm:$0xff] %v9172_v47  ;;  %v3740_v41 = vmul.f32 %v7695_v11, %v9088_v37  ;;  %v6995_v47 = vld [vmem:[#allocation2 + $0x20] sm:$0xff] }
 0x661   : > { %v6571_v27 = vpack.i.bf16 %v3951_v1, %v3950_v8  ;;  %v3389_v8 = vmul.f32 %v10645_v9, %v9088_v37  ;;  %v3259_v1 = vmul.f32 %v9082_v13, %v10643_v17  ;;  %v3954_v30 = vmul.f32 %v6995_v47, %v10641_v35 }
 0x662   : > { %v9179_v19 = vpop.permute.xlu0 %6507  ;;  %v3613_v47 = vmul.f32 %v7598_v42, %v9088_v37 }
 0x663   : > { %10642 = vst [vmem:[#allocation40_spill] sm:$0xff] %v9179_v19  ;;  %v9183_v33 = vpop.permute.xlu1 %6512  ;;  %v10459_v0 = vunpack.i.h.bf16 %v9179_v19  ;;  %v6546_v29 = vpack.i.bf16 %v9116_v56, %v3259_v1  ;;  %v3962_v1 = vmul.f32 %v10640_v53, %v9080_v55  ;;  %v6996_v19 = vld [vmem:[#allocation2 + $0x18] sm:$0xff] }
 0x664   : > { %v6514_v45 = vunpack.i.l.bf16 %v9183_v33 }
 0x665   : > { %6572 = vrot.lane.b32.xlu2 %v6571_v27, %s7301_s12  ;;  %v6591_v27 = vpack.i.bf16 %v3389_v8, %v9129_v25  ;;  %v3610_v8 = vmul.f32 %v9082_v13, %v7598_v42 }
 0x666   : > { %6542 = vrot.lane.b32.xlu0 %v9189_v54, %s7299_s4  ;;  %v9198_v2 = vsel %vm1152_vm1, %v10459_v0, %v6514_v45  ;;  %v10646_v45 = vld [vmem:[#allocation25_spill] sm:$0xff]  ;;  %v3739_v0 = vmul.f32 %v9061_v31, %v7717_v20  ;;  %v3952_v20 = vmul.f32 %v9038_v28, %v10647_v52  ;;  %v6997_v28 = vld [vmem:[#allocation2 + $0x38] sm:$0xff] }
 0x667   : > { %10644 = vst [vmem:[#allocation24_spill] sm:$0xff] %v9198_v2  ;;  %6567 = vrot.lane.b32.xlu1 %v6566_v18, %s7295_s23  ;;  %v3611_v18 = vmul.f32 %v10646_v45, %v9080_v55  ;;  %v6581_v2 = vpack.i.bf16 %v3962_v1, %v3954_v30  ;;  %v3963_v55 = vmul.f32 %v9061_v31, %v10641_v35  ;;  %v10648_v30 = vld [vmem:[#allocation30_spill] sm:$0xff] }
 0x668   : > { %v3957_v1 = vmul.f32 %v6997_v28, %v10641_v35  ;;  %v9320_v35 = vpop.permute.xlu2 %6517 }
 0x66d   : > { %6592 = vrot.lane.b32.xlu2 %v6591_v27, %s7297_s21  ;;  %v6606_v27 = vpack.i.bf16 %v3740_v41, %v3739_v0  ;;  %v3953_v0 = vmul.f32 %v6996_v19, %v10640_v53  ;;  %v6611_v41 = vpack.i.bf16 %v3964_v38, %v3963_v55  ;;  %v6998_v19 = vld [vmem:[#allocation2 + $0x40] sm:$0xff]  ;;  %v3961_v38 = vmul.f32 %v9082_v13, %v10647_v52  ;;  %v4097_v13 = vld [vmem:[%s10348_s10 + $0x8] sm:$0xff] }
 0x66e   : > { %6547 = vrot.lane.b32.xlu0 %v6546_v29, %s7295_s23  ;;  %v6556_v29 = vpack.i.bf16 %v3611_v18, %v3610_v8  ;;  %v3612_v8 = vmul.f32 %v9061_v31, %v10648_v30  ;;  %v9250_v55 = vpack.i.bf16 %v9090_v24, %v9121_v46 }
 0x66f   : > { %3883 = vrot.lane.b32.xlu1 %v9088_v37, %s7299_s4  ;;  %v6576_v18 = vpack.i.bf16 %v3953_v0, %v3952_v20  ;;  %v6999_v37 = vld [vmem:[#allocation2 + $0x30] sm:$0xff] }
 0x670   : > { %v3956_v31 = vmul.f32 %v6999_v37, %v10640_v53  ;;  %v4346_v37 = vmul.f32 %v10630_v3, %v9121_v46 }
 0x672   : > { %v6601_v0 = vpack.i.bf16 %v3956_v31, %v3961_v38  ;;  %v4350_v31 = vmul.f32 %v9076_v39, %v10631_v14 }
 0x675   : > { %6607 = vrot.lane.b32.xlu2 %v6606_v27, %s7298_s1  ;;  %v3958_v27 = vmul.f32 %v6998_v19, %v10647_v52  ;;  %v9278_v19 = vld [vmem:[#allocation2 + $0x58] sm:$0xff] }
 0x676   : > { %6557 = vrot.lane.b32.xlu0 %v6556_v29, %s7296_s26  ;;  %v10649_v29 = vld [vmem:[#allocation42_spill] sm:$0xff]  ;;  %v9290_v38 = vpack.i.bf16 %v9278_v19, %v9070_v40 }
 0x677   : > { %6582 = vrot.lane.b32.xlu1 %v6581_v2, %s7301_s12  ;;  %v6596_v2 = vpack.i.bf16 %v3613_v47, %v3612_v8  ;;  %v6616_v20 = vpack.i.bf16 %v3958_v27, %v3957_v1  ;;  %v7000_v47 = vld [vmem:[#allocation2 + $0x28] sm:$0xff]  ;;  %v4096_v8 = vld [vmem:[%s10348_s10] sm:$0xff]  ;;  %v9276_v1 = vld [vmem:[#allocation2 + $0x10] sm:$0xff] }
 0x678   : > { %v9282_v27 = vpack.i.bf16 %v9110_v26, %v9276_v1  ;;  %10651 = vst [vmem:[#allocation45_spill] sm:$0xff] %v9290_v38 }
 0x67d   : > { %6612 = vrot.lane.b32.xlu2 %v6611_v41, %s7301_s12  ;;  %v3955_v41 = vmul.f32 %v7000_v47, %v10647_v52  ;;  %v4501_v52 = vmul.f32 %v10628_v51, %v9121_v46 }
 0x67e   : > { %6577 = vrot.lane.b32.xlu0 %v6576_v18, %s7301_s12  ;;  %v9261_v18 = vpack.i.bf16 %v9066_v22, %v9098_v49 }
 0x67f   : > { %6597 = vrot.lane.b32.xlu1 %v6596_v2, %s7296_s26  ;;  %v9266_v2 = vld [vmem:[#allocation2 + $0x28] sm:$0xff] }
 0x680   : > { %10650 = vst [vmem:[#allocation28_spill] sm:$0xff] %v9261_v18  ;;  %v9272_v28 = vpack.i.bf16 %v9266_v2, %v9076_v39 }
 0x685   : > { %6617 = vrot.lane.b32.xlu2 %v6616_v20, %s7301_s12  ;;  %v4347_v20 = vmul.f32 %v9090_v24, %v10631_v14 }
 0x686   : > { %6587 = vrot.lane.b32.xlu0 %v10649_v29, %s7301_s12 }
 0x687   : > { %6602 = vrot.lane.b32.xlu1 %v6601_v0, %s7301_s12  ;;  %v6657_v29 = vpack.i.bf16 %v4347_v20, %v4346_v37  ;;  %v9302_v0 = vld [vmem:[#allocation2 + $0x40] sm:$0xff]  ;;  %v4348_v20 = vmul.f32 %v10643_v17, %v9276_v1  ;;  %v4349_v37 = vmul.f32 %v10630_v3, %v9110_v26 }
 0x688   : > { %v9306_v47 = vpack.i.bf16 %v9103_v60, %v9302_v0 }
 0x689   : > { %v6662_v53 = vpack.i.bf16 %v4349_v37, %v4348_v20 }
 0x68d   : > { %6623 = vrot.lane.b32.xlu2 %v9250_v55, %s7293_s16 }
 0x68e   : > { %3992 = vrot.lane.b32.xlu0 %v3955_v41, %s7301_s12 }
 0x68f   : > { %4105 = vperm.xlu1 %6621, %v4097_v13   ;;  %v4352_v13 = vmul.f32 %v10630_v3, %v9098_v49 }
 0x695   : > { %6638 = vrot.lane.b32.xlu2 %v9261_v18, %s7293_s16 }
 0x696   : > { %4100 = vperm.xlu0 %5910, %v4096_v8   ;;  %v4353_v8 = vmul.f32 %v9066_v22, %v10631_v14 }
 0x697   : > { %6633 = vrot.lane.b32.xlu1 %v9272_v28, %s7293_s16 }
 0x69d   : > { %6653 = vrot.lane.b32.xlu2 %v9189_v54, %s7293_s16  ;;  %v4351_v54 = vmul.f32 %v10643_v17, %v9266_v2 }
 0x69e   : > { %6628 = vrot.lane.b32.xlu0 %v9282_v27, %s7293_s16 }
 0x69f   : > { %6648 = vrot.lane.b32.xlu1 %v9290_v38, %s7293_s16  ;;  %v6667_v41 = vpack.i.bf16 %v4351_v54, %v4350_v31  ;;  %v4357_v31 = vmul.f32 %v10643_v17, %v9278_v19  ;;  %v6672_v54 = vpack.i.bf16 %v4353_v8, %v4352_v13  ;;  %v4502_v38 = vmul.f32 %v9090_v24, %v10632_v12 }
 0x6a0   : > { %v4354_v13 = vmul.f32 %v10643_v17, %v9302_v0  ;;  %v4505_v8 = vmul.f32 %v9076_v39, %v10632_v12  ;;  %v4503_v39 = vmul.f32 %v10645_v9, %v9276_v1 }
 0x6a1   : > { %v6687_v20 = vpack.i.bf16 %v4502_v38, %v4501_v52  ;;  %v4504_v52 = vmul.f32 %v10628_v51, %v9110_v26  ;;  %v4512_v38 = vmul.f32 %v10645_v9, %v9278_v19  ;;  %v4510_v26 = vmul.f32 %v9103_v60, %v10628_v51 }
 0x6a5   : > { %6658 = vrot.lane.b32.xlu2 %v6657_v29, %s7295_s23  ;;  %v4356_v29 = vmul.f32 %v9070_v40, %v10631_v14  ;;  %v4355_v14 = vmul.f32 %v9103_v60, %v10630_v3 }
 0x6a6   : > { %6643 = vrot.lane.b32.xlu0 %v9306_v47, %s7293_s16 }
 0x6a7   : > { %6668 = vrot.lane.b32.xlu1 %v6667_v41, %s7295_s23  ;;  %v6682_v41 = vpack.i.bf16 %v4357_v31, %v4356_v29  ;;  %v6677_v37 = vpack.i.bf16 %v4355_v14, %v4354_v13  ;;  %v4507_v31 = vmul.f32 %v10628_v51, %v9098_v49  ;;  %v4511_v14 = vmul.f32 %v9070_v40, %v10632_v12 }
 0x6a8   : > { %v4509_v40 = vmul.f32 %v10645_v9, %v9302_v0 }
 0x6ad   : > { %6673 = vrot.lane.b32.xlu2 %v6672_v54, %s7295_s23  ;;  %v4508_v54 = vmul.f32 %v9066_v22, %v10632_v12  ;;  %v6712_v22 = vpack.i.bf16 %v4512_v38, %v4511_v14 }
 0x6ae   : > { %6663 = vrot.lane.b32.xlu0 %v6662_v53, %s7295_s23  ;;  %v4506_v53 = vmul.f32 %v10645_v9, %v9266_v2 }
 0x6af   : > { %6683 = vrot.lane.b32.xlu1 %v6682_v41, %s7295_s23  ;;  %v6523_v18 = vpop.permute.xlu2 %6522  ;;  %v6702_v13 = vpack.i.bf16 %v4508_v54, %v4507_v31  ;;  %v6364_v31 = vunpack.i.l.bf16 %v8951_v59 }
 0x6b0   : > { %v6697_v29 = vpack.i.bf16 %v4506_v53, %v4505_v8  ;;  %v6692_v8 = vpack.i.bf16 %v4504_v52, %v4503_v39  ;;  %v6707_v53 = vpack.i.bf16 %v4510_v26, %v4509_v40  ;;  %v6525_v60 = vunpack.i.h.bf16 %v6523_v18 }
 0x6b1   : > { %v6524_v52 = vunpack.i.l.bf16 %v6523_v18 }
 0x6b5   : > { %6688 = vrot.lane.b32.xlu2 %v6687_v20, %s7297_s21 }
 0x6b6   : > { %6678 = vrot.lane.b32.xlu0 %v6677_v37, %s7295_s23  ;;  %v6365_v37 = vunpack.i.h.bf16 %v8951_v59 }
 0x6b7   : > { %6698 = vrot.lane.b32.xlu1 %v6697_v29, %s7297_s21  ;;  %v9356_v41 = vpop.permute.xlu2 %6527 }
 0x6b8   : > { %v3189_v59 = vsel %vm657_vm12, %v6364_v31, %v6365_v37  ;;  %v3190_v18 = vsel %vm657_vm12, %v6365_v37, %v6524_v52 }
 0x6bd   : > { %6703 = vrot.lane.b32.xlu2 %v6702_v13, %s7297_s21 }
 0x6be   : > { %6693 = vrot.lane.b32.xlu0 %v6692_v8, %s7297_s21  ;;  %v6349_v8 = vunpack.i.l.bf16 %v8924_v16 }
 0x6bf   : > { %6713 = vrot.lane.b32.xlu1 %v6712_v22, %s7297_s21  ;;  %v9365_v20 = vpop.permute.xlu2 %6572  ;;  %v10653_v22 = vld [vmem:[#allocation31_spill] sm:$0xff] }
 0x6c0   : > { %v6275_v26 = vunpack.i.h.bf16 %v10653_v22  ;;  %v6390_v22 = vunpack.i.h.bf16 %v8918_v5 }
 0x6c5   : > { %6718 = vrot.lane.b32.xlu2 %v9250_v55, %s7294_s3  ;;  %v6360_v55 = vunpack.i.h.bf16 %v8780_v57 }
 0x6c6   : > { %6708 = vrot.lane.b32.xlu0 %v6707_v53, %s7297_s21  ;;  %v10654_v53 = vld [vmem:[#allocation46_spill] sm:$0xff] }
 0x6c7   : > { %6728 = vrot.lane.b32.xlu1 %v9272_v28, %s7294_s3  ;;  %v10652_v28 = vpack.i.bf16 %v9125_v36, %v9116_v56  ;;  %v6593_v40 = vpop.permute.xlu2 %6592  ;;  %v10655_v56 = vunpack.i.l.bf16 %v8780_v57  ;;  %v6470_v57 = vunpack.i.h.bf16 %v9052_v34 }
 0x6c8   : > { %v6533_v29 = vpop.permute.xlu0 %6532  ;;  %v6595_v31 = vunpack.i.h.bf16 %v6593_v40 }
 0x6c9   : > { %v6535_v54 = vunpack.i.h.bf16 %v6533_v29  ;;  %v6534_v39 = vunpack.i.l.bf16 %v6533_v29  ;;  %v6553_v14 = vpop.permute.xlu1 %6552  ;;  %v6345_v29 = vunpack.i.h.bf16 %v10654_v53  ;;  %v3188_v36 = vsel %vm657_vm12, %v10655_v56, %v6360_v55 }
 0x6ca   : > { %v6555_v52 = vunpack.i.h.bf16 %v6553_v14  ;;  %v6469_v55 = vunpack.i.l.bf16 %v9052_v34  ;;  %v10659_v56 = vunpack.i.h.bf16 %v8875_v44 }
 0x6cb   : > { %v3191_v38 = vsel %vm657_vm12, %v6525_v60, %v6534_v39  ;;  %v3192_v13 = vsel %vm657_vm12, %v6534_v39, %v6535_v54  ;;  %v6344_v60 = vunpack.i.l.bf16 %v10654_v53  ;;  %v6594_v39 = vunpack.i.l.bf16 %v6593_v40 }
 0x6cc   : > { %3217 = vmatpush.msrb.mxu0 %v3191_v38  ;;  %3237 = vmatpush.msrb.mxu1 %v3192_v13  ;;  %v10658_v40 = vunpack.i.l.bf16 %v8949_v10 }
 0x6cd   : > { %6733 = vrot.lane.b32.xlu2 %v10652_v28, %s7295_s23  ;;  %v3183_v13 = vsel %vm657_vm12, %v6275_v26, %v6344_v60  ;;  %v6554_v28 = vunpack.i.l.bf16 %v6553_v14  ;;  %v3446_v34 = vsel %vm838_vm15, %v6594_v39, %v6595_v31  ;;  %v6394_v14 = vunpack.i.l.bf16 %v8875_v44 }
 0x6ce   : > { %6723 = vrot.lane.b32.xlu0 %v9282_v27, %s7294_s3  ;;  %3218 = vmatpush.msrb.mxu0 %v3189_v59  ;;  %v10656_v27 = vunpack.i.h.bf16 %v8924_v16  ;;  %v3184_v16 = vsel %vm657_vm12, %v6344_v60, %v6345_v29  ;;  %v6405_v59 = vunpack.i.h.bf16 %v8949_v10  ;;  %v4786_v29 = vmul.f32 %v7598_v42, %v9278_v19 }
 0x6cf   : > { %3238 = vmatpush.msrb.mxu1 %v3190_v18  ;;  %v9435_v31 = vpop.permute.xlu2 %6607  ;;  %v6385_v44 = vunpack.i.h.bf16 %v8969_v58 }
 0x6d0   : > { %v9389_v54 = vpop.permute.xlu0 %6537  ;;  %3219 = vmatpush.msrb.mxu0 %v8852_v43  ;;  %v3185_v37 = vsel %vm657_vm12, %v6349_v8, %v10656_v27  ;;  %v3137_v43 = vld [vmem:[#allocation11 + $0x8] sm:$0xff]  ;;  %v10657_v8 = vpack.i.bf16 %v9129_v25, %v9096_v32  ;;  %v3443_v25 = vsel %vm838_vm15, %v6469_v55, %v6470_v57  ;;  %v3444_v32 = vsel %vm838_vm15, %v6470_v57, %v6554_v28 }
 0x6d1   : > { %3239 = vmatpush.msrb.mxu1 %v3188_v36  ;;  %v9398_v38 = vpop.permute.xlu1 %6562  ;;  %v3442_v53 = vsel %vm838_vm15, %v10658_v40, %v6405_v59  ;;  %v3439_v36 = vsel %vm838_vm15, %v6394_v14, %v10659_v56  ;;  %v4781_v27 = vmul.f32 %v10646_v45, %v9098_v49  ;;  %v4780_v28 = vmul.f32 %v7598_v42, %v9266_v2 }
 0x6d2   : > { %3220 = vmatpush.msrb.mxu0 %v3185_v37  ;;  %v3391_v37 = vld [vmem:[#allocation11 + $0x18] sm:$0xff]  ;;  %v6370_v14 = vunpack.i.h.bf16 %v8956_v23 }
 0x6d3   : > { %3240 = vmatpush.msrb.mxu1 %v8943_v21  ;;  %v3445_v21 = vsel %vm838_vm15, %v6555_v52, %v6594_v39  ;;  %v10660_v39 = vunpack.i.l.bf16 %v8918_v5  ;;  %v6772_v52 = vpack.i.bf16 %v4781_v27, %v4786_v29  ;;  %v10663_v29 = vld [vmem:[#allocation60_spill] sm:$0xff]  ;;  %v6529_v27 = vunpack.i.l.bf16 %v9356_v41 }
 0x6d4   : > { %3221 = vmatpush.msrb.mxu0 %v3183_v13 }
 0x6d5   : > { %3241 = vmatpush.msrb.mxu1 %v3184_v16  ;;  %6738 = vrot.lane.b32.xlu2 %v10657_v8, %s7297_s21 }
 0x6d6   : > { %5587 = vmatmul.msk.f32.vlgmr.msrb.gmra.mxu0 %vm3075_vm4, %v3137_v43  ;;  %5588 = vmatmul.msk.f32.vlgmr.msrb.gmra.mxu1 %vm3075_vm4, %v3137_v43  ;;  %v6464_v43 = vunpack.i.l.bf16 %v9050_v6 }
 0x6d7   : > { %3471 = vmatpush.msra.mxu0 %v3445_v21  ;;  %3491 = vmatpush.msra.mxu1 %v3446_v34  ;;  %v10661_v21 = vunpack.i.l.bf16 %v8969_v58  ;;  %v9464_v40 = vpop.permute.xlu2 %6612  ;;  %v10662_v58 = vld [vmem:[#allocation65_spill] sm:$0xff] }
 0x6d8   : > { %6748 = vrot.lane.b32.xlu0 %v9306_v47, %s7294_s3  ;;  %v9419_v18 = vpop.permute.xlu0 %6542 }
 0x6d9   : > { %3472 = vmatpush.msra.mxu0 %v3443_v25  ;;  %3492 = vmatpush.msra.mxu1 %v3444_v32  ;;  %v6568_v26 = vpop.permute.xlu1 %6567  ;;  %v3315_v34 = vsel %vm748_vm11, %v10661_v21, %v6385_v44  ;;  %v6369_v25 = vunpack.i.l.bf16 %v8956_v23  ;;  %v10665_v23 = vunpack.i.h.bf16 %v8879_v63  ;;  %v6530_v44 = vunpack.i.h.bf16 %v9356_v41 }
 0x6da   : > { %v6570_v60 = vunpack.i.h.bf16 %v6568_v26  ;;  %v6569_v47 = vunpack.i.l.bf16 %v6568_v26  ;;  %v6539_v26 = vunpack.i.l.bf16 %v9389_v54  ;;  %v4941_v41 = vmul.f32 %v7695_v11, %v9278_v19  ;;  %v10671_v19 = vld [vmem:[#allocation32_spill] sm:$0xff] }
 0x6db   : > { %3473 = vmatpush.msra.mxu0 %v8991_v62  ;;  %3493 = vmatpush.msra.mxu1 %v3442_v53  ;;  %v3438_v62 = vsel %vm838_vm15, %v10660_v39, %v6390_v22  ;;  %v6540_v22 = vunpack.i.h.bf16 %v9389_v54  ;;  %v4777_v39 = vmul.f32 %v7598_v42, %v9276_v1 }
 0x6dc   : > { %v3319_v10 = vsel %vm748_vm11, %v6569_v47, %v6570_v60  ;;  %v6300_v60 = vunpack.i.h.bf16 %v10663_v29  ;;  %v6610_v29 = vunpack.i.h.bf16 %v9435_v31 }
 0x6dd   : > { %3474 = vmatpush.msra.mxu0 %v3439_v36  ;;  %3494 = vmatpush.msra.mxu1 %v8996_v61  ;;  %v6465_v61 = vunpack.i.h.bf16 %v9050_v6  ;;  %v6374_v6 = vunpack.i.l.bf16 %v8879_v63  ;;  %v3264_v36 = vld [vmem:[#allocation11 + $0x10] sm:$0xff] }
 0x6de   : > { %3364 = vmatpush.msrb.mxu3 %v3319_v10  ;;  %v3311_v10 = vsel %vm748_vm11, %v6369_v25, %v6370_v14 }
 0x6df   : > { %3475 = vmatpush.msra.mxu0 %v8937_v48  ;;  %3495 = vmatpush.msra.mxu1 %v3438_v62  ;;  %v4775_v48 = vmul.f32 %v10646_v45, %v9121_v46  ;;  %v3316_v59 = vsel %vm748_vm11, %v6464_v43, %v6465_v61  ;;  %v3312_v56 = vsel %vm748_vm11, %v6374_v6, %v10665_v23  ;;  %v10666_v62 = vld [vmem:[#allocation70_spill] sm:$0xff] }
 0x6e0   : > { %6773 = vrot.lane.b32.xlu0 %v6772_v52, %s7296_s26  ;;  %v6548_v13 = vpop.permute.xlu0 %6547  ;;  %5592 = vmatmul.msk.f32.vlgmr.msra.gmra.mxu1 %vm3075_vm4, %v3391_v37  ;;  %v6430_v52 = vunpack.i.h.bf16 %v10666_v62  ;;  %v6429_v63 = vunpack.i.l.bf16 %v10666_v62 }
 0x6e1   : > { %v6550_v57 = vunpack.i.h.bf16 %v6548_v13  ;;  %v6549_v55 = vunpack.i.l.bf16 %v6548_v13  ;;  %5591 = vmatmul.msk.f32.vlgmr.msra.gmra.mxu0 %vm3075_vm4, %v3391_v37  ;;  %v9447_v5 = vpop.permute.xlu1 %3883  ;;  %v6787_v32 = vpack.i.bf16 %v4775_v48, %v4780_v28  ;;  %v4776_v37 = vmul.f32 %v9090_v24, %v10648_v30 }
 0x6e2   : > { %v3310_v13 = vsel %vm748_vm11, %v6300_v60, %v6369_v25  ;;  %v3541_v48 = vsel %vm906_vm13, %v6430_v52, %v6529_v27  ;;  %v3540_v6 = vsel %vm906_vm13, %v6429_v63, %v6430_v52  ;;  %v6609_v60 = vunpack.i.l.bf16 %v9435_v31  ;;  %v3503_v52 = vld [vmem:[#allocation11 + $0x20] sm:$0xff]  ;;  %v10676_v63 = vld [vmem:[#allocation57_spill] sm:$0xff] }
 0x6e3   : > { %v3318_v16 = vsel %vm748_vm11, %v6550_v57, %v6569_v47  ;;  %v3317_v8 = vsel %vm748_vm11, %v6465_v61, %v6549_v55  ;;  %v10664_v47 = vld [vmem:[#allocation47_spill] sm:$0xff]  ;;  %v10667_v61 = vld [vmem:[#allocation49_spill] sm:$0xff]  ;;  %v3543_v57 = vsel %vm906_vm13, %v6539_v26, %v6540_v22  ;;  %v3542_v55 = vsel %vm906_vm13, %v6530_v44, %v6539_v26 }
 0x6e4   : > { %3344 = vmatpush.msrb.mxu2 %v3318_v16  ;;  %3365 = vmatpush.msrb.mxu3 %v3317_v8  ;;  %v6425_v43 = vunpack.i.h.bf16 %v10667_v61  ;;  %v6792_v28 = vpack.i.bf16 %v4777_v39, %v4776_v37  ;;  %v10668_v16 = vld [vmem:[#allocation68_spill] sm:$0xff]  ;;  %v10670_v14 = vunpack.i.l.bf16 %v10667_v61  ;;  %v4936_v22 = vmul.f32 %v10671_v19, %v9098_v49  ;;  %v10672_v26 = vld [vmem:[#allocation41_spill] sm:$0xff] }
 0x6e5   : > { %v6414_v8 = vunpack.i.l.bf16 %v10668_v16  ;;  %v10674_v39 = vld [vmem:[#allocation69_spill] sm:$0xff]  ;;  %v10675_v49 = vunpack.i.h.bf16 %v10668_v16  ;;  %v6475_v44 = vunpack.i.h.bf16 %v10676_v63  ;;  %v6564_v31 = vunpack.i.l.bf16 %v9398_v38 }
 0x6e6   : > { %3345 = vmatpush.msrb.mxu2 %v3316_v59  ;;  %3366 = vmatpush.msrb.mxu3 %v3315_v34  ;;  %v10669_v59 = vld [vmem:[#allocation59_spill] sm:$0xff]  ;;  %v3539_v25 = vsel %vm906_vm13, %v10670_v14, %v6425_v43  ;;  %v6474_v43 = vunpack.i.l.bf16 %v10676_v63 }
 0x6e7   : > { %v6410_v21 = vunpack.i.h.bf16 %v10669_v59  ;;  %v6409_v34 = vunpack.i.l.bf16 %v10669_v59  ;;  %v3536_v62 = vsel %vm906_vm13, %v6414_v8, %v10675_v49  ;;  %v10678_v59 = vld [vmem:[#allocation38_spill] sm:$0xff]  ;;  %v6459_v49 = vunpack.i.l.bf16 %v9048_v50 }
 0x6e8   : > { %6788 = vrot.lane.b32.xlu0 %v6787_v32, %s7296_s26  ;;  %v9467_v53 = vpop.permute.xlu0 %6557  ;;  %3346 = vmatpush.msrb.mxu2 %v10662_v58  ;;  %v6280_v58 = vunpack.i.h.bf16 %v10672_v26  ;;  %v10680_v26 = vld [vmem:[#allocation63_spill] sm:$0xff] }
 0x6e9   : > { %3367 = vmatpush.msrb.mxu3 %v10664_v47  ;;  %v9476_v54 = vpop.permute.xlu1 %6582  ;;  %v9510_v47 = vpop.permute.xlu2 %6617  ;;  %v6560_v27 = vunpack.i.h.bf16 %v9467_v53  ;;  %v6559_v8 = vunpack.i.l.bf16 %v9467_v53  ;;  %v10679_v53 = vld [vmem:[#allocation62_spill] sm:$0xff] }
 0x6ea   : > { %3347 = vmatpush.msrb.mxu2 %v3312_v56  ;;  %v10673_v56 = vld [vmem:[#allocation61_spill] sm:$0xff]  ;;  %v3534_v61 = vsel %vm906_vm13, %v6280_v58, %v6409_v34  ;;  %v6439_v58 = vunpack.i.l.bf16 %v10680_v26 }
 0x6eb   : > { %3368 = vmatpush.msrb.mxu3 %v3311_v10 }
 0x6ec   : > { %5590 = vmatmul.msk.f32.vlgmr.msrb.gmra.mxu3 %vm3075_vm4, %v3264_v36  ;;  %3348 = vmatpush.msrb.mxu2 %v3310_v13  ;;  %v3535_v13 = vsel %vm906_vm13, %v6409_v34, %v6410_v21  ;;  %v6449_v21 = vunpack.i.l.bf16 %v10678_v59  ;;  %v6450_v34 = vunpack.i.h.bf16 %v10678_v59 }
 0x6ed   : > { %3588 = vmatpush.msra.mxu3 %v3543_v57  ;;  %5589 = vmatmul.msk.f32.vlgmr.msrb.gmra.mxu2 %vm3075_vm4, %v3264_v36  ;;  %v6807_v36 = vpack.i.bf16 %v4936_v22, %v4941_v41  ;;  %v6565_v57 = vunpack.i.h.bf16 %v9398_v38  ;;  %v10677_v41 = vld [vmem:[#allocation56_spill] sm:$0xff]  ;;  %v6445_v22 = vunpack.i.h.bf16 %v10679_v53 }
 0x6ee   : > { %3568 = vmatpush.msra.mxu2 %v3542_v55  ;;  %v6490_v16 = vunpack.i.h.bf16 %v10677_v41  ;;  %v6489_v38 = vunpack.i.l.bf16 %v10677_v41  ;;  %v6544_v41 = vunpack.i.l.bf16 %v9419_v18 }
 0x6ef   : > { %3589 = vmatpush.msra.mxu3 %v3541_v48 }
 0x6f0   : > { %6793 = vrot.lane.b32.xlu0 %v6792_v28, %s7296_s26  ;;  %3569 = vmatpush.msra.mxu2 %v3540_v6  ;;  %v9503_v32 = vpop.permute.xlu0 %6577  ;;  %v6485_v28 = vunpack.i.h.bf16 %v9068_v15  ;;  %v3797_v6 = vsel %vm1084_vm14, %v6609_v60, %v6610_v29  ;;  %v3795_v14 = vsel %vm1084_vm14, %v6490_v16, %v6564_v31  ;;  %v3796_v29 = vsel %vm1084_vm14, %v6565_v57, %v6609_v60 }
 0x6f1   : > { %3590 = vmatpush.msra.mxu3 %v3539_v25  ;;  %v6598_v23 = vpop.permute.xlu1 %6597  ;;  %v3794_v60 = vsel %vm1084_vm14, %v6489_v38, %v6490_v16  ;;  %v9554_v31 = vpop.permute.xlu2 %6623  ;;  %v10686_v16 = vld [vmem:[#allocation64_spill] sm:$0xff]  ;;  %v3615_v38 = vld [vmem:[#allocation11 + $0x28] sm:$0xff] }
 0x6f2   : > { %3570 = vmatpush.msra.mxu2 %v10673_v56  ;;  %v6600_v10 = vunpack.i.h.bf16 %v6598_v23  ;;  %v6599_v37 = vunpack.i.l.bf16 %v6598_v23  ;;  %v3667_v23 = vsel %vm995_vm0, %v6474_v43, %v6475_v44  ;;  %v10681_v56 = vld [vmem:[#allocation66_spill] sm:$0xff]  ;;  %v10684_v43 = vunpack.i.h.bf16 %v10680_v26 }
 0x6f3   : > { %3591 = vmatpush.msra.mxu3 %v10674_v39  ;;  %v6515_v26 = vunpack.i.h.bf16 %v9183_v33  ;;  %v10691_v33 = vld [vmem:[#allocation40_spill] sm:$0xff] }
 0x6f4   : > { %3571 = vmatpush.msra.mxu2 %v3536_v62  ;;  %v3669_v55 = vsel %vm995_vm0, %v6560_v27, %v6599_v37  ;;  %v3670_v48 = vsel %vm995_vm0, %v6599_v37, %v6600_v10  ;;  %v6455_v27 = vunpack.i.h.bf16 %v10681_v56  ;;  %v10682_v10 = vunpack.i.l.bf16 %v9068_v15 }
 0x6f5   : > { %3592 = vmatpush.msra.mxu3 %v3535_v13  ;;  %3695 = vmatpush.msrb.mxu0 %v3669_v55  ;;  %v3665_v62 = vsel %vm995_vm0, %v6445_v22, %v6449_v21  ;;  %v3666_v15 = vsel %vm995_vm0, %v6449_v21, %v6450_v34  ;;  %v6615_v13 = vunpack.i.h.bf16 %v9464_v40  ;;  %v3663_v57 = vsel %vm995_vm0, %v6439_v58, %v10684_v43  ;;  %v10695_v43 = vld [vmem:[#allocation43_spill] sm:$0xff] }
 0x6f6   : > { %5594 = vmatmul.msk.f32.vlgmr.msra.gmra.mxu3 %vm3075_vm4, %v3503_v52  ;;  %3572 = vmatpush.msra.mxu2 %v3534_v61  ;;  %v3793_v37 = vsel %vm1084_vm14, %v10682_v10, %v6485_v28  ;;  %v6614_v61 = vunpack.i.l.bf16 %v9464_v40  ;;  %v10685_v55 = vunpack.i.l.bf16 %v10681_v56  ;;  %v3742_v28 = vld [vmem:[#allocation11 + $0x30] sm:$0xff]  ;;  %v6545_v40 = vunpack.i.h.bf16 %v9419_v18  ;;  %v10692_v10 = vld [vmem:[#allocation67_spill] sm:$0xff] }
 0x6f7   : > { %3842 = vmatpush.msrb.mxu3 %v3797_v6  ;;  %3715 = vmatpush.msrb.mxu1 %v3670_v48  ;;  %v10688_v6 = vld [vmem:[#allocation72_spill] sm:$0xff]  ;;  %v6520_v18 = vunpack.i.h.bf16 %v9320_v35  ;;  %v6519_v22 = vunpack.i.l.bf16 %v9320_v35  ;;  %v6620_v58 = vunpack.i.h.bf16 %v9510_v47 }
 0x6f8   : > { %6808 = vrot.lane.b32.xlu0 %v6807_v36, %s7298_s1  ;;  %v9536_v25 = vpop.permute.xlu0 %6587  ;;  %5593 = vmatmul.msk.f32.vlgmr.msra.gmra.mxu2 %vm3075_vm4, %v3503_v52  ;;  %v3668_v36 = vsel %vm995_vm0, %v6475_v44, %v6559_v8  ;;  %v10683_v52 = vld [vmem:[#allocation71_spill] sm:$0xff]  ;;  %v4935_v44 = vmul.f32 %v7695_v11, %v9266_v2  ;;  %v3789_v48 = vsel %vm1084_vm14, %v10685_v55, %v6455_v27  ;;  %v10687_v8 = vunpack.i.h.bf16 %v9048_v50 }
 0x6f9   : > { %3843 = vmatpush.msrb.mxu3 %v3795_v14  ;;  %3822 = vmatpush.msrb.mxu2 %v3796_v29  ;;  %v9548_v39 = vpop.permute.xlu1 %6602  ;;  %v6435_v63 = vunpack.i.h.bf16 %v10683_v52  ;;  %v4930_v2 = vmul.f32 %v10671_v19, %v9121_v46  ;;  %v10689_v59 = vunpack.i.l.bf16 %v10683_v52  ;;  %v6585_v14 = vunpack.i.h.bf16 %v9476_v54 }
 0x6fa   : > { %3696 = vmatpush.msrb.mxu0 %v3667_v23  ;;  %3716 = vmatpush.msrb.mxu1 %v3668_v36  ;;  %v6590_v53 = vunpack.i.h.bf16 %v9536_v25  ;;  %v4021_v50 = vsel %vm1240_vm2, %v6614_v61, %v6615_v13  ;;  %v6619_v29 = vunpack.i.l.bf16 %v9510_v47  ;;  %v6589_v56 = vunpack.i.l.bf16 %v9536_v25 }
 0x6fb   : > { %3844 = vmatpush.msrb.mxu3 %v3793_v37  ;;  %3823 = vmatpush.msrb.mxu2 %v3794_v60  ;;  %v3662_v46 = vsel %vm995_vm0, %v10689_v59, %v6435_v63  ;;  %v6822_v21 = vpack.i.bf16 %v4930_v2, %v4935_v44  ;;  %v3893_v27 = vsel %vm1152_vm1, %v6544_v41, %v6545_v40  ;;  %v6509_v36 = vunpack.i.l.bf16 %v10691_v33  ;;  %v10693_v37 = vld [vmem:[#allocation33_spill] sm:$0xff]  ;;  %v10694_v63 = vld [vmem:[#allocation58_spill] sm:$0xff] }
 0x6fc   : > { %3697 = vmatpush.msrb.mxu0 %v3665_v62  ;;  %3717 = vmatpush.msrb.mxu1 %v3666_v15  ;;  %v3894_v47 = vsel %vm1152_vm1, %v6545_v40, %v9447_v5  ;;  %v6584_v25 = vunpack.i.l.bf16 %v9476_v54  ;;  %v6605_v60 = vunpack.i.h.bf16 %v9548_v39  ;;  %v4020_v62 = vsel %vm1240_vm2, %v6585_v14, %v6614_v61  ;;  %v9612_v15 = vpop.permute.xlu2 %6638 }
 0x6fd   : > { %3845 = vmatpush.msrb.mxu3 %v9159_v7  ;;  %3824 = vmatpush.msrb.mxu2 %v9153_v4  ;;  %v6604_v7 = vunpack.i.l.bf16 %v9548_v39  ;;  %v3790_v4 = vsel %vm1084_vm14, %v6459_v49, %v10687_v8  ;;  %v4931_v49 = vmul.f32 %v9090_v24, %v10693_v37  ;;  %v4932_v52 = vmul.f32 %v7695_v11, %v9276_v1 }
 0x6fe   : > { %3698 = vmatpush.msrb.mxu0 %v3663_v57  ;;  %3718 = vmatpush.msrb.mxu1 %v10686_v16  ;;  %v6505_v5 = vunpack.i.h.bf16 %v10694_v63  ;;  %v3891_v24 = vsel %vm1152_vm1, %v6515_v26, %v6519_v22  ;;  %v3892_v54 = vsel %vm1152_vm1, %v6519_v22, %v6520_v18  ;;  %v4017_v39 = vsel %vm1240_vm2, %v6619_v29, %v6620_v58  ;;  %v3854_v18 = vld [vmem:[#allocation11 + $0x38] sm:$0xff] }
 0x6ff   : > { %3846 = vmatpush.msrb.mxu3 %v3789_v48  ;;  %3825 = vmatpush.msrb.mxu2 %v3790_v4  ;;  %v4019_v35 = vsel %vm1240_vm2, %v6590_v53, %v6604_v7  ;;  %v6580_v44 = vunpack.i.h.bf16 %v9503_v32  ;;  %v6579_v13 = vunpack.i.l.bf16 %v9503_v32  ;;  %v4018_v1 = vsel %vm1240_vm2, %v6589_v56, %v6590_v53  ;;  %v10698_v32 = vld [vmem:[#allocation24_spill] sm:$0xff]  ;;  %v10700_v4 = vld [vmem:[#allocation39_spill] sm:$0xff] }
 0x700   : > { %3699 = vmatpush.msrb.mxu0 %v10688_v6  ;;  %v3993_v34 = vpop.permute.xlu0 %3992  ;;  %3719 = vmatpush.msrb.mxu1 %v3662_v46  ;;  %v6494_v57 = vunpack.i.l.bf16 %v10695_v43  ;;  %v10696_v55 = vunpack.i.h.bf16 %v10691_v33  ;;  %v6575_v2 = vunpack.i.h.bf16 %v9365_v20  ;;  %v4016_v40 = vsel %vm1240_vm2, %v6605_v60, %v6619_v29 }
 0x701   : > { %5598 = vmatmul.msk.f32.vlgmr.msrb.gmra.mxu3 %vm3075_vm4, %v3742_v28  ;;  %6823 = vrot.lane.b32.xlu0 %v6822_v21, %s7298_s1  ;;  %v9592_v23 = vpop.permute.xlu1 %4105  ;;  %v4015_v61 = vsel %vm1240_vm2, %v6584_v25, %v3993_v34  ;;  %v10699_v41 = vunpack.i.l.bf16 %v10694_v63  ;;  %v6574_v8 = vunpack.i.l.bf16 %v9365_v20  ;;  %v4014_v6 = vsel %vm1240_vm2, %v6580_v44, %v6584_v25  ;;  %v3966_v21 = vld [vmem:[#allocation11 + $0x40] sm:$0xff]  ;;  %v10702_v20 = vld [vmem:[#allocation27_spill] sm:$0xff] }
 0x702   : > { %4066 = vmatpush.msra.mxu3 %v4021_v50  ;;  %10690 = vst [vmem:[#allocation23_spill] sm:$0xff] %v9592_v23  ;;  %5595 = vmatmul.msk.f32.vlgmr.msrb.gmra.mxu0 %vm3075_vm4, %v3615_v38  ;;  %v3889_v48 = vsel %vm1152_vm1, %v6509_v36, %v10696_v55  ;;  %v4013_v59 = vsel %vm1240_vm2, %v6575_v2, %v6579_v13  ;;  %v10484_v29 = vunpack.i.h.bf16 %v9554_v31  ;;  %v10486_v25 = vunpack.i.h.bf16 %v9612_v15 }
 0x703   : > { %5596 = vmatmul.msk.f32.vlgmr.msrb.gmra.mxu1 %vm3075_vm4, %v3615_v38  ;;  %3826 = vmatpush.msrb.mxu2 %v10692_v10  ;;  %v3888_v7 = vsel %vm1152_vm1, %v10699_v41, %v6505_v5  ;;  %v6827_v46 = vpack.i.bf16 %v4932_v52, %v4931_v49  ;;  %v10701_v38 = vunpack.i.h.bf16 %v10695_v43  ;;  %v4012_v14 = vsel %vm1240_vm2, %v6574_v8, %v6575_v2 }
 0x704   : > { %3919 = vmatpush.msra.mxu0 %v3893_v27  ;;  %3939 = vmatpush.msra.mxu1 %v3894_v47  ;;  %v9648_v53 = vpop.permute.xlu2 %6653 }
 0x705   : > { %5597 = vmatmul.msk.f32.vlgmr.msrb.gmra.mxu2 %vm3075_vm4, %v3742_v28  ;;  %4067 = vmatpush.msra.mxu3 %v4019_v35  ;;  %v3885_v34 = vsel %vm1152_vm1, %v6494_v57, %v10701_v38 }
 0x706   : > { %4046 = vmatpush.msra.mxu2 %v4020_v62  ;;  %3920 = vmatpush.msra.mxu0 %v3891_v24 }
 0x707   : > { %3940 = vmatpush.msra.mxu1 %v3892_v54  ;;  %4068 = vmatpush.msra.mxu3 %v4017_v39 }
 0x708   : > { %4047 = vmatpush.msra.mxu2 %v4018_v1  ;;  %v9625_v28 = vpop.permute.xlu0 %4100  ;;  %3921 = vmatpush.msra.mxu0 %v3889_v48 }
 0x709   : > { %10697 = vst [vmem:[#allocation26_spill] sm:$0xff] %v9625_v28  ;;  %3941 = vmatpush.msra.mxu1 %v10698_v32  ;;  %4069 = vmatpush.msra.mxu3 %v4015_v61  ;;  %v9633_v16 = vpop.permute.xlu1 %6633 }
 0x70a   : > { %4048 = vmatpush.msra.mxu2 %v4016_v40  ;;  %3922 = vmatpush.msra.mxu0 %v10700_v4  ;;  %v10485_v56 = vunpack.i.l.bf16 %v9633_v16 }
 0x70b   : > { %3942 = vmatpush.msra.mxu1 %v3888_v7  ;;  %4070 = vmatpush.msra.mxu3 %v4013_v59 }
 0x70c   : > { %4049 = vmatpush.msra.mxu2 %v4014_v6  ;;  %6828 = vrot.lane.b32.xlu0 %v6827_v46, %s7298_s1  ;;  %v9665_v36 = vpop.permute.xlu2 %6658 }
 0x70d   : > { %3923 = vmatpush.msra.mxu0 %v3885_v34  ;;  %3943 = vmatpush.msra.mxu1 %v10702_v20  ;;  %v10480_v39 = vunpack.i.h.bf16 %v9665_v36 }
 0x70e   : > { %5602 = vmatmul.msk.f32.vlgmr.msra.gmra.mxu3 %vm3075_vm4, %v3966_v21  ;;  %5599 = vmatmul.msk.f32.vlgmr.msra.gmra.mxu0 %vm3075_vm4, %v3854_v18 }
 0x70f   : > { %5600 = vmatmul.msk.f32.vlgmr.msra.gmra.mxu1 %vm3075_vm4, %v3854_v18  ;;  %4050 = vmatpush.msra.mxu2 %v4012_v14 }
 0x710   : > { %v6629_v50 = vpop.permute.xlu0 %6628  ;;  %5601 = vmatmul.msk.f32.vlgmr.msra.gmra.mxu2 %vm3075_vm4, %v3966_v21 }
 0x711   : > { %v9651_v22 = vpop.permute.xlu1 %6648  ;;  %v6631_v26 = vunpack.i.h.bf16 %v6629_v50  ;;  %v6630_v58 = vunpack.i.l.bf16 %v6629_v50 }
 0x712   : > { %v10487_v60 = vunpack.i.l.bf16 %v9651_v22 }
 0x713   : > { %v9658_v27 = vsel %vm657_vm12, %v6631_v26, %v10485_v56  ;;  %v9663_v35 = vsel %vm657_vm12, %v10484_v29, %v6630_v58 }
 0x714   : > { %v9681_v54 = vpop.permute.xlu2 %6673 }
 0x715   : > { %v10482_v48 = vunpack.i.h.bf16 %v9681_v54 }
 0x718   : > { %v6644_v33 = vpop.permute.xlu0 %6643 }
 0x719   : > { %v6646_v47 = vunpack.i.h.bf16 %v6644_v33  ;;  %v6645_v10 = vunpack.i.l.bf16 %v6644_v33  ;;  %v9667_v49 = vpop.permute.xlu1 %6668 }
 0x71a   : > { %v10481_v44 = vunpack.i.l.bf16 %v9667_v49 }
 0x71b   : > { %v9674_v62 = vsel %vm657_vm12, %v6646_v47, %v10487_v60  ;;  %v9679_v52 = vsel %vm657_vm12, %v10486_v25, %v6645_v10 }
 0x71c   : > { %v9699_v32 = vpop.permute.xlu2 %6688 }
 0x71d   : > { %10703 = vst [vmem:[#allocation25_spill] sm:$0xff] %v9699_v32  ;;  %v10476_v59 = vunpack.i.h.bf16 %v9699_v32 }
 0x720   : > { %v6664_v63 = vpop.permute.xlu0 %6663 }
 0x721   : > { %v6666_v5 = vunpack.i.h.bf16 %v6664_v63  ;;  %v6665_v24 = vunpack.i.l.bf16 %v6664_v63  ;;  %v9685_v13 = vpop.permute.xlu1 %6683 }
 0x722   : > { %v10483_v2 = vunpack.i.l.bf16 %v9685_v13 }
 0x723   : > { %v9690_v1 = vsel %vm748_vm11, %v6666_v5, %v10481_v44  ;;  %v9695_v61 = vsel %vm748_vm11, %v10480_v39, %v6665_v24 }
 0x724   : > { %v9725_v34 = vpop.permute.xlu2 %6703 }
 0x725   : > { %v10478_v26 = vunpack.i.h.bf16 %v9725_v34 }
 0x728   : > { %v6679_v43 = vpop.permute.xlu0 %6678 }
 0x729   : > { %v6681_v57 = vunpack.i.h.bf16 %v6679_v43  ;;  %v6680_v55 = vunpack.i.l.bf16 %v6679_v43  ;;  %v9711_v7 = vpop.permute.xlu1 %6698 }
 0x72a   : > { %v10477_v46 = vunpack.i.l.bf16 %v9711_v7 }
 0x72b   : > { %v9704_v40 = vsel %vm748_vm11, %v6681_v57, %v10483_v2  ;;  %v9709_v41 = vsel %vm748_vm11, %v10482_v48, %v6680_v55  ;;  %v10714_v48 = vld [vmem:[#allocation48_spill] sm:$0xff] }
 0x72c   : > { %v9743_v63 = vpop.permute.xlu2 %6718 }
 0x72d   : > { %10709 = vst [vmem:[#allocation60_spill] sm:$0xff] %v9743_v63  ;;  %v10475_v24 = vunpack.i.h.bf16 %v9743_v63 }
 0x730   : > { %v6694_v8 = vpop.permute.xlu0 %6693 }
 0x731   : > { %v6696_v4 = vunpack.i.h.bf16 %v6694_v8  ;;  %v6695_v6 = vunpack.i.l.bf16 %v6694_v8  ;;  %v9727_v20 = vpop.permute.xlu1 %6713 }
 0x732   : > { %v10479_v58 = vunpack.i.l.bf16 %v9727_v20 }
 0x733   : > { %v9718_v21 = vsel %vm838_vm15, %v6696_v4, %v10477_v46  ;;  %v9723_v38 = vsel %vm838_vm15, %v10476_v59, %v6695_v6 }
 0x734   : > { %10704 = vst [vmem:[#allocation30_spill] sm:$0xff] %v9718_v21 }
 0x735   : > { %10705 = vst [vmem:[#allocation42_spill] sm:$0xff] %v9723_v38 }
 0x738   : > { %v6709_v18 = vpop.permute.xlu0 %6708 }
 0x739   : > { %v6711_v14 = vunpack.i.h.bf16 %v6709_v18  ;;  %v6710_v50 = vunpack.i.l.bf16 %v6709_v18 }
 0x73b   : > { %v9734_v33 = vsel %vm838_vm15, %v6711_v14, %v10479_v58  ;;  %v9739_v47 = vsel %vm838_vm15, %v10478_v26, %v6710_v50  ;;  %v3116_v50 = vpop.f32.mrf.mxu3 }
 0x73c   : > { %10706 = vst [vmem:[#allocation31_spill] sm:$0xff] %v9734_v33  ;;  %v3120_v29 = vadd.f32 %v3116_v50, %v10714_v48 }
 0x73d   : > { %10707 = vst [vmem:[#allocation46_spill] sm:$0xff] %v9739_v47 }
 0x740   : > { %v9741_v10 = vpop.permute.xlu0 %6723 }
 0x741   : > { %10708 = vst [vmem:[#allocation65_spill] sm:$0xff] %v9741_v10  ;;  %v6725_v5 = vunpack.i.l.bf16 %v9741_v10 }
 0x743   : > { %v9750_v43 = vsel %vm906_vm13, %v10475_v24, %v6725_v5  ;;  %v3096_v5 = vpop.f32.mrf.mxu2 }
 0x744   : > { %10710 = vst [vmem:[#allocation47_spill] sm:$0xff] %v9750_v43  ;;  %v3119_v2 = vadd.f32 %v3096_v5, %v10714_v48 }
 0x74a   : > { %v9752_v57 = vpop.permute.xlu0 %6748 }
 0x752   : > { %v9754_v55 = vpop.permute.xlu0 %6773 }
 0x753   : > { %v3243_v24 = vpop.f32.mrf.mxu1  ;;  %v3223_v46 = vpop.f32.mrf.mxu0 }
 0x754   : > { %v3246_v25 = vadd.f32 %v3223_v46, %v3119_v2  ;;  %v3247_v60 = vadd.f32 %v3243_v24, %v3120_v29  ;;  %v10717_v24 = vld [vmem:[#allocation51_spill] sm:$0xff] }
 0x75a   : > { %v9756_v8 = vpop.permute.xlu0 %6788 }
 0x75b   : > { %10711 = vst [vmem:[#allocation70_spill] sm:$0xff] %v9756_v8  ;;  %v6791_v18 = vunpack.i.h.bf16 %v9756_v8 }
 0x75d   : > { %v3497_v58 = vpop.f32.mrf.mxu1 }
 0x75e   : > { %v3477_v44 = vpop.f32.mrf.mxu0 }
 0x762   : > { %v9758_v4 = vpop.permute.xlu0 %6793 }
 0x763   : > { %10712 = vst [vmem:[#allocation49_spill] sm:$0xff] %v9758_v4  ;;  %v10490_v6 = vunpack.i.l.bf16 %v9758_v4 }
 0x765   : > { %v9765_v14 = vsel %vm995_vm0, %v6791_v18, %v10490_v6 }
 0x766   : > { %10713 = vst [vmem:[#allocation68_spill] sm:$0xff] %v9765_v14 }
 0x76f   : > { %v3370_v59 = vpop.f32.mrf.mxu3 }
 0x770   : > { %v3350_v26 = vpop.f32.mrf.mxu2  ;;  %v3374_v18 = vadd.f32 %v3370_v59, %v3247_v60 }
 0x771   : > { %v3373_v23 = vadd.f32 %v3350_v26, %v3246_v25 }
 0x772   : > { %v3501_v8 = vadd.f32 %v3497_v58, %v3374_v18  ;;  %v9803_v18 = vld [vmem:[#allocation2 + $0x20] sm:$0xff] }
 0x773   : > { %v3500_v14 = vadd.f32 %v3477_v44, %v3373_v23 }
 0x779   : > { %v3594_v39 = vpop.f32.mrf.mxu3 }
 0x77a   : > { %v3598_v38 = vadd.f32 %v3594_v39, %v3501_v8  ;;  %v9773_v39 = vld [vmem:[#allocation2 + $0x70] sm:$0xff] }
 0x77b   : > { %v3574_v56 = vpop.f32.mrf.mxu2  ;;  %v4789_v46 = vmul.f32 %v7598_v42, %v9773_v39 }
 0x77c   : > { %v3597_v43 = vadd.f32 %v3574_v56, %v3500_v14 }
 0x77f   : > { %v3701_v6 = vpop.f32.mrf.mxu0 }
 0x780   : > { %v3721_v28 = vpop.f32.mrf.mxu1  ;;  %v3724_v10 = vadd.f32 %v3701_v6, %v3597_v43  ;;  %v10718_v43 = vld [vmem:[#allocation50_spill] sm:$0xff]  ;;  %v9799_v6 = vld [vmem:[#allocation2 + $0x18] sm:$0xff] }
 0x781   : > { %v3725_v21 = vadd.f32 %v3721_v28, %v3598_v38  ;;  %v10715_v28 = vld [vmem:[#allocation28_spill] sm:$0xff]  ;;  %v9781_v38 = vld [vmem:[#allocation2 + $0x60] sm:$0xff]  ;;  %v10719_v8 = vpack.i.bf16 %v10717_v24, %v10718_v43  ;;  %v4778_v14 = vmul.f32 %v9799_v6, %v10646_v45 }
 0x784   : > { %v3848_v4 = vpop.f32.mrf.mxu3 }
 0x785   : > { %v3852_v32 = vadd.f32 %v3848_v4, %v3725_v21  ;;  %v9779_v21 = vld [vmem:[#allocation2 + $0x68] sm:$0xff] }
 0x786   : > { %v6757_v26 = vpack.i.bf16 %v9779_v21, %v9781_v38  ;;  %v4788_v58 = vmul.f32 %v9779_v21, %v10648_v30 }
 0x788   : > { %v3828_v63 = vpop.f32.mrf.mxu2 }
 0x789   : > { %v3851_v5 = vadd.f32 %v3828_v63, %v3724_v10  ;;  %v4783_v63 = vmul.f32 %v7598_v42, %v9302_v0 }
 0x78b   : > { %v3925_v33 = vpop.f32.mrf.mxu0 }
 0x78c   : > { %v3945_v47 = vpop.f32.mrf.mxu1  ;;  %v3948_v29 = vadd.f32 %v3925_v33, %v3851_v5  ;;  %v6762_v33 = vpack.i.bf16 %v4789_v46, %v4788_v58  ;;  %v4779_v5 = vmul.f32 %v9803_v18, %v10648_v30 }
 0x78d   : > { %v3949_v48 = vadd.f32 %v3945_v47, %v3852_v32  ;;  %v10716_v32 = vld [vmem:[#allocation45_spill] sm:$0xff]  ;;  %v9789_v47 = vld [vmem:[#allocation2 + $0x38] sm:$0xff] }
 0x78e   : > { %v4782_v10 = vmul.f32 %v9789_v47, %v10648_v30 }
 0x790   : > { %v6777_v4 = vpack.i.bf16 %v4783_v63, %v4782_v10  ;;  %v6750_v63 = vunpack.i.l.bf16 %v9752_v57 }
 0x791   : > { %v4072_v50 = vpop.f32.mrf.mxu3 }
 0x792   : > { %v4076_v2 = vadd.f32 %v4072_v50, %v3949_v48  ;;  %v4944_v48 = vmul.f32 %v7695_v11, %v9773_v39  ;;  %v6782_v50 = vpack.i.bf16 %v4779_v5, %v4778_v14  ;;  %v4942_v14 = vmul.f32 %v9781_v38, %v10671_v19 }
 0x793   : > { %v4052_v60 = vpop.f32.mrf.mxu2 }
 0x794   : > { %vm4078_vm7 = vcmp.ge.f32.partialorder %v4076_v2, 0.0  ;;  %v4080_v25 = vmul.f32 0.2, %v4076_v2  ;;  %v4075_v59 = vadd.f32 %v4052_v60, %v3948_v29  ;;  %v4938_v60 = vmul.f32 %v7695_v11, %v9302_v0 }
 0x796   : > { %v4082_v23 = vsel %vm4078_vm7, %v4076_v2, %v4080_v25  ;;  %vm4077_vm8 = vcmp.ge.f32.partialorder %v4075_v59, 0.0  ;;  %v4079_v44 = vmul.f32 0.2, %v4075_v59  ;;  %v4943_v2 = vmul.f32 %v9779_v21, %v10693_v37 }
 0x797   : > { %4087 = vrot.lane.b32.xlu2 %v4082_v23, %s7288_s2  ;;  %v4937_v25 = vmul.f32 %v9789_v47, %v10693_v37  ;;  %v10721_v23 = vld [vmem:[#allocation52_spill] sm:$0xff] }
 0x798   : > { %v4081_v56 = vsel %vm4077_vm8, %v4075_v59, %v4079_v44  ;;  %v6797_v29 = vpack.i.bf16 %v4944_v48, %v4943_v2  ;;  %v10720_v59 = vld [vmem:[#allocation53_spill] sm:$0xff]  ;;  %v9851_v48 = vpop.permute.xlu1 %6728  ;;  %v10724_v2 = vld [vmem:[#allocation44_spill] sm:$0xff] }
 0x799   : > { %4085 = vrot.lane.b32.xlu1 %v4081_v56, %s7288_s2  ;;  %v10722_v44 = vpack.i.bf16 %v10720_v59, %v10721_v23  ;;  %v6812_v56 = vpack.i.bf16 %v4938_v60, %v4937_v25  ;;  %v10727_v23 = vld [vmem:[#allocation22_spill] sm:$0xff]  ;;  %s5645_s2 = sshll.u32 %s7387_s24, 5 }
 0x79f   : > { %6743 = vrot.lane.b32.xlu2 %v10715_v28, %s7294_s3  ;;  %v4933_v28 = vmul.f32 %v9799_v6, %v10671_v19 }
 0x7a1   : > { %6753 = vrot.lane.b32.xlu1 %v10716_v32, %s7294_s3  ;;  %v4934_v32 = vmul.f32 %v9803_v18, %v10693_v37 }
 0x7a3   : > { %v6817_v46 = vpack.i.bf16 %v4934_v32, %v4933_v28  ;;  %v4113_v32 = vld [vmem:[#allocation2 + $0x38] sm:$0xff] }
 0x7a7   : > { %6758 = vrot.lane.b32.xlu2 %v6757_v26, %s7294_s3  ;;  %v9828_v26 = vpop.permute.xlu2 %6733 }
 0x7a9   : > { %6763 = vrot.lane.b32.xlu1 %v6762_v33, %s7296_s26 }
 0x7af   : > { %6768 = vrot.lane.b32.xlu2 %v10719_v8, %s7296_s26  ;;  %v9830_v0 = vpop.permute.xlu2 %6738 }
 0x7b1   : > { %6778 = vrot.lane.b32.xlu1 %v6777_v4, %s7296_s26 }
 0x7b7   : > { %6783 = vrot.lane.b32.xlu2 %v6782_v50, %s7296_s26 }
 0x7b9   : > { %6798 = vrot.lane.b32.xlu1 %v6797_v29, %s7298_s1  ;;  %v10725_v29 = vld [vmem:[#allocation37_spill] sm:$0xff] }
 0x7ba   : > { %v10726_v25 = vpack.i.bf16 %v10724_v2, %v10725_v29  ;;  %v10728_v29 = vld [vmem:[#allocation21_spill] sm:$0xff] }
 0x7bf   : > { %6803 = vrot.lane.b32.xlu2 %v10722_v44, %s7298_s1 }
 0x7c1   : > { %6813 = vrot.lane.b32.xlu1 %v6812_v56, %s7298_s1  ;;  %v4115_v56 = vld [vmem:[#allocation2 + $0x50] sm:$0xff] }
 0x7c7   : > { %6818 = vrot.lane.b32.xlu2 %v6817_v46, %s7298_s1  ;;  %v4127_v46 = vmul.f32 %v10727_v23, %v4115_v56 }
 0x7f1   : > { %v4088_v58 = vpop.permute.xlu2 %4087 }
 0x7f2   : > { %4095 = vst.msk [vmem:[#allocation2 + $0x88] sm:$0xff] %vm525_vm6, %v4088_v58 }
 0x7f9   : > { %v9833_v33 = vpop.permute.xlu2 %6743  ;;  %v9835_v10 = vld [vmem:[#allocation2 + $0x88] sm:$0xff] }
 0x7fa   : > { %v10499_v24 = vunpack.i.h.bf16 %v9833_v33  ;;  %v6842_v43 = vpack.i.bf16 %v9781_v38, %v9835_v10  ;;  %v4947_v4 = vmul.f32 %v7695_v11, %v9835_v10  ;;  %v4117_v11 = vld [vmem:[#allocation2 + $0x68] sm:$0xff] }
 0x7fb   : > { %v4129_v28 = vmul.f32 %v10727_v23, %v4117_v11  ;;  %v4109_v11 = vld [vmem:[#allocation2 + $0x8] sm:$0xff] }
 0x7fc   : > { %6843 = vrot.lane.b32.xlu2 %v6842_v43, %s7299_s4  ;;  %v9845_v8 = vsel %vm906_vm13, %v10499_v24, %v6750_v63  ;;  %v6877_v5 = vpack.i.bf16 %v4942_v14, %v4947_v4  ;;  %v4116_v4 = vld [vmem:[#allocation2 + $0x60] sm:$0xff]  ;;  %v4125_v14 = vmul.f32 %v10727_v23, %v4113_v32 }
 0x7fd   : > { %10723 = vst [vmem:[#allocation59_spill] sm:$0xff] %v9845_v8  ;;  %v4112_v8 = vld [vmem:[#allocation2 + $0x30] sm:$0xff] }
 0x804   : > { %6878 = vrot.lane.b32.xlu2 %v6877_v5, %s7298_s1  ;;  %v6751_v5 = vunpack.i.h.bf16 %v9752_v57  ;;  %v4128_v57 = vmul.f32 %v10728_v29, %v4116_v4  ;;  %v4110_v4 = vld [vmem:[#allocation2 + $0x18] sm:$0xff] }
 0x80b   : > { %v4086_v50 = vpop.permute.xlu1 %4085 }
 0x80c   : > { %6898 = vrot.lane.b32.xlu2 %v10726_v25, %s7299_s4  ;;  %v9859_v60 = vsel %vm525_vm6, %v4086_v50, %v4088_v58  ;;  %4093 = vst.msk [vmem:[#allocation2 + $0x78] sm:$0xff] %vm534_vm5, %v4086_v50  ;;  %v4111_v58 = vld [vmem:[#allocation2 + $0x20] sm:$0xff]  ;;  %vm4134_vm5 = vcmask 392192  }
 0x80d   : > { %v6847_v59 = vpack.i.bf16 %v9835_v10, %v9859_v60  ;;  %v4131_v44 = vmul.f32 %v10727_v23, %v9859_v60  ;;  %v4791_v56 = vmul.f32 %v9859_v60, %v10648_v30  ;;  %v4123_v32 = vmul.f32 %v10727_v23, %v4111_v58  ;;  %v4132_v30 = vld [vmem:[#allocation12] sm:$0xff] }
 0x80f   : > { %6848 = vrot.lane.b32.xlu1 %v6847_v59, %s7293_s16  ;;  %4174 = vmatpush.msrb.mxu1 %v4131_v44 }
 0x811   : > { %4175 = vmatpush.msrb.mxu1 %v4129_v28  ;;  %v4114_v28 = vld [vmem:[#allocation2 + $0x48] sm:$0xff] }
 0x812   : > { %v4126_v58 = vmul.f32 %v10728_v29, %v4114_v28  ;;  %v10729_v28 = vld [vmem:[#allocation29_spill] sm:$0xff] }
 0x813   : > { %v9869_v63 = vpop.permute.xlu1 %6753  ;;  %v9871_v43 = vld [vmem:[#allocation2 + $0x78] sm:$0xff]  ;;  %4176 = vmatpush.msrb.mxu1 %v4127_v46 }
 0x814   : > { %v6755_v50 = vunpack.i.l.bf16 %v9869_v63  ;;  %v6832_v2 = vpack.i.bf16 %v9871_v43, %v9773_v39  ;;  %v4130_v25 = vmul.f32 %v10728_v29, %v9871_v43  ;;  %v4790_v44 = vmul.f32 %v10646_v45, %v9871_v43 }
 0x815   : > { %4177 = vmatpush.msrb.mxu1 %v4125_v14  ;;  %v4121_v14 = vmul.f32 %v10727_v23, %v4109_v11  ;;  %v6857_v23 = vpack.i.bf16 %v9859_v60, %v9871_v43  ;;  %v6917_v11 = vpack.i.bf16 %v9803_v18, %v9799_v6 }
 0x816   : > { %6833 = vrot.lane.b32.xlu0 %v6832_v2, %s7293_s16  ;;  %4151 = vmatpush.msrb.mxu0 %v4130_v25  ;;  %v9890_v46 = vsel %vm906_vm13, %v6751_v5, %v6755_v50  ;;  %v6912_v24 = vpack.i.bf16 %v4791_v56, %v4790_v44  ;;  %v4124_v5 = vmul.f32 %v10728_v29, %v4112_v8  ;;  %v4133_v8 = vld [vmem:[#allocation12 + $0x8] sm:$0xff] }
 0x817   : > { %6853 = vrot.lane.b32.xlu1 %v6847_v59, %s7294_s3  ;;  %4178 = vmatpush.msrb.mxu1 %v4123_v32  ;;  %v4108_v59 = vld [vmem:[#allocation2] sm:$0xff]  ;;  %v4122_v44 = vmul.f32 %v10728_v29, %v4110_v4  ;;  %v4361_v56 = vmul.f32 %v10630_v3, %v9871_v43  ;;  %v4363_v3 = vmul.f32 %v10643_v17, %v9835_v10 }
 0x818   : > { %4152 = vmatpush.msrb.mxu0 %v4128_v57  ;;  %6913 = vrot.lane.b32.xlu2 %v6912_v24, %s7296_s26  ;;  %v4120_v24 = vmul.f32 %v10728_v29, %v4108_v59  ;;  %v4360_v29 = vmul.f32 %v10643_v17, %v9773_v39  ;;  %v10730_v57 = vld [vmem:[#allocation34_spill] sm:$0xff]  ;;  %v4516_v17 = vmul.f32 %v10628_v51, %v9871_v43 }
 0x819   : > { %4179 = vmatpush.msrb.mxu1 %v4121_v14  ;;  %v5221_v14 = vmul.f32 %v10730_v57, %v9835_v10  ;;  %v4792_v51 = vmul.f32 %v7598_v42, %v9835_v10 }
 0x81a   : > { %4153 = vmatpush.msrb.mxu0 %v4126_v58  ;;  %5605 = vmatmul.msk.f32.vlgmr.msrb.gmra.mxu1 %vm4134_vm5, %v4132_v30  ;;  %v6862_v4 = vpack.i.bf16 %v4361_v56, %v4360_v29  ;;  %v4515_v56 = vmul.f32 %v10645_v9, %v9773_v39 }
 0x81b   : > { %v9898_v25 = vpop.permute.xlu1 %6763 }
 0x81c   : > { %4154 = vmatpush.msrb.mxu0 %v4124_v5  ;;  %v10731_v5 = vld [vmem:[#allocation35_spill] sm:$0xff] }
 0x81d   : > { %v5216_v59 = vmul.f32 %v9781_v38, %v10731_v5 }
 0x81e   : > { %6838 = vrot.lane.b32.xlu0 %v6832_v2, %s7294_s3  ;;  %4155 = vmatpush.msrb.mxu0 %v4122_v44  ;;  %v4362_v2 = vmul.f32 %v9859_v60, %v10729_v28  ;;  %v4518_v28 = vmul.f32 %v10645_v9, %v9835_v10  ;;  %v5207_v9 = vmul.f32 %v9799_v6, %v10731_v5  ;;  %v7006_v10 = vld [vmem:[#allocation2 + $0x30] sm:$0xff] }
 0x81f   : > { %6858 = vrot.lane.b32.xlu1 %v6857_v23, %s7299_s4 }
 0x820   : > { %4156 = vmatpush.msrb.mxu0 %v4120_v24  ;;  %6918 = vrot.lane.b32.xlu2 %v6917_v11, %s7299_s4  ;;  %v6882_v44 = vpack.i.bf16 %v4363_v3, %v4362_v2  ;;  %v6927_v24 = vpack.i.bf16 %v5216_v59, %v5221_v14  ;;  %v4517_v11 = vmul.f32 %v9859_v60, %v10632_v12  ;;  %v10733_v14 = vld [vmem:[#allocation54_spill] sm:$0xff] }
 0x821   : > { %5603 = vmatmul.msk.f32.vlgmr.msrb.gmra.mxu0 %vm4134_vm5, %v4132_v30  ;;  %v6776_v30 = vunpack.i.h.bf16 %v9754_v55  ;;  %v6867_v2 = vpack.i.bf16 %v4516_v17, %v4515_v56  ;;  %v4787_v12 = vmul.f32 %v9781_v38, %v10646_v45  ;;  %v7008_v38 = vld [vmem:[#allocation2 + $0x40] sm:$0xff]  ;;  %v4946_v17 = vmul.f32 %v9859_v60, %v10693_v37  ;;  %v7010_v56 = vld [vmem:[#allocation2 + $0x28] sm:$0xff] }
 0x822   : > { %5606 = vmatmul.msk.f32.gmra.mxu1 %vm4134_vm5, %v4133_v8  ;;  %v6887_v29 = vpack.i.bf16 %v4518_v28, %v4517_v11  ;;  %v6907_v6 = vpack.i.bf16 %v7008_v38, %v9789_v47  ;;  %v7009_v11 = vld [vmem:[#allocation2] sm:$0xff] }
 0x823   : > { %v9917_v32 = vpop.permute.xlu1 %6778  ;;  %v6872_v59 = vpack.i.bf16 %v4787_v12, %v4792_v51  ;;  %v6922_v28 = vpack.i.bf16 %v7009_v11, %v7010_v56  ;;  %v5219_v12 = vmul.f32 %v10731_v5, %v9871_v43 }
 0x824   : > { %v6780_v58 = vunpack.i.l.bf16 %v9917_v32 }
 0x826   : > { %6863 = vrot.lane.b32.xlu0 %v6862_v4, %s7295_s23  ;;  %v9931_v23 = vsel %vm995_vm0, %v6776_v30, %v6780_v58  ;;  %v10735_v30 = vld [vmem:[#allocation36_spill] sm:$0xff] }
 0x827   : > { %6883 = vrot.lane.b32.xlu1 %v6882_v44, %s7295_s23  ;;  %v5208_v4 = vmul.f32 %v9803_v18, %v10735_v30  ;;  %v6892_v44 = vpack.i.bf16 %v9773_v39, %v9779_v21  ;;  %v4945_v18 = vmul.f32 %v10671_v19, %v9871_v43  ;;  %v5217_v51 = vmul.f32 %v9779_v21, %v10735_v30  ;;  %s5383_s23 = scalar_lea.hbm %s10349_s11, %s5645_s2 }
 0x828   : > { %6928 = vrot.lane.b32.xlu2 %v6927_v24, %s7301_s12  ;;  %v7007_v24 = vld [vmem:[#allocation2 + $0x58] sm:$0xff]  ;;  %v5212_v43 = vmul.f32 %v7008_v38, %v10730_v57  ;;  %s5386_s24 = sshll.u32 %s5383_s23, 4  ;;  %s5387_s24 = int_to_ptr.hbm [resolvable:$true] %s5386_s24 }
 0x829   : > { %5604 = vmatmul.msk.f32.gmra.mxu0 %vm4134_vm5, %v4133_v8  ;;  %v10732_v8 = vld [vmem:[#allocation55_spill] sm:$0xff]  ;;  %v6967_v42 = vpack.i.bf16 %v5208_v4, %v5207_v9  ;;  %v6902_v45 = vpack.i.bf16 %v7006_v10, %v7007_v24  ;;  %v5215_v37 = vmul.f32 %v7007_v24, %v10730_v57  ;;  %v5210_v9 = vmul.f32 %v7006_v10, %v10731_v5  ;;  %v9991_v24 = vpop.permute.xlu2 %6758 }
 0x82a   : > { %v10734_v3 = vpack.i.bf16 %v10732_v8, %v10733_v14  ;;  %v7011_v8 = vld [vmem:[#allocation2 + $0x8] sm:$0xff]  ;;  %v7012_v14 = vld [vmem:[#allocation2 + $0x10] sm:$0xff] }
 0x82b   : > { %v6932_v19 = vpack.i.bf16 %v7012_v14, %v7011_v8  ;;  %v6952_v4 = vpack.i.bf16 %v5210_v9, %v5215_v37  ;;  %v10002_v38 = vpop.permute.xlu1 %6798  ;;  %v6651_v37 = vunpack.i.h.bf16 %v9651_v22 }
 0x82e   : > { %6868 = vrot.lane.b32.xlu0 %v6867_v2, %s7297_s21  ;;  %v6937_v2 = vpack.i.bf16 %v4946_v17, %v4945_v18 }
 0x82f   : > { %6888 = vrot.lane.b32.xlu1 %v6887_v29, %s7297_s21  ;;  %v5218_v29 = vmul.f32 %v10730_v57, %v9773_v39  ;;  %v5220_v39 = vmul.f32 %v9859_v60, %v10735_v30  ;;  %v5205_v60 = vmul.f32 %v7011_v8, %v10735_v30  ;;  %s7211_s21 = sshra.s32 %s5387_s24, 4  ;;  %s7212_s21 = int_to_ptr.hbm [resolvable:$true] %s7211_s21 }
 0x830   : > { %6948 = vrot.lane.b32.xlu2 %v10734_v3, %s7301_s12  ;;  %p7218_p13 = scmp.lt.s32.totalorder %s7212_s21, %s10349_s11 }
 0x831   : > { %v6942_v3 = vpack.i.bf16 %v5218_v29, %v5217_v51  ;;  %v6957_v21 = vpack.i.bf16 %v5220_v39, %v5219_v12  ;;  %v9997_v18 = vpop.permute.xlu2 %6768 }
 0x836   : > { %6873 = vrot.lane.b32.xlu0 %v6872_v59, %s7296_s26  ;;  %v5204_v59 = vmul.f32 %v7009_v11, %v10731_v5  ;;  %s5384_s26 = sshll.u32 %s489_s15, 4  ;;  %s5385_s26 = int_to_ptr.vmem [resolvable:$true] %s5384_s26 }
 0x837   : > { %6893 = vrot.lane.b32.xlu1 %v6892_v44, %s7299_s4  ;;  %v5209_v44 = vmul.f32 %v7010_v56, %v10730_v57  ;;  %v10008_v56 = vpop.permute.xlu1 %6813 }
 0x838   : > { %6968 = vrot.lane.b32.xlu2 %v6967_v42, %s7301_s12  ;;  %v5211_v42 = vmul.f32 %v9789_v47, %v10735_v30  ;;  %v10000_v47 = vpop.permute.xlu0 %6808 }
 0x839   : > { %v6972_v10 = vpack.i.bf16 %v5204_v59, %v5209_v44  ;;  %v10004_v17 = vpop.permute.xlu2 %6783  ;;  %v6640_v44 = vunpack.i.l.bf16 %v9612_v15 }
 0x83e   : > { %6903 = vrot.lane.b32.xlu0 %v6902_v45, %s7299_s4  ;;  %v6962_v45 = vpack.i.bf16 %v5212_v43, %v5211_v42  ;;  %v6636_v42 = vunpack.i.h.bf16 %v9633_v16  ;;  %v10736_v43 = vunpack.i.l.bf16 %v9651_v22 }
 0x83f   : > { %6908 = vrot.lane.b32.xlu1 %v6907_v6, %s7299_s4  ;;  %v5206_v6 = vmul.f32 %v7012_v14, %v10730_v57  ;;  %v6656_v14 = vunpack.i.h.bf16 %v9648_v53 }
 0x840   : > { %v10006_v11 = vpop.permute.xlu0 %6823 }
 0x841   : > { %v6977_v5 = vpack.i.bf16 %v5206_v6, %v5205_v60  ;;  %v6625_v60 = vunpack.i.l.bf16 %v9554_v31  ;;  %v10737_v6 = vunpack.i.h.bf16 %v9612_v15 }
 0x846   : > { %6923 = vrot.lane.b32.xlu0 %v6922_v28, %s7299_s4  ;;  %v10010_v28 = vpop.permute.xlu2 %6803 }
 0x847   : > { %6938 = vrot.lane.b32.xlu1 %v6937_v2, %s7298_s1  ;;  %s7213_s1 = scalar_lea.hbm %s7212_s21, 32 }
 0x848   : > { %v10012_v30 = vpop.permute.xlu0 %6828  ;;  %p7214_p1 = scmp.ne.s32.totalorder %s7212_s21, %s7213_s1  ;;  %p7219_p7 = scmp.lt.s32.totalorder %s7217_s29, %s7213_s1 }
 0x84a   : > { %p7215_p3 = pnand %p7214_p1, %p7453_p0  ;;  %p7220_p8 = por %p7219_p7, %p7218_p13 }
 0x84c   : > { %p7216_p5 = pneg %p7215_p3 }
 0x84e   : > { %6933 = vrot.lane.b32.xlu0 %v6932_v19, %s7299_s4  ;;  %v10014_v51 = vpop.permute.xlu2 %6818  ;;  %p7221_p9 = pnand %p7220_p8, %p7216_p5 }
 0x84f   : > { %6943 = vrot.lane.b32.xlu1 %v6942_v3, %s7301_s12  ;;  %v6655_v3 = vunpack.i.l.bf16 %v9648_v53 }
 0x851   : > { %v4274_v53 = vsel %vm657_vm12, %v6655_v3, %v6656_v14  ;;  %v4211_v3 = vld [vmem:[#allocation12 + $0x18] sm:$0xff] }
 0x856   : > { %6953 = vrot.lane.b32.xlu0 %v6952_v4, %s7301_s12  ;;  %v10024_v59 = vpop.permute.xlu2 %6843 }
 0x857   : > { %6958 = vrot.lane.b32.xlu1 %v6957_v21, %s7301_s12 }
 0x85e   : > { %6973 = vrot.lane.b32.xlu0 %v6972_v10, %s7301_s12  ;;  %v4273_v10 = vsel %vm657_vm12, %v10736_v43, %v6651_v37  ;;  %v10051_v15 = vpop.permute.xlu2 %6878 }
 0x85f   : > { %6963 = vrot.lane.b32.xlu1 %v6962_v45, %s7301_s12 }
 0x867   : > { %6978 = vrot.lane.b32.xlu1 %v6977_v5, %s7301_s12  ;;  %v4270_v5 = vsel %vm657_vm12, %v6640_v44, %v10737_v6 }
 0x881   : > { %v6849_v57 = vpop.permute.xlu1 %6848 }
 0x882   : > { %v6851_v2 = vunpack.i.h.bf16 %v6849_v57  ;;  %v6850_v29 = vunpack.i.l.bf16 %v6849_v57  ;;  %v10738_v57 = vunpack.i.l.bf16 %v9633_v16 }
 0x884   : > { %v4277_v8 = vsel %vm657_vm12, %v6850_v29, %v6851_v2  ;;  %v4269_v22 = vsel %vm657_vm12, %v10738_v57, %v6636_v42  ;;  %v6660_v42 = vunpack.i.l.bf16 %v9665_v36 }
 0x885   : > { %4329 = vmatpush.msrb.mxu3 %v4277_v8 }
 0x888   : > { %v6834_v19 = vpop.permute.xlu0 %6833 }
 0x889   : > { %v6836_v12 = vunpack.i.h.bf16 %v6834_v19  ;;  %v6835_v9 = vunpack.i.l.bf16 %v6834_v19  ;;  %v10020_v39 = vpop.permute.xlu1 %6853  ;;  %v6736_v19 = vunpack.i.h.bf16 %v9828_v26 }
 0x88b   : > { %v4276_v4 = vsel %vm657_vm12, %v6836_v12, %v6850_v29  ;;  %v4275_v21 = vsel %vm657_vm12, %v6656_v14, %v6835_v9  ;;  %v4210_v29 = vld [vmem:[#allocation12 + $0x10] sm:$0xff] }
 0x88c   : > { %4306 = vmatpush.msrb.mxu2 %v4276_v4  ;;  %4330 = vmatpush.msrb.mxu3 %v4275_v21  ;;  %v6675_v4 = vunpack.i.l.bf16 %v9681_v54  ;;  %v6686_v21 = vunpack.i.h.bf16 %v9685_v13 }
 0x88e   : > { %4307 = vmatpush.msrb.mxu2 %v4274_v53  ;;  %4331 = vmatpush.msrb.mxu3 %v4273_v10  ;;  %v10065_v53 = vpop.permute.xlu2 %6898  ;;  %v6671_v10 = vunpack.i.h.bf16 %v9667_v49 }
 0x890   : > { %v10032_v45 = vpop.permute.xlu0 %6838  ;;  %4308 = vmatpush.msrb.mxu2 %v9674_v62  ;;  %4332 = vmatpush.msrb.mxu3 %v9679_v52  ;;  %v10739_v62 = vunpack.i.h.bf16 %v9554_v31 }
 0x891   : > { %v10043_v2 = vpop.permute.xlu1 %6858 }
 0x892   : > { %4309 = vmatpush.msrb.mxu2 %v4270_v5  ;;  %4333 = vmatpush.msrb.mxu3 %v4269_v22  ;;  %v4266_v52 = vsel %vm657_vm12, %v6625_v60, %v10739_v62  ;;  %v10740_v5 = vunpack.i.l.bf16 %v9685_v13  ;;  %v10741_v22 = vunpack.i.h.bf16 %v9681_v54  ;;  %v6741_v62 = vunpack.i.h.bf16 %v9830_v0 }
 0x893   : > { %v6856_v54 = vunpack.i.h.bf16 %v10020_v39 }
 0x894   : > { %4310 = vmatpush.msrb.mxu2 %v9658_v27  ;;  %4334 = vmatpush.msrb.mxu3 %v9663_v35  ;;  %v6735_v27 = vunpack.i.l.bf16 %v9828_v26  ;;  %v4428_v57 = vsel %vm748_vm11, %v10740_v5, %v6686_v21 }
 0x895   : > { %5609 = vmatmul.msk.f32.vlgmr.msrb.gmra.mxu3 %vm4134_vm5, %v4210_v29 }
 0x896   : > { %4311 = vmatpush.msrb.mxu2 %v4266_v52  ;;  %v4429_v44 = vsel %vm748_vm11, %v6735_v27, %v6736_v19  ;;  %v6740_v52 = vunpack.i.l.bf16 %v9830_v0  ;;  %v6855_v27 = vunpack.i.l.bf16 %v10020_v39  ;;  %v10742_v0 = vunpack.i.l.bf16 %v9667_v49  ;;  %v10097_v21 = vpop.permute.xlu2 %6913 }
 0x897   : > { %5607 = vmatmul.msk.f32.vlgmr.msrb.gmra.mxu2 %vm4134_vm5, %v4210_v29  ;;  %v4425_v29 = vsel %vm748_vm11, %v6675_v4, %v10741_v22  ;;  %v6761_v39 = vunpack.i.h.bf16 %v9991_v24  ;;  %v6840_v49 = vunpack.i.l.bf16 %v10032_v45  ;;  %v6705_v4 = vunpack.i.l.bf16 %v9725_v34 }
 0x898   : > { %v6864_v16 = vpop.permute.xlu0 %6863 }
 0x899   : > { %v6866_v8 = vunpack.i.h.bf16 %v6864_v16  ;;  %v6884_v14 = vpop.permute.xlu1 %6883  ;;  %v6865_v31 = vunpack.i.l.bf16 %v6864_v16  ;;  %v4704_v5 = vsel %vm906_vm13, %v6761_v39, %v6840_v49 }
 0x89a   : > { %v6886_v35 = vunpack.i.h.bf16 %v6884_v14  ;;  %v6885_v37 = vunpack.i.l.bf16 %v6884_v14 }
 0x89b   : > { %v4430_v26 = vsel %vm748_vm11, %v6736_v19, %v6865_v31  ;;  %v6841_v19 = vunpack.i.h.bf16 %v10032_v45  ;;  %v4584_v31 = vsel %vm838_vm15, %v6740_v52, %v6741_v62  ;;  %v4706_v45 = vsel %vm906_vm13, %v6855_v27, %v6856_v54  ;;  %v4366_v54 = vld [vmem:[#allocation12 + $0x28] sm:$0xff] }
 0x89c   : > { %v4431_v12 = vsel %vm748_vm11, %v6866_v8, %v6885_v37  ;;  %v4432_v9 = vsel %vm748_vm11, %v6885_v37, %v6886_v35  ;;  %v6716_v35 = vunpack.i.h.bf16 %v9727_v20 }
 0x89d   : > { %5610 = vmatmul.msk.f32.gmra.mxu3 %vm4134_vm5, %v4211_v3  ;;  %4461 = vmatpush.msra.mxu0 %v4431_v12  ;;  %v4365_v12 = vld [vmem:[#allocation12 + $0x20] sm:$0xff] }
 0x89e   : > { %4484 = vmatpush.msra.mxu1 %v4432_v9  ;;  %v10151_v49 = vpop.permute.xlu2 %6918 }
 0x89f   : > { %5608 = vmatmul.msk.f32.gmra.mxu2 %vm4134_vm5, %v4211_v3  ;;  %4462 = vmatpush.msra.mxu0 %v4429_v44  ;;  %v4424_v3 = vsel %vm748_vm11, %v10742_v0, %v6671_v10  ;;  %v6756_v44 = vunpack.i.h.bf16 %v9869_v63  ;;  %v6745_v10 = vunpack.i.l.bf16 %v9833_v33  ;;  %v10752_v63 = vunpack.i.h.bf16 %v9833_v33  ;;  %v10755_v33 = vld [vmem:[#allocation60_spill] sm:$0xff] }
 0x8a0   : > { %v6869_v43 = vpop.permute.xlu0 %6868  ;;  %4485 = vmatpush.msra.mxu1 %v4430_v26 }
 0x8a1   : > { %v6871_v60 = vunpack.i.h.bf16 %v6869_v43  ;;  %v6889_v6 = vpop.permute.xlu1 %6888  ;;  %4463 = vmatpush.msra.mxu0 %v9704_v40  ;;  %v6870_v14 = vunpack.i.l.bf16 %v6869_v43  ;;  %v10744_v43 = vunpack.i.l.bf16 %v9727_v20  ;;  %v10748_v20 = vld [vmem:[#allocation46_spill] sm:$0xff]  ;;  %v4702_v52 = vsel %vm906_vm13, %v6755_v50, %v6756_v44 }
 0x8a2   : > { %v6891_v16 = vunpack.i.h.bf16 %v6889_v6  ;;  %v6890_v8 = vunpack.i.l.bf16 %v6889_v6  ;;  %4486 = vmatpush.msra.mxu1 %v4428_v57  ;;  %v10746_v57 = vld [vmem:[#allocation25_spill] sm:$0xff]  ;;  %v4699_v50 = vsel %vm906_vm13, %v6745_v10, %v10752_v63  ;;  %v6771_v44 = vunpack.i.h.bf16 %v9997_v18 }
 0x8a3   : > { %4464 = vmatpush.msra.mxu0 %v4425_v29  ;;  %v4585_v9 = vsel %vm838_vm15, %v6741_v62, %v6870_v14  ;;  %v6690_v22 = vunpack.i.l.bf16 %v10746_v57  ;;  %v10747_v29 = vunpack.i.h.bf16 %v9725_v34  ;;  %v6731_v14 = vunpack.i.h.bf16 %v9851_v48 }
 0x8a4   : > { %4487 = vmatpush.msra.mxu1 %v9709_v41  ;;  %v4586_v40 = vsel %vm838_vm15, %v6871_v60, %v6890_v8  ;;  %v4587_v13 = vsel %vm838_vm15, %v6890_v8, %v6891_v16  ;;  %v10743_v41 = vunpack.i.h.bf16 %v9665_v36  ;;  %v10745_v60 = vld [vmem:[#allocation31_spill] sm:$0xff]  ;;  %v10749_v16 = vunpack.i.l.bf16 %v9711_v7 }
 0x8a5   : > { %4465 = vmatpush.msra.mxu0 %v9690_v1  ;;  %4616 = vmatpush.msra.mxu2 %v4586_v40  ;;  %v6760_v1 = vunpack.i.l.bf16 %v9991_v24  ;;  %v4705_v24 = vsel %vm906_vm13, %v6841_v19, %v6855_v27  ;;  %v4580_v62 = vsel %vm838_vm15, %v6705_v4, %v10747_v29  ;;  %v6730_v34 = vunpack.i.l.bf16 %v9851_v48  ;;  %v10750_v40 = vld [vmem:[#allocation65_spill] sm:$0xff]  ;;  %v10751_v19 = vld [vmem:[#allocation30_spill] sm:$0xff]  ;;  %v10753_v48 = vld [vmem:[#allocation59_spill] sm:$0xff] }
 0x8a6   : > { %4488 = vmatpush.msra.mxu1 %v4424_v3  ;;  %4639 = vmatpush.msra.mxu3 %v4587_v13  ;;  %v4421_v37 = vsel %vm748_vm11, %v6660_v42, %v10743_v41  ;;  %v6701_v42 = vunpack.i.h.bf16 %v9711_v7  ;;  %v6726_v13 = vunpack.i.h.bf16 %v10750_v40  ;;  %v6915_v7 = vunpack.i.l.bf16 %v10097_v21  ;;  %v4520_v41 = vld [vmem:[#allocation12 + $0x30] sm:$0xff] }
 0x8a7   : > { %4466 = vmatpush.msra.mxu0 %v4421_v37  ;;  %4617 = vmatpush.msra.mxu2 %v4584_v31  ;;  %v4703_v6 = vsel %vm906_vm13, %v6760_v1, %v6761_v39  ;;  %v10754_v3 = vunpack.i.h.bf16 %v10746_v57  ;;  %v6720_v37 = vunpack.i.l.bf16 %v10755_v33  ;;  %v10756_v31 = vld [vmem:[#allocation42_spill] sm:$0xff]  ;;  %v6766_v39 = vunpack.i.h.bf16 %v9898_v25 }
 0x8a8   : > { %v10099_v36 = vpop.permute.xlu0 %6873  ;;  %4489 = vmatpush.msra.mxu1 %v9695_v61  ;;  %4640 = vmatpush.msra.mxu3 %v4585_v9  ;;  %v4583_v61 = vsel %vm838_vm15, %v10744_v43, %v6716_v35  ;;  %v4579_v8 = vsel %vm838_vm15, %v10749_v16, %v6701_v42  ;;  %v6765_v1 = vunpack.i.l.bf16 %v9898_v25  ;;  %v4697_v4 = vsel %vm906_vm13, %v6726_v13, %v6730_v34  ;;  %v4521_v16 = vld [vmem:[#allocation12 + $0x38] sm:$0xff] }
 0x8a9   : > { %5611 = vmatmul.msk.f32.vlgmr.msra.gmra.mxu0 %vm4134_vm5, %v4365_v12  ;;  %5613 = vmatmul.msk.f32.vlgmr.msra.gmra.mxu1 %vm4134_vm5, %v4365_v12  ;;  %v10107_v26 = vpop.permute.xlu1 %6893  ;;  %v6875_v27 = vunpack.i.l.bf16 %v10099_v36  ;;  %v4576_v35 = vsel %vm838_vm15, %v6690_v22, %v10754_v3  ;;  %v6876_v9 = vunpack.i.h.bf16 %v10099_v36  ;;  %v6770_v25 = vunpack.i.l.bf16 %v9997_v18 }
 0x8aa   : > { %4735 = vmatpush.msrb.mxu0 %v4705_v24  ;;  %4758 = vmatpush.msrb.mxu1 %v4706_v45  ;;  %v6786_v45 = vunpack.i.h.bf16 %v10004_v17  ;;  %v6785_v42 = vunpack.i.l.bf16 %v10004_v17  ;;  %v10757_v43 = vunpack.i.h.bf16 %v10755_v33  ;;  %v6775_v10 = vunpack.i.l.bf16 %v9754_v55  ;;  %v4657_v17 = vld [vmem:[#allocation12 + $0x40] sm:$0xff] }
 0x8ab   : > { %4618 = vmatpush.msra.mxu2 %v10745_v60  ;;  %4641 = vmatpush.msra.mxu3 %v4583_v61  ;;  %v6781_v18 = vunpack.i.h.bf16 %v9917_v32  ;;  %v10758_v60 = vld [vmem:[#allocation47_spill] sm:$0xff]  ;;  %v4856_v22 = vsel %vm995_vm0, %v6770_v25, %v6771_v44  ;;  %v6801_v63 = vunpack.i.h.bf16 %v10002_v38  ;;  %v6800_v32 = vunpack.i.l.bf16 %v10002_v38 }
 0x8ac   : > { %4736 = vmatpush.msrb.mxu0 %v4703_v6  ;;  %4759 = vmatpush.msrb.mxu1 %v4704_v5  ;;  %v4695_v61 = vsel %vm906_vm13, %v6720_v37, %v10757_v43  ;;  %v4858_v6 = vsel %vm995_vm0, %v6876_v9, %v6765_v1  ;;  %v4859_v5 = vsel %vm995_vm0, %v6765_v1, %v6766_v39  ;;  %v6895_v3 = vunpack.i.l.bf16 %v10107_v26  ;;  %v10762_v39 = vld [vmem:[#allocation68_spill] sm:$0xff] }
 0x8ad   : > { %4619 = vmatpush.msra.mxu2 %v4580_v62  ;;  %4642 = vmatpush.msra.mxu3 %v10748_v20  ;;  %v4857_v29 = vsel %vm995_vm0, %v6771_v44, %v6775_v10  ;;  %v10759_v62 = vld [vmem:[#allocation70_spill] sm:$0xff]  ;;  %v10760_v20 = vld [vmem:[#allocation49_spill] sm:$0xff]  ;;  %v4855_v40 = vsel %vm995_vm0, %v6780_v58, %v6781_v18  ;;  %v6881_v58 = vunpack.i.h.bf16 %v10051_v15  ;;  %v6811_v38 = vunpack.i.h.bf16 %v10000_v47  ;;  %v4658_v44 = vld [vmem:[#allocation12 + $0x48] sm:$0xff] }
 0x8ae   : > { %4737 = vmatpush.msrb.mxu0 %v9890_v46  ;;  %4760 = vmatpush.msrb.mxu1 %v4702_v52  ;;  %v6916_v46 = vunpack.i.h.bf16 %v10097_v21  ;;  %v4698_v21 = vsel %vm906_vm13, %v6730_v34, %v6731_v14  ;;  %v6790_v55 = vunpack.i.l.bf16 %v10759_v62  ;;  %v6796_v52 = vunpack.i.h.bf16 %v10760_v20 }
 0x8af   : > { %4620 = vmatpush.msra.mxu2 %v10751_v19  ;;  %4643 = vmatpush.msra.mxu3 %v4579_v8  ;;  %v4852_v8 = vsel %vm995_vm0, %v6785_v42, %v6786_v45  ;;  %v6880_v34 = vunpack.i.l.bf16 %v10051_v15  ;;  %v6846_v15 = vunpack.i.h.bf16 %v10024_v59  ;;  %v6900_v37 = vunpack.i.l.bf16 %v10065_v53 }
 0x8b0   : > { %v10139_v0 = vpop.permute.xlu0 %6903  ;;  %4738 = vmatpush.msrb.mxu0 %v4699_v50  ;;  %4761 = vmatpush.msrb.mxu1 %v10753_v48  ;;  %v4860_v36 = vsel %vm995_vm0, %v6915_v7, %v6916_v46  ;;  %v4861_v24 = vsel %vm995_vm0, %v6916_v46, %v6875_v27  ;;  %v6861_v50 = vunpack.i.h.bf16 %v10043_v2  ;;  %v4853_v46 = vsel %vm995_vm0, %v6786_v45, %v6790_v55  ;;  %v10194_v7 = vpop.permute.xlu2 %6928 }
 0x8b1   : > { %4621 = vmatpush.msra.mxu2 %v4576_v35  ;;  %4644 = vmatpush.msra.mxu3 %v10756_v31  ;;  %v10147_v12 = vpop.permute.xlu1 %6908  ;;  %v6901_v35 = vunpack.i.h.bf16 %v10065_v53  ;;  %v6905_v31 = vunpack.i.l.bf16 %v10139_v0  ;;  %v6806_v9 = vunpack.i.h.bf16 %v10010_v28  ;;  %v5014_v53 = vsel %vm1084_vm14, %v6800_v32, %v6801_v63 }
 0x8b2   : > { %5612 = vmatmul.msk.f32.gmra.mxu0 %vm4134_vm5, %v4366_v54  ;;  %5614 = vmatmul.msk.f32.gmra.mxu1 %vm4134_vm5, %v4366_v54  ;;  %v6860_v54 = vunpack.i.l.bf16 %v10043_v2  ;;  %v6845_v2 = vunpack.i.l.bf16 %v10024_v59  ;;  %v6810_v59 = vunpack.i.l.bf16 %v10000_v47  ;;  %v6805_v25 = vunpack.i.l.bf16 %v10010_v28  ;;  %v4794_v28 = vld [vmem:[#allocation12 + $0x50] sm:$0xff] }
 0x8b3   : > { %5615 = vmatmul.msk.f32.vlgmr.msra.gmra.mxu2 %vm4134_vm5, %v4520_v41  ;;  %5617 = vmatmul.msk.f32.vlgmr.msra.gmra.mxu3 %vm4134_vm5, %v4520_v41  ;;  %v10761_v41 = vunpack.i.l.bf16 %v10760_v20  ;;  %v6815_v43 = vunpack.i.l.bf16 %v10008_v56  ;;  %v6911_v10 = vunpack.i.h.bf16 %v10147_v12  ;;  %v6910_v18 = vunpack.i.l.bf16 %v10147_v12 }
 0x8b4   : > { %4739 = vmatpush.msrb.mxu0 %v4697_v4  ;;  %4762 = vmatpush.msrb.mxu1 %v4698_v21  ;;  %v5135_v1 = vsel %vm1152_vm1, %v6861_v50, %v6845_v2  ;;  %v5013_v21 = vsel %vm1084_vm14, %v6881_v58, %v6800_v32  ;;  %v5011_v62 = vsel %vm1084_vm14, %v6805_v25, %v6806_v9  ;;  %v6831_v20 = vunpack.i.h.bf16 %v10012_v30  ;;  %v4795_v58 = vld [vmem:[#allocation12 + $0x58] sm:$0xff] }
 0x8b5   : > { %4890 = vmatpush.msrb.mxu2 %v4860_v36  ;;  %4913 = vmatpush.msrb.mxu3 %v4861_v24  ;;  %v4851_v33 = vsel %vm995_vm0, %v10761_v41, %v6796_v52  ;;  %v6816_v36 = vunpack.i.h.bf16 %v10008_v56  ;;  %v5132_v24 = vsel %vm1152_vm1, %v6846_v15, %v6895_v3  ;;  %v6825_v56 = vunpack.i.l.bf16 %v10006_v11 }
 0x8b6   : > { %4740 = vmatpush.msrb.mxu0 %v4695_v61  ;;  %4763 = vmatpush.msrb.mxu1 %v10758_v60  ;;  %v6906_v61 = vunpack.i.h.bf16 %v10139_v0  ;;  %v6921_v60 = vunpack.i.h.bf16 %v10151_v49  ;;  %v5012_v55 = vsel %vm1084_vm14, %v6806_v9, %v6810_v59  ;;  %v6930_v32 = vunpack.i.l.bf16 %v10194_v7 }
 0x8b7   : > { %4891 = vmatpush.msrb.mxu2 %v4858_v6  ;;  %4914 = vmatpush.msrb.mxu3 %v4859_v5  ;;  %v6920_v6 = vunpack.i.l.bf16 %v10151_v49  ;;  %v5130_v5 = vsel %vm1152_vm1, %v6900_v37, %v6901_v35  ;;  %v6820_v49 = vunpack.i.l.bf16 %v10014_v51  ;;  %v6931_v37 = vunpack.i.h.bf16 %v10194_v7  ;;  %v5086_v7 = vld [vmem:[#allocation12 + $0x70] sm:$0xff] }
 0x8b8   : > { %v10174_v57 = vpop.permute.xlu0 %6923  ;;  %v10243_v52 = vpop.permute.xlu2 %6948 }
 0x8b9   : > { %4892 = vmatpush.msrb.mxu2 %v4856_v22  ;;  %4915 = vmatpush.msrb.mxu3 %v4857_v29  ;;  %v6939_v14 = vpop.permute.xlu1 %6938  ;;  %v6925_v0 = vunpack.i.l.bf16 %v10174_v57  ;;  %v6821_v29 = vunpack.i.h.bf16 %v10014_v51  ;;  %v5129_v51 = vsel %vm1152_vm1, %v6910_v18, %v6911_v10  ;;  %v6951_v41 = vunpack.i.h.bf16 %v10243_v52 }
 0x8ba   : > { %5619 = vmatmul.msk.f32.vlgmr.msrb.gmra.mxu0 %vm4134_vm5, %v4657_v17  ;;  %5621 = vmatmul.msk.f32.vlgmr.msrb.gmra.mxu1 %vm4134_vm5, %v4657_v17  ;;  %v6941_v13 = vunpack.i.h.bf16 %v6939_v14  ;;  %v6940_v19 = vunpack.i.l.bf16 %v6939_v14  ;;  %v5131_v17 = vsel %vm1152_vm1, %v6901_v35, %v6905_v31  ;;  %v6830_v14 = vunpack.i.l.bf16 %v10012_v30 }
 0x8bb   : > { %4893 = vmatpush.msrb.mxu2 %v9931_v23  ;;  %4916 = vmatpush.msrb.mxu3 %v4855_v40  ;;  %v6896_v23 = vunpack.i.h.bf16 %v10107_v26  ;;  %v5134_v26 = vsel %vm1152_vm1, %v6860_v54, %v6861_v50  ;;  %v5010_v40 = vsel %vm1084_vm14, %v6815_v43, %v6816_v36  ;;  %v6826_v30 = vunpack.i.h.bf16 %v10006_v11 }
 0x8bc   : > { %5616 = vmatmul.msk.f32.gmra.mxu2 %vm4134_vm5, %v4521_v16  ;;  %5618 = vmatmul.msk.f32.gmra.mxu3 %vm4134_vm5, %v4521_v16  ;;  %v5015_v27 = vsel %vm1084_vm14, %v6940_v19, %v6941_v13  ;;  %v5016_v48 = vsel %vm1084_vm14, %v6941_v13, %v6880_v34  ;;  %v6926_v16 = vunpack.i.h.bf16 %v10174_v57  ;;  %v5009_v34 = vsel %vm1084_vm14, %v6811_v38, %v6815_v43 }
 0x8bd   : > { %4894 = vmatpush.msrb.mxu2 %v4852_v8  ;;  %4917 = vmatpush.msrb.mxu3 %v4853_v46  ;;  %v5133_v45 = vsel %vm1152_vm1, %v6895_v3, %v6896_v23  ;;  %v5128_v8 = vsel %vm1152_vm1, %v6906_v61, %v6910_v18  ;;  %v5126_v13 = vsel %vm1152_vm1, %v6920_v6, %v6921_v60  ;;  %v4949_v23 = vld [vmem:[#allocation12 + $0x60] sm:$0xff]  ;;  %v5087_v6 = vld [vmem:[#allocation12 + $0x78] sm:$0xff] }
 0x8be   : > { %5045 = vmatpush.msra.mxu0 %v5015_v27  ;;  %5068 = vmatpush.msra.mxu1 %v5016_v48  ;;  %v5127_v57 = vsel %vm1152_vm1, %v6921_v60, %v6925_v0  ;;  %v5007_v47 = vsel %vm1084_vm14, %v6820_v49, %v6821_v29  ;;  %v5008_v54 = vsel %vm1084_vm14, %v6821_v29, %v6825_v56  ;;  %v4158_v29 = vpop.f32.mrf.mxu0  ;;  %v4181_v49 = vpop.f32.mrf.mxu1 }
 0x8bf   : > { %4895 = vmatpush.msrb.mxu2 %v10762_v39  ;;  %4918 = vmatpush.msrb.mxu3 %v4851_v33  ;;  %v5005_v2 = vsel %vm1084_vm14, %v6826_v30, %v6830_v14  ;;  %v5006_v11 = vsel %vm1084_vm14, %v6830_v14, %v6831_v20  ;;  %v6950_v33 = vunpack.i.l.bf16 %v10243_v52 }
 0x8c0   : > { %v6934_v4 = vpop.permute.xlu0 %6933  ;;  %5046 = vmatpush.msra.mxu0 %v5013_v21  ;;  %5069 = vmatpush.msra.mxu1 %v5014_v53  ;;  %v6969_v39 = vpop.permute.xlu2 %6968 }
 0x8c1   : > { %5164 = vmatpush.msra.mxu2 %v5134_v26  ;;  %5187 = vmatpush.msra.mxu3 %v5135_v1  ;;  %v10222_v42 = vpop.permute.xlu1 %6943  ;;  %v6936_v12 = vunpack.i.h.bf16 %v6934_v4  ;;  %v6935_v22 = vunpack.i.l.bf16 %v6934_v4  ;;  %v5285_v4 = vsel %vm1240_vm2, %v6950_v33, %v6951_v41  ;;  %v6971_v36 = vunpack.i.h.bf16 %v6969_v39 }
 0x8c2   : > { %5620 = vmatmul.msk.f32.gmra.mxu0 %vm4134_vm5, %v4658_v44  ;;  %5622 = vmatmul.msk.f32.gmra.mxu1 %vm4134_vm5, %v4658_v44  ;;  %v6946_v3 = vunpack.i.h.bf16 %v10222_v42  ;;  %v6945_v38 = vunpack.i.l.bf16 %v10222_v42 }
 0x8c3   : > { %5165 = vmatpush.msra.mxu2 %v5132_v24  ;;  %5188 = vmatpush.msra.mxu3 %v5133_v45  ;;  %v5124_v63 = vsel %vm1152_vm1, %v6926_v16, %v6935_v22  ;;  %v5125_v50 = vsel %vm1152_vm1, %v6935_v22, %v6936_v12  ;;  %v4950_v24 = vld [vmem:[#allocation12 + $0x68] sm:$0xff]  ;;  %v6970_v45 = vunpack.i.l.bf16 %v6969_v39  ;;  %v5223_v12 = vld [vmem:[#allocation12 + $0x80] sm:$0xff] }
 0x8c4   : > { %5623 = vmatmul.msk.f32.vlgmr.msrb.gmra.mxu2 %vm4134_vm5, %v4794_v28  ;;  %5625 = vmatmul.msk.f32.vlgmr.msrb.gmra.mxu3 %vm4134_vm5, %v4794_v28  ;;  %v5287_v26 = vsel %vm1240_vm2, %v6931_v37, %v6945_v38  ;;  %v5288_v1 = vsel %vm1240_vm2, %v6945_v38, %v6946_v3  ;;  %v5224_v22 = vld [vmem:[#allocation12 + $0x88] sm:$0xff] }
 0x8c5   : > { %5166 = vmatpush.msra.mxu2 %v5130_v5  ;;  %5189 = vmatpush.msra.mxu3 %v5131_v17  ;;  %v5281_v10 = vsel %vm1240_vm2, %v6970_v45, %v6971_v36 }
 0x8c6   : > { %5047 = vmatpush.msra.mxu0 %v5011_v62  ;;  %5070 = vmatpush.msra.mxu1 %v5012_v55  ;;  %v4161_v62 = vpop.f32.mrf.mxu0  ;;  %v4184_v55 = vpop.f32.mrf.mxu1 }
 0x8c7   : > { %5167 = vmatpush.msra.mxu2 %v5128_v8  ;;  %5190 = vmatpush.msra.mxu3 %v5129_v51 }
 0x8c8   : > { %v6954_v19 = vpop.permute.xlu0 %6953  ;;  %5048 = vmatpush.msra.mxu0 %v5009_v34  ;;  %5071 = vmatpush.msra.mxu1 %v5010_v40 }
 0x8c9   : > { %5168 = vmatpush.msra.mxu2 %v5126_v13  ;;  %5191 = vmatpush.msra.mxu3 %v5127_v57  ;;  %v6959_v46 = vpop.permute.xlu1 %6958  ;;  %v6955_v31 = vunpack.i.l.bf16 %v6954_v19  ;;  %v6956_v21 = vunpack.i.h.bf16 %v6954_v19 }
 0x8ca   : > { %5049 = vmatpush.msra.mxu0 %v5007_v47  ;;  %5072 = vmatpush.msra.mxu1 %v5008_v54  ;;  %v6961_v27 = vunpack.i.h.bf16 %v6959_v46  ;;  %v6960_v48 = vunpack.i.l.bf16 %v6959_v46 }
 0x8cb   : > { %5169 = vmatpush.msra.mxu2 %v5124_v63  ;;  %5192 = vmatpush.msra.mxu3 %v5125_v50  ;;  %v5286_v25 = vsel %vm1240_vm2, %v6951_v41, %v6955_v31  ;;  %v10764_v31 = vld [vmem:[#allocation23_spill] sm:$0xff] }
 0x8cc   : > { %5050 = vmatpush.msra.mxu0 %v5005_v2  ;;  %5073 = vmatpush.msra.mxu1 %v5006_v11  ;;  %v5289_v15 = vsel %vm1240_vm2, %v6960_v48, %v6961_v27  ;;  %v5290_v35 = vsel %vm1240_vm2, %v6961_v27, %v6930_v32  ;;  %v4189_v39 = vadd.f32 %v4161_v62, %v10764_v31 }
 0x8cd   : > { %5624 = vmatmul.msk.f32.gmra.mxu2 %vm4134_vm5, %v4795_v58  ;;  %5626 = vmatmul.msk.f32.gmra.mxu3 %vm4134_vm5, %v4795_v58  ;;  %v10763_v58 = vld [vmem:[#allocation26_spill] sm:$0xff] }
 0x8ce   : > { %5627 = vmatmul.msk.f32.vlgmr.msra.gmra.mxu0 %vm4134_vm5, %v4949_v23  ;;  %5629 = vmatmul.msk.f32.vlgmr.msra.gmra.mxu1 %vm4134_vm5, %v4949_v23  ;;  %v4187_v27 = vadd.f32 %v4158_v29, %v10763_v58  ;;  %v4188_v48 = vadd.f32 %v4181_v49, %v10763_v58 }
 0x8cf   : > { %5319 = vmatpush.msrb.mxu0 %v5289_v15  ;;  %5342 = vmatpush.msrb.mxu1 %v5290_v35 }
 0x8d0   : > { %v6974_v59 = vpop.permute.xlu0 %6973 }
 0x8d1   : > { %5320 = vmatpush.msrb.mxu0 %v5287_v26  ;;  %5343 = vmatpush.msrb.mxu1 %v5288_v1  ;;  %v6964_v9 = vpop.permute.xlu1 %6963  ;;  %v6975_v42 = vunpack.i.l.bf16 %v6974_v59  ;;  %v6976_v60 = vunpack.i.h.bf16 %v6974_v59  ;;  %v4190_v26 = vadd.f32 %v4184_v55, %v10764_v31 }
 0x8d2   : > { %v6966_v53 = vunpack.i.h.bf16 %v6964_v9  ;;  %v6965_v44 = vunpack.i.l.bf16 %v6964_v9 }
 0x8d3   : > { %5321 = vmatpush.msrb.mxu0 %v5285_v4  ;;  %5344 = vmatpush.msrb.mxu1 %v5286_v25  ;;  %v5282_v18 = vsel %vm1240_vm2, %v6971_v36, %v6975_v42 }
 0x8d4   : > { %v5283_v43 = vsel %vm1240_vm2, %v6956_v21, %v6965_v44  ;;  %v5284_v61 = vsel %vm1240_vm2, %v6965_v44, %v6966_v53 }
 0x8d5   : > { %5631 = vmatmul.msk.f32.vlgmr.msra.gmra.mxu2 %vm4134_vm5, %v5086_v7  ;;  %5633 = vmatmul.msk.f32.vlgmr.msra.gmra.mxu3 %vm4134_vm5, %v5086_v7 }
 0x8d6   : > { %5628 = vmatmul.msk.f32.gmra.mxu0 %vm4134_vm5, %v4950_v24  ;;  %5630 = vmatmul.msk.f32.gmra.mxu1 %vm4134_vm5, %v4950_v24 }
 0x8d7   : > { %5322 = vmatpush.msrb.mxu0 %v5283_v43  ;;  %5345 = vmatpush.msrb.mxu1 %v5284_v61 }
 0x8d9   : > { %5323 = vmatpush.msrb.mxu0 %v5281_v10  ;;  %5346 = vmatpush.msrb.mxu1 %v5282_v18  ;;  %v6979_v28 = vpop.permute.xlu1 %6978 }
 0x8da   : > { %v6981_v5 = vunpack.i.h.bf16 %v6979_v28  ;;  %v6980_v17 = vunpack.i.l.bf16 %v6979_v28 }
 0x8dc   : > { %v5279_v56 = vsel %vm1240_vm2, %v6976_v60, %v6980_v17  ;;  %v5280_v0 = vsel %vm1240_vm2, %v6980_v17, %v6981_v5 }
 0x8dd   : > { %5632 = vmatmul.msk.f32.gmra.mxu2 %vm4134_vm5, %v5087_v6  ;;  %5634 = vmatmul.msk.f32.gmra.mxu3 %vm4134_vm5, %v5087_v6 }
 0x8de   : > { %5324 = vmatpush.msrb.mxu0 %v5279_v56  ;;  %5347 = vmatpush.msrb.mxu1 %v5280_v0 }
 0x8df   : > { %5635 = vmatmul.msk.f32.vlgmr.msrb.gmra.mxu0 %vm4134_vm5, %v5223_v12  ;;  %5637 = vmatmul.msk.f32.vlgmr.msrb.gmra.mxu1 %vm4134_vm5, %v5223_v12 }
 0x8e7   : > { %5636 = vmatmul.msk.f32.gmra.mxu0 %vm4134_vm5, %v5224_v22  ;;  %5638 = vmatmul.msk.f32.gmra.mxu1 %vm4134_vm5, %v5224_v22 }
 0x918   : > { %v4336_v52 = vpop.f32.mrf.mxu3 }
 0x919   : > { %v4343_v11 = vadd.f32 %v4336_v52, %v4188_v48 }
 0x91a   : > { %v4313_v20 = vpop.f32.mrf.mxu2 }
 0x91b   : > { %v4342_v2 = vadd.f32 %v4313_v20, %v4187_v27 }
 0x920   : > { %v4339_v14 = vpop.f32.mrf.mxu3 }
 0x921   : > { %v4345_v59 = vadd.f32 %v4339_v14, %v4190_v26 }
 0x922   : > { %v4316_v51 = vpop.f32.mrf.mxu2 }
 0x923   : > { %v4344_v1 = vadd.f32 %v4316_v51, %v4189_v39  ;;  %v7014_v51 = vld [vmem:[%s7492_s14 + $0x8] sm:$0xff] }
 0x926   : > { %v4468_v16 = vpop.f32.mrf.mxu0  ;;  %v4491_v8 = vpop.f32.mrf.mxu1 }
 0x927   : > { %v4497_v38 = vadd.f32 %v4468_v16, %v4342_v2  ;;  %v4498_v15 = vadd.f32 %v4491_v8, %v4343_v11  ;;  %v7013_v16 = vld [vmem:[%s7492_s14] sm:$0xff] }
 0x92f   : > { %v4471_v34 = vpop.f32.mrf.mxu0  ;;  %v4494_v40 = vpop.f32.mrf.mxu1 }
 0x930   : > { %v4499_v53 = vadd.f32 %v4471_v34, %v4344_v1  ;;  %v4500_v44 = vadd.f32 %v4494_v40, %v4345_v59 }
 0x936   : > { %v4623_v13 = vpop.f32.mrf.mxu2  ;;  %v4646_v19 = vpop.f32.mrf.mxu3 }
 0x937   : > { %v4742_v57 = vpop.f32.mrf.mxu0  ;;  %v4765_v63 = vpop.f32.mrf.mxu1  ;;  %v4652_v35 = vadd.f32 %v4623_v13, %v4497_v38  ;;  %v4653_v41 = vadd.f32 %v4646_v19, %v4498_v15 }
 0x939   : > { %v4771_v9 = vadd.f32 %v4742_v57, %v4652_v35  ;;  %v4772_v4 = vadd.f32 %v4765_v63, %v4653_v41 }
 0x93f   : > { %v4626_v50 = vpop.f32.mrf.mxu2  ;;  %v4649_v30 = vpop.f32.mrf.mxu3 }
 0x940   : > { %v4745_v47 = vpop.f32.mrf.mxu0  ;;  %v4768_v54 = vpop.f32.mrf.mxu1  ;;  %v4654_v24 = vadd.f32 %v4626_v50, %v4499_v53  ;;  %v4655_v45 = vadd.f32 %v4649_v30, %v4500_v44 }
 0x942   : > { %v4773_v18 = vadd.f32 %v4745_v47, %v4654_v24  ;;  %v4774_v28 = vadd.f32 %v4768_v54, %v4655_v45  ;;  %v7015_v47 = vld [vmem:[%s7492_s14 + $0x10] sm:$0xff] }
 0x947   : > { %v4897_v46 = vpop.f32.mrf.mxu2  ;;  %v4920_v32 = vpop.f32.mrf.mxu3 }
 0x948   : > { %v4926_v25 = vadd.f32 %v4897_v46, %v4771_v9  ;;  %v4927_v36 = vadd.f32 %v4920_v32, %v4772_v4  ;;  %v7016_v46 = vld [vmem:[%s7492_s14 + $0x18] sm:$0xff] }
 0x94b   : > { %v5052_v23 = vpop.f32.mrf.mxu0  ;;  %v5075_v3 = vpop.f32.mrf.mxu1 }
 0x94c   : > { %v5081_v61 = vadd.f32 %v5052_v23, %v4926_v25  ;;  %v5082_v10 = vadd.f32 %v5075_v3, %v4927_v36 }
 0x950   : > { %v4900_v33 = vpop.f32.mrf.mxu2  ;;  %v4923_v37 = vpop.f32.mrf.mxu3 }
 0x951   : > { %v4928_v56 = vadd.f32 %v4900_v33, %v4773_v18  ;;  %v4929_v0 = vadd.f32 %v4923_v37, %v4774_v28 }
 0x953   : > { %v5055_v21 = vpop.f32.mrf.mxu0  ;;  %v5078_v7 = vpop.f32.mrf.mxu1 }
 0x954   : > { %v5083_v20 = vadd.f32 %v5055_v21, %v4928_v56  ;;  %v5084_v52 = vadd.f32 %v5078_v7, %v4929_v0 }
 0x958   : > { %v5171_v42 = vpop.f32.mrf.mxu2  ;;  %v5194_v43 = vpop.f32.mrf.mxu3 }
 0x959   : > { %v5200_v60 = vadd.f32 %v5171_v42, %v5081_v61  ;;  %v5201_v6 = vadd.f32 %v5194_v43, %v5082_v10 }
 0x95c   : > { %v5326_v5 = vpop.f32.mrf.mxu0  ;;  %v5349_v17 = vpop.f32.mrf.mxu1 }
 0x95d   : > { %v5355_v12 = vadd.f32 %v5326_v5, %v5200_v60  ;;  %v5356_v22 = vadd.f32 %v5349_v17, %v5201_v6 }
 0x95f   : > { %v5359_v29 = vmul.f32 0.2, %v5355_v12  ;;  %v5360_v49 = vmul.f32 0.2, %v5356_v22 }
 0x960   : > { %v5174_v62 = vpop.f32.mrf.mxu2  ;;  %v5197_v55 = vpop.f32.mrf.mxu3 }
 0x961   : > { %v5363_v8 = vadd.f32 %v7013_v16, %v5359_v29  ;;  %v5364_v14 = vadd.f32 %v7014_v51, %v5360_v49  ;;  %v5202_v34 = vadd.f32 %v5174_v62, %v5083_v20  ;;  %v5203_v40 = vadd.f32 %v5197_v55, %v5084_v52 }
 0x963   : > { %5367 = vst [vmem:[%s489_s15] sm:$0xff] %v5363_v8 }
 0x964   : > { %5368 = vst [vmem:[%s489_s15 + $0x8] sm:$0xff] %v5364_v14  ;;  %v5329_v13 = vpop.f32.mrf.mxu0  ;;  %v5352_v19 = vpop.f32.mrf.mxu1 }
 0x965   : > { %v5357_v57 = vadd.f32 %v5329_v13, %v5202_v34  ;;  %v5358_v63 = vadd.f32 %v5352_v19, %v5203_v40 }
 0x967   : > { %v5361_v50 = vmul.f32 0.2, %v5357_v57  ;;  %v5362_v30 = vmul.f32 0.2, %v5358_v63 }
 0x969   : > { %v5365_v54 = vadd.f32 %v7015_v47, %v5361_v50  ;;  %v5366_v32 = vadd.f32 %v7016_v46, %v5362_v30 }
 0x96b   : > { %5369 = vst [vmem:[%s489_s15 + $0x10] sm:$0xff] %v5365_v54 }
 0x96c   : > { %5370 = vst [vmem:[%s489_s15 + $0x18] sm:$0xff] %v5366_v32 }
 0x96d   : > { %7224 = shalt.err (!%p7221_p9)
}
 0x96e   : > { %s7302_s13 = smov 256   ;;  %s10765_s14 = smov 16  }
 0x96f   : > { %5668 = dma.vmem_to_hbm [thread:$0]  (%p7453_p0), %s5385_s26, 512, %s5387_s24, %s5372_s5, %s7302_s13, %s7302_s13, %s10765_s14  }
 0x970 PF: > { %s5401_s2 = sand.u32 1, %s7263_s17   ;;  %p10766_p10 = scmp.ge.s32.totalorder %s7275_s20, 2 }
 0x971   : > { %s5402_s15 = scalar_lea.sflag [#allocation5], %s5401_s2 }
 0x972   : > { %p5691_p11 = pnand %p10766_p10, %p7459_p6 }
 0x974   : > { %p5692_p12 = pneg %p5691_p11 }
 0x976   : > { %7258 = dma.done.wait (%p5692_p12), %s5402_s15, 512  }
 0x977   : > { %7260 = vsyncadd (%p5692_p12), %s5402_s15, 4294966784  ;;  %s10767_s16 = sld [smem:[#allocation20_spill]]  ;;  %p27_p2 = scmp.ge.s32.totalorder %s7429_s28, 4  }
 0x978   : > { %s10768_s17 = smov %s7267_s18  ;;  %s10769_s18 = smov %s7271_s19 }
 0x979   : > { %s10771_s20 = smov %s7429_s28  ;;  %29 = sbr.rel (!%p27_p2) target bundleno = 14 (0xe), region = 169 }
 0x97d   : > { %s10770_s19 = smov %s10767_s16 }
 0x97e   :  { %5408 = vsyncpa [#allocation4], 1 }
 0x97f   :  { %5410 = vsyncpa [#allocation4 + $0x1], 1 }
 0x980   :  { %5411 = vsyncpa [#allocation7], 1 }
 0x981   :  { %5412 = vsyncpa [#allocation10], 1 }
 0x982   :  { %5413 = vsyncpa [#allocation13], 1 }
 0x983   :  { %5414 = vsyncpa [#allocation5], 1 }
 0x984   :  { %5416 = vsyncpa [#allocation5 + $0x1], 1 }

</bundles_post_ra>
